<compile_context>
chip_gen: v7x
topology: tpu7x:2x2x1
jax: 0.10.0
libtpu: 0.0.40
codegen_flags: <defaults>
</compile_context>

<pallas_src>
import numpy as np
import jax
import jax.numpy as jnp
from jax.experimental import pallas as pl
from jax.experimental.pallas import tpu as pltpu


def encdec_lstm_kernel(x2d_ref,
                       wx_e_ref, wh_e_ref, b_e_ref,
                       wy_d_ref, wcdh_d_ref, b_d_ref,
                       wout_ref, bout_ref,
                       out_ref):
    f32 = jnp.float32
    bf16 = jnp.bfloat16

    B, TL = out_ref.shape
    H = wh_e_ref.shape[0]
    H4 = 4 * H
    TB = x2d_ref.shape[0]
    T = TB // B

    # ---- Hoist all weight / bias loads and broadcasts out of the unrolled loops ----
    Wxe = wx_e_ref[...]                                   # [I, 4H]  bf16
    Whe = wh_e_ref[...]                                   # [H, 4H]  bf16
    Wcdh = wcdh_d_ref[...]                                # [2H, 4H] bf16 (fused [ctx | dh] weights)
    Wyd = jnp.broadcast_to(wy_d_ref[...], (B, H4))        # [B, 4H]  f32
    Bd = jnp.broadcast_to(b_d_ref[...], (B, H4))          # [B, 4H]  f32
    Wout = jnp.broadcast_to(wout_ref[...], (B, H))        # [B, H]   f32
    Bout = jnp.broadcast_to(bout_ref[...], (B, 1))        # [B, 1]   f32

    def split_gates(z):                                   # z: [B, 4H] f32, packed (i, f, o, g)
        sig = jax.nn.sigmoid(z[:, :3 * H])                # one sigmoid over 3H lanes
        g_g = jnp.tanh(z[:, 3 * H:])                      # one tanh over H lanes
        return sig[:, 0 * H:1 * H], sig[:, 1 * H:2 * H], sig[:, 2 * H:3 * H], g_g

    # ---- Encoder: input projection hoisted out of the h->h critical path, bias folded in ----
    # x2d rows are time-major: row t*B + b, so xg_all[t*B:(t+1)*B] is the step-t slice.
    xg_all = (jnp.dot(x2d_ref[...], Wxe, preferred_element_type=f32)
              + jnp.broadcast_to(b_e_ref[...], (TB, H4)))               # [T*B, 4H] f32
    # NOTE: 2-row per-step slices cost a small sublane shuffle; XLU has slack here (review: low prio).

    h = jnp.zeros((B, H), f32)
    c = jnp.zeros((B, H), f32)
    hs = []                                               # encoder hidden states stay in vregs
    for t in range(T):                                    # fully unrolled (small static T)
        z = (xg_all[t * B:(t + 1) * B, :]
             + jnp.dot(h.astype(bf16), Whe, preferred_element_type=f32))   # one packed dot / step
        i_g, f_g, o_g, g_g = split_gates(z)
        c = f_g * c + i_g * g_g
        h = o_g * jnp.tanh(c)
        hs.append(h)

    E = jnp.stack(hs, axis=1)                             # [B, T, H], built once from vregs

    # ---- Attention decoder ----
    dh, dc = h, c                                         # decoder state = encoder final state
    y = jnp.zeros((B, 1), f32)                            # dec_init = zeros(B, 1, 1)
    outs = []
    for _ in range(TL):
        # Luong dot attention on VPU/XLU (M=1 MXU matmuls would be pure launch overhead here).
        s = jnp.sum(dh[:, None, :] * E, axis=-1)          # [B, T] scores (broadcast mul + lane reduce)
        m = jnp.max(s, axis=-1, keepdims=True)
        p = jnp.exp(s - m)
        denom = jnp.sum(p, axis=-1, keepdims=True)
        w = p * pl.reciprocal(denom, approx=True)         # softmax weights, EUP reciprocal
        ctx = w[:, 0:1] * hs[0]
        for t in range(1, T):
            ctx = ctx + w[:, t:t + 1] * hs[t]             # [B, H] context via VPU FMAs

        # Decoder LSTM step; input = concat([y, ctx]); ctx/dh dots fused into one [B,2H]@[2H,4H].
        cd = jnp.concatenate([ctx, dh], axis=1).astype(bf16)                 # [B, 2H]
        z = y * Wyd + jnp.dot(cd, Wcdh, preferred_element_type=f32) + Bd     # [B, 4H]
        i_g, f_g, o_g, g_g = split_gates(z)
        dc = f_g * dc + i_g * g_g
        dh = o_g * jnp.tanh(dc)

        # Output head Linear(H -> 1) as a lane reduction (cheaper than a 1-column MXU matmul)
        y = jnp.sum(dh * Wout, axis=1, keepdims=True) + Bout      # [B, 1], fed back (pre-sigmoid)
        outs.append(jax.nn.sigmoid(y))

    out_ref[...] = jnp.concatenate(outs, axis=1)          # single lane-dense [B, TL] store

    # TODO(synk): teacher-forcing branch (torch.rand < ratio with target_values) not translated;
    # with target_values=None it is dead code — kernel is forward/inference-only.


GATE_ORDER = (0, 1, 3, 2)   # repack (i, f, g, o) params -> (i, f, o, g) lane layout


def pack_params(p):
    """Pack per-gate [4, K, H] weights to [K, 4H] in (i, f, o, g) order; MXU operands in bf16."""
    def packw(w):
        return jnp.concatenate([w[g] for g in GATE_ORDER], axis=-1)
    return dict(
        wx_e=packw(p["wx_e"]).astype(jnp.bfloat16),       # [I, 4H]  MXU operand
        wh_e=packw(p["wh_e"]).astype(jnp.bfloat16),       # [H, 4H]  MXU operand
        b_e=packw(p["b_e"]),                              # [1, 4H]  f32
        wy_d=packw(p["wy_d"]),                            # [1, 4H]  f32 (VPU multiply)
        wcdh_d=jnp.concatenate([packw(p["wc_d"]), packw(p["wh_d"])],
                               axis=0).astype(jnp.bfloat16),   # [2H, 4H] fused MXU operand
        b_d=packw(p["b_d"]),                              # [1, 4H]  f32
        wout=p["wout"].T,                                 # [1, H]   row for the lane-reduction head
        bout=p["bout"],                                   # [1, 1]
    )


def encdec_lstm_forward(x, params, target_length):
    B, T, I = x.shape
    pk = pack_params(params)
    # Time-major 2D layout so per-step slices of the hoisted input projection are contiguous rows.
    x2d = jnp.transpose(x, (1, 0, 2)).reshape(T * B, I).astype(jnp.bfloat16)
    args = (x2d,
            pk["wx_e"], pk["wh_e"], pk["b_e"],
            pk["wy_d"], pk["wcdh_d"], pk["b_d"],
            pk["wout"], pk["bout"])
    # Gridless on purpose: total resident footprint is <0.1 MiB (fine on v5e/v6e/v7x VMEM);
    # a grid would only add ~0.35 us/step overhead with nothing to overlap.
    # TODO(synk): only if per-core batch reaches >=8 (full sublane tile) add a batch-tiled grid
    # with dimension_semantics=("parallel",) to use both v7x TensorCores.
    return pl.pallas_call(
        encdec_lstm_kernel,
        out_shape=jax.ShapeDtypeStruct((B, target_length), jnp.float32),
        in_specs=[pl.BlockSpec(memory_space=pltpu.MemorySpace.VMEM) for _ in args],
        out_specs=pl.BlockSpec(memory_space=pltpu.MemorySpace.VMEM),
    )(*args)


def init_params(key, input_dim, hidden_dim):
    ks = jax.random.split(key, 9)
    s = 1.0 / np.sqrt(hidden_dim)

    def u(k, shape):
        return jax.random.uniform(k, shape, jnp.float32, -s, s)

    return dict(
        wx_e=u(ks[0], (4, input_dim, hidden_dim)),   # encoder LSTM input weights (per gate, i,f,g,o)
        wh_e=u(ks[1], (4, hidden_dim, hidden_dim)),  # encoder LSTM recurrent weights
        b_e=u(ks[2], (4, 1, hidden_dim)),            # encoder LSTM bias
        wy_d=u(ks[3], (4, 1, hidden_dim)),           # decoder LSTM weights on scalar input y
        wc_d=u(ks[4], (4, hidden_dim, hidden_dim)),  # decoder LSTM weights on attention context
        wh_d=u(ks[5], (4, hidden_dim, hidden_dim)),  # decoder LSTM recurrent weights
        b_d=u(ks[6], (4, 1, hidden_dim)),            # decoder LSTM bias
        wout=u(ks[7], (hidden_dim, 1)),              # output Linear(H -> 1)
        bout=u(ks[8], (1, 1)),
    )


def reference_forward(x, p, target_length):
    """Pure-JAX f32 reference with identical semantics (ground truth for the kernel)."""
    B, T, _I = x.shape
    H = p["wh_e"].shape[-1]

    def gates(xg, h, wh, b):
        z = [xg[g] + h @ wh[g] + b[g] for g in range(4)]
        return (jax.nn.sigmoid(z[0]), jax.nn.sigmoid(z[1]),
                jnp.tanh(z[2]), jax.nn.sigmoid(z[3]))

    h = jnp.zeros((B, H), jnp.float32)
    c = jnp.zeros((B, H), jnp.float32)
    enc = []
    for t in range(T):
        xt = x[:, t, :]
        xg = [xt @ p["wx_e"][g] for g in range(4)]
        i, f, g_, o = gates(xg, h, p["wh_e"], p["b_e"])
        c = f * c + i * g_
        h = o * jnp.tanh(c)
        enc.append(h)
    enc_out = jnp.stack(enc, axis=1)                 # [B, T, H]

    dh, dc = h, c
    y = jnp.zeros((B, 1), jnp.float32)
    ys = []
    for t in range(target_length):
        scores = jnp.einsum("bth,bh->bt", enc_out, dh)
        w = jax.nn.softmax(scores, axis=1)
        ctx = jnp.einsum("bt,bth->bh", w, enc_out)
        xg = [y * p["wy_d"][g] + ctx @ p["wc_d"][g] for g in range(4)]
        i, f, g_, o = gates(xg, dh, p["wh_d"], p["b_d"])
        dc = f * dc + i * g_
        dh = o * jnp.tanh(dc)
        y = dh @ p["wout"] + p["bout"]
        ys.append(y)
    out = jnp.concatenate(ys, axis=1)                # [B, target_length]
    return jax.nn.sigmoid(out)


if __name__ == "__main__":
    key = jax.random.PRNGKey(0)
    B, T, I, H, TL = 2, 8, 4, 32, 4                  # batch, seq_len, input_dim, hidden, target_length

    kx, kp = jax.random.split(key)
    x = jax.random.normal(kx, (B, T, I), jnp.float32)
    params = init_params(kp, I, H)

    out = encdec_lstm_forward(x, params, TL)
    out = jax.block_until_ready(out)

    ref = reference_forward(x, params, TL)
    assert out.shape == (B, TL)
    np.testing.assert_allclose(np.asarray(out), np.asarray(ref), rtol=1e-2, atol=1e-2)

    print("KERNEL_OK")
</pallas_src>

<mosaic_0001>
module attributes {stable_mosaic.version = 11 : i64} {
  func.func @encdec_lstm_kernel(%arg0: memref<16x4xbf16, #tpu.memory_space<vmem>>, %arg1: memref<4x128xbf16, #tpu.memory_space<vmem>>, %arg2: memref<32x128xbf16, #tpu.memory_space<vmem>>, %arg3: memref<1x128xf32, #tpu.memory_space<vmem>>, %arg4: memref<1x128xf32, #tpu.memory_space<vmem>>, %arg5: memref<64x128xbf16, #tpu.memory_space<vmem>>, %arg6: memref<1x128xf32, #tpu.memory_space<vmem>>, %arg7: memref<1x32xf32, #tpu.memory_space<vmem>>, %arg8: memref<1x1xf32, #tpu.memory_space<vmem>>, %arg9: memref<2x4xf32, #tpu.memory_space<vmem>>) attributes {dimension_semantics = [], scalar_prefetch = 0 : i64, scratch_operands = 0 : i64, tpu.core_type = #tpu.core_type<tc>} {
    %c0 = arith.constant 0 : index
    %c0_0 = arith.constant 0 : index
    %0 = vector.load %arg1[%c0, %c0_0] : memref<4x128xbf16, #tpu.memory_space<vmem>>, vector<4x128xbf16>
    %c0_1 = arith.constant 0 : index
    %c0_2 = arith.constant 0 : index
    %1 = vector.load %arg2[%c0_1, %c0_2] : memref<32x128xbf16, #tpu.memory_space<vmem>>, vector<32x128xbf16>
    %c0_3 = arith.constant 0 : index
    %c0_4 = arith.constant 0 : index
    %2 = vector.load %arg5[%c0_3, %c0_4] : memref<64x128xbf16, #tpu.memory_space<vmem>>, vector<64x128xbf16>
    %c0_5 = arith.constant 0 : index
    %c0_6 = arith.constant 0 : index
    %3 = vector.load %arg4[%c0_5, %c0_6] : memref<1x128xf32, #tpu.memory_space<vmem>>, vector<1x128xf32>
    %4 = vector.shape_cast %3 : vector<1x128xf32> to vector<1x128xf32>
    %5 = vector.broadcast %4 : vector<1x128xf32> to vector<2x128xf32>
    %c0_7 = arith.constant 0 : index
    %c0_8 = arith.constant 0 : index
    %6 = vector.load %arg6[%c0_7, %c0_8] : memref<1x128xf32, #tpu.memory_space<vmem>>, vector<1x128xf32>
    %7 = vector.shape_cast %6 : vector<1x128xf32> to vector<1x128xf32>
    %8 = vector.broadcast %7 : vector<1x128xf32> to vector<2x128xf32>
    %c0_9 = arith.constant 0 : index
    %c0_10 = arith.constant 0 : index
    %9 = vector.load %arg7[%c0_9, %c0_10] : memref<1x32xf32, #tpu.memory_space<vmem>>, vector<1x32xf32>
    %10 = vector.shape_cast %9 : vector<1x32xf32> to vector<1x32xf32>
    %11 = vector.broadcast %10 : vector<1x32xf32> to vector<2x32xf32>
    %c0_11 = arith.constant 0 : index
    %c0_12 = arith.constant 0 : index
    %12 = vector.load %arg8[%c0_11, %c0_12] : memref<1x1xf32, #tpu.memory_space<vmem>>, vector<1x1xf32>
    %13 = vector.shape_cast %12 : vector<1x1xf32> to vector<1x1xf32>
    %14 = vector.broadcast %13 : vector<1x1xf32> to vector<2x1xf32>
    %c0_13 = arith.constant 0 : index
    %c0_14 = arith.constant 0 : index
    %15 = vector.load %arg0[%c0_13, %c0_14] : memref<16x4xbf16, #tpu.memory_space<vmem>>, vector<16x4xbf16>
    %cst = arith.constant dense<0.000000e+00> : vector<16x128xf32>
    %16 = tpu.matmul %15, %0, %cst {dimension_numbers = #tpu.dot_dimension_numbers<[1], [0], [0], [1], [0, 0, 1, 1], [], []>} : vector<16x4xbf16>, vector<4x128xbf16>, vector<16x128xf32> -> vector<16x128xf32>
    %c0_15 = arith.constant 0 : index
    %c0_16 = arith.constant 0 : index
    %17 = vector.load %arg3[%c0_15, %c0_16] : memref<1x128xf32, #tpu.memory_space<vmem>>, vector<1x128xf32>
    %18 = vector.shape_cast %17 : vector<1x128xf32> to vector<1x128xf32>
    %19 = vector.broadcast %18 : vector<1x128xf32> to vector<16x128xf32>
    %20 = arith.addf %16, %19 : vector<16x128xf32>
    %cst_17 = arith.constant 0.000000e+00 : f32
    %21 = vector.broadcast %cst_17 : f32 to vector<2x32xf32>
    %cst_18 = arith.constant 0.000000e+00 : f32
    %22 = vector.broadcast %cst_18 : f32 to vector<2x32xf32>
    %23 = vector.extract_strided_slice %20 {offsets = [0, 0], sizes = [2, 128], strides = [1, 1]} : vector<16x128xf32> to vector<2x128xf32>
    %24 = arith.truncf %21 : vector<2x32xf32> to vector<2x32xbf16>
    %cst_19 = arith.constant dense<0.000000e+00> : vector<2x128xf32>
    %25 = tpu.matmul %24, %1, %cst_19 {dimension_numbers = #tpu.dot_dimension_numbers<[1], [0], [0], [1], [0, 0, 1, 1], [], []>} : vector<2x32xbf16>, vector<32x128xbf16>, vector<2x128xf32> -> vector<2x128xf32>
    %26 = arith.addf %23, %25 : vector<2x128xf32>
    %27 = vector.extract_strided_slice %26 {offsets = [0, 0], sizes = [2, 96], strides = [1, 1]} : vector<2x128xf32> to vector<2x96xf32>
    %28 = arith.negf %27 : vector<2x96xf32>
    %29 = math.exp %28 : vector<2x96xf32>
    %cst_20 = arith.constant 1.000000e+00 : f32
    %30 = vector.broadcast %cst_20 : f32 to vector<2x96xf32>
    %31 = arith.addf %30, %29 : vector<2x96xf32>
    %32 = arith.divf %30, %31 : vector<2x96xf32>
    %33 = vector.extract_strided_slice %26 {offsets = [0, 96], sizes = [2, 32], strides = [1, 1]} : vector<2x128xf32> to vector<2x32xf32>
    %34 = math.tanh %33 : vector<2x32xf32>
    %35 = vector.extract_strided_slice %32 {offsets = [0, 0], sizes = [2, 32], strides = [1, 1]} : vector<2x96xf32> to vector<2x32xf32>
    %36 = vector.extract_strided_slice %32 {offsets = [0, 32], sizes = [2, 32], strides = [1, 1]} : vector<2x96xf32> to vector<2x32xf32>
    %37 = vector.extract_strided_slice %32 {offsets = [0, 64], sizes = [2, 32], strides = [1, 1]} : vector<2x96xf32> to vector<2x32xf32>
    %38 = arith.mulf %36, %22 : vector<2x32xf32>
    %39 = arith.mulf %35, %34 : vector<2x32xf32>
    %40 = arith.addf %38, %39 : vector<2x32xf32>
    %41 = math.tanh %40 : vector<2x32xf32>
    %42 = arith.mulf %37, %41 : vector<2x32xf32>
    %43 = vector.extract_strided_slice %20 {offsets = [2, 0], sizes = [2, 128], strides = [1, 1]} : vector<16x128xf32> to vector<2x128xf32>
    %44 = arith.truncf %42 : vector<2x32xf32> to vector<2x32xbf16>
    %cst_21 = arith.constant dense<0.000000e+00> : vector<2x128xf32>
    %45 = tpu.matmul %44, %1, %cst_21 {dimension_numbers = #tpu.dot_dimension_numbers<[1], [0], [0], [1], [0, 0, 1, 1], [], []>} : vector<2x32xbf16>, vector<32x128xbf16>, vector<2x128xf32> -> vector<2x128xf32>
    %46 = arith.addf %43, %45 : vector<2x128xf32>
    %47 = vector.extract_strided_slice %46 {offsets = [0, 0], sizes = [2, 96], strides = [1, 1]} : vector<2x128xf32> to vector<2x96xf32>
    %48 = arith.negf %47 : vector<2x96xf32>
    %49 = math.exp %48 : vector<2x96xf32>
    %cst_22 = arith.constant 1.000000e+00 : f32
    %50 = vector.broadcast %cst_22 : f32 to vector<2x96xf32>
    %51 = arith.addf %50, %49 : vector<2x96xf32>
    %52 = arith.divf %50, %51 : vector<2x96xf32>
    %53 = vector.extract_strided_slice %46 {offsets = [0, 96], sizes = [2, 32], strides = [1, 1]} : vector<2x128xf32> to vector<2x32xf32>
    %54 = math.tanh %53 : vector<2x32xf32>
    %55 = vector.extract_strided_slice %52 {offsets = [0, 0], sizes = [2, 32], strides = [1, 1]} : vector<2x96xf32> to vector<2x32xf32>
    %56 = vector.extract_strided_slice %52 {offsets = [0, 32], sizes = [2, 32], strides = [1, 1]} : vector<2x96xf32> to vector<2x32xf32>
    %57 = vector.extract_strided_slice %52 {offsets = [0, 64], sizes = [2, 32], strides = [1, 1]} : vector<2x96xf32> to vector<2x32xf32>
    %58 = arith.mulf %56, %40 : vector<2x32xf32>
    %59 = arith.mulf %55, %54 : vector<2x32xf32>
    %60 = arith.addf %58, %59 : vector<2x32xf32>
    %61 = math.tanh %60 : vector<2x32xf32>
    %62 = arith.mulf %57, %61 : vector<2x32xf32>
    %63 = vector.extract_strided_slice %20 {offsets = [4, 0], sizes = [2, 128], strides = [1, 1]} : vector<16x128xf32> to vector<2x128xf32>
    %64 = arith.truncf %62 : vector<2x32xf32> to vector<2x32xbf16>
    %cst_23 = arith.constant dense<0.000000e+00> : vector<2x128xf32>
    %65 = tpu.matmul %64, %1, %cst_23 {dimension_numbers = #tpu.dot_dimension_numbers<[1], [0], [0], [1], [0, 0, 1, 1], [], []>} : vector<2x32xbf16>, vector<32x128xbf16>, vector<2x128xf32> -> vector<2x128xf32>
    %66 = arith.addf %63, %65 : vector<2x128xf32>
    %67 = vector.extract_strided_slice %66 {offsets = [0, 0], sizes = [2, 96], strides = [1, 1]} : vector<2x128xf32> to vector<2x96xf32>
    %68 = arith.negf %67 : vector<2x96xf32>
    %69 = math.exp %68 : vector<2x96xf32>
    %cst_24 = arith.constant 1.000000e+00 : f32
    %70 = vector.broadcast %cst_24 : f32 to vector<2x96xf32>
    %71 = arith.addf %70, %69 : vector<2x96xf32>
    %72 = arith.divf %70, %71 : vector<2x96xf32>
    %73 = vector.extract_strided_slice %66 {offsets = [0, 96], sizes = [2, 32], strides = [1, 1]} : vector<2x128xf32> to vector<2x32xf32>
    %74 = math.tanh %73 : vector<2x32xf32>
    %75 = vector.extract_strided_slice %72 {offsets = [0, 0], sizes = [2, 32], strides = [1, 1]} : vector<2x96xf32> to vector<2x32xf32>
    %76 = vector.extract_strided_slice %72 {offsets = [0, 32], sizes = [2, 32], strides = [1, 1]} : vector<2x96xf32> to vector<2x32xf32>
    %77 = vector.extract_strided_slice %72 {offsets = [0, 64], sizes = [2, 32], strides = [1, 1]} : vector<2x96xf32> to vector<2x32xf32>
    %78 = arith.mulf %76, %60 : vector<2x32xf32>
    %79 = arith.mulf %75, %74 : vector<2x32xf32>
    %80 = arith.addf %78, %79 : vector<2x32xf32>
    %81 = math.tanh %80 : vector<2x32xf32>
    %82 = arith.mulf %77, %81 : vector<2x32xf32>
    %83 = vector.extract_strided_slice %20 {offsets = [6, 0], sizes = [2, 128], strides = [1, 1]} : vector<16x128xf32> to vector<2x128xf32>
    %84 = arith.truncf %82 : vector<2x32xf32> to vector<2x32xbf16>
    %cst_25 = arith.constant dense<0.000000e+00> : vector<2x128xf32>
    %85 = tpu.matmul %84, %1, %cst_25 {dimension_numbers = #tpu.dot_dimension_numbers<[1], [0], [0], [1], [0, 0, 1, 1], [], []>} : vector<2x32xbf16>, vector<32x128xbf16>, vector<2x128xf32> -> vector<2x128xf32>
    %86 = arith.addf %83, %85 : vector<2x128xf32>
    %87 = vector.extract_strided_slice %86 {offsets = [0, 0], sizes = [2, 96], strides = [1, 1]} : vector<2x128xf32> to vector<2x96xf32>
    %88 = arith.negf %87 : vector<2x96xf32>
    %89 = math.exp %88 : vector<2x96xf32>
    %cst_26 = arith.constant 1.000000e+00 : f32
    %90 = vector.broadcast %cst_26 : f32 to vector<2x96xf32>
    %91 = arith.addf %90, %89 : vector<2x96xf32>
    %92 = arith.divf %90, %91 : vector<2x96xf32>
    %93 = vector.extract_strided_slice %86 {offsets = [0, 96], sizes = [2, 32], strides = [1, 1]} : vector<2x128xf32> to vector<2x32xf32>
    %94 = math.tanh %93 : vector<2x32xf32>
    %95 = vector.extract_strided_slice %92 {offsets = [0, 0], sizes = [2, 32], strides = [1, 1]} : vector<2x96xf32> to vector<2x32xf32>
    %96 = vector.extract_strided_slice %92 {offsets = [0, 32], sizes = [2, 32], strides = [1, 1]} : vector<2x96xf32> to vector<2x32xf32>
    %97 = vector.extract_strided_slice %92 {offsets = [0, 64], sizes = [2, 32], strides = [1, 1]} : vector<2x96xf32> to vector<2x32xf32>
    %98 = arith.mulf %96, %80 : vector<2x32xf32>
    %99 = arith.mulf %95, %94 : vector<2x32xf32>
    %100 = arith.addf %98, %99 : vector<2x32xf32>
    %101 = math.tanh %100 : vector<2x32xf32>
    %102 = arith.mulf %97, %101 : vector<2x32xf32>
    %103 = vector.extract_strided_slice %20 {offsets = [8, 0], sizes = [2, 128], strides = [1, 1]} : vector<16x128xf32> to vector<2x128xf32>
    %104 = arith.truncf %102 : vector<2x32xf32> to vector<2x32xbf16>
    %cst_27 = arith.constant dense<0.000000e+00> : vector<2x128xf32>
    %105 = tpu.matmul %104, %1, %cst_27 {dimension_numbers = #tpu.dot_dimension_numbers<[1], [0], [0], [1], [0, 0, 1, 1], [], []>} : vector<2x32xbf16>, vector<32x128xbf16>, vector<2x128xf32> -> vector<2x128xf32>
    %106 = arith.addf %103, %105 : vector<2x128xf32>
    %107 = vector.extract_strided_slice %106 {offsets = [0, 0], sizes = [2, 96], strides = [1, 1]} : vector<2x128xf32> to vector<2x96xf32>
    %108 = arith.negf %107 : vector<2x96xf32>
    %109 = math.exp %108 : vector<2x96xf32>
    %cst_28 = arith.constant 1.000000e+00 : f32
    %110 = vector.broadcast %cst_28 : f32 to vector<2x96xf32>
    %111 = arith.addf %110, %109 : vector<2x96xf32>
    %112 = arith.divf %110, %111 : vector<2x96xf32>
    %113 = vector.extract_strided_slice %106 {offsets = [0, 96], sizes = [2, 32], strides = [1, 1]} : vector<2x128xf32> to vector<2x32xf32>
    %114 = math.tanh %113 : vector<2x32xf32>
    %115 = vector.extract_strided_slice %112 {offsets = [0, 0], sizes = [2, 32], strides = [1, 1]} : vector<2x96xf32> to vector<2x32xf32>
    %116 = vector.extract_strided_slice %112 {offsets = [0, 32], sizes = [2, 32], strides = [1, 1]} : vector<2x96xf32> to vector<2x32xf32>
    %117 = vector.extract_strided_slice %112 {offsets = [0, 64], sizes = [2, 32], strides = [1, 1]} : vector<2x96xf32> to vector<2x32xf32>
    %118 = arith.mulf %116, %100 : vector<2x32xf32>
    %119 = arith.mulf %115, %114 : vector<2x32xf32>
    %120 = arith.addf %118, %119 : vector<2x32xf32>
    %121 = math.tanh %120 : vector<2x32xf32>
    %122 = arith.mulf %117, %121 : vector<2x32xf32>
    %123 = vector.extract_strided_slice %20 {offsets = [10, 0], sizes = [2, 128], strides = [1, 1]} : vector<16x128xf32> to vector<2x128xf32>
    %124 = arith.truncf %122 : vector<2x32xf32> to vector<2x32xbf16>
    %cst_29 = arith.constant dense<0.000000e+00> : vector<2x128xf32>
    %125 = tpu.matmul %124, %1, %cst_29 {dimension_numbers = #tpu.dot_dimension_numbers<[1], [0], [0], [1], [0, 0, 1, 1], [], []>} : vector<2x32xbf16>, vector<32x128xbf16>, vector<2x128xf32> -> vector<2x128xf32>
    %126 = arith.addf %123, %125 : vector<2x128xf32>
    %127 = vector.extract_strided_slice %126 {offsets = [0, 0], sizes = [2, 96], strides = [1, 1]} : vector<2x128xf32> to vector<2x96xf32>
    %128 = arith.negf %127 : vector<2x96xf32>
    %129 = math.exp %128 : vector<2x96xf32>
    %cst_30 = arith.constant 1.000000e+00 : f32
    %130 = vector.broadcast %cst_30 : f32 to vector<2x96xf32>
    %131 = arith.addf %130, %129 : vector<2x96xf32>
    %132 = arith.divf %130, %131 : vector<2x96xf32>
    %133 = vector.extract_strided_slice %126 {offsets = [0, 96], sizes = [2, 32], strides = [1, 1]} : vector<2x128xf32> to vector<2x32xf32>
    %134 = math.tanh %133 : vector<2x32xf32>
    %135 = vector.extract_strided_slice %132 {offsets = [0, 0], sizes = [2, 32], strides = [1, 1]} : vector<2x96xf32> to vector<2x32xf32>
    %136 = vector.extract_strided_slice %132 {offsets = [0, 32], sizes = [2, 32], strides = [1, 1]} : vector<2x96xf32> to vector<2x32xf32>
    %137 = vector.extract_strided_slice %132 {offsets = [0, 64], sizes = [2, 32], strides = [1, 1]} : vector<2x96xf32> to vector<2x32xf32>
    %138 = arith.mulf %136, %120 : vector<2x32xf32>
    %139 = arith.mulf %135, %134 : vector<2x32xf32>
    %140 = arith.addf %138, %139 : vector<2x32xf32>
    %141 = math.tanh %140 : vector<2x32xf32>
    %142 = arith.mulf %137, %141 : vector<2x32xf32>
    %143 = vector.extract_strided_slice %20 {offsets = [12, 0], sizes = [2, 128], strides = [1, 1]} : vector<16x128xf32> to vector<2x128xf32>
    %144 = arith.truncf %142 : vector<2x32xf32> to vector<2x32xbf16>
    %cst_31 = arith.constant dense<0.000000e+00> : vector<2x128xf32>
    %145 = tpu.matmul %144, %1, %cst_31 {dimension_numbers = #tpu.dot_dimension_numbers<[1], [0], [0], [1], [0, 0, 1, 1], [], []>} : vector<2x32xbf16>, vector<32x128xbf16>, vector<2x128xf32> -> vector<2x128xf32>
    %146 = arith.addf %143, %145 : vector<2x128xf32>
    %147 = vector.extract_strided_slice %146 {offsets = [0, 0], sizes = [2, 96], strides = [1, 1]} : vector<2x128xf32> to vector<2x96xf32>
    %148 = arith.negf %147 : vector<2x96xf32>
    %149 = math.exp %148 : vector<2x96xf32>
    %cst_32 = arith.constant 1.000000e+00 : f32
    %150 = vector.broadcast %cst_32 : f32 to vector<2x96xf32>
    %151 = arith.addf %150, %149 : vector<2x96xf32>
    %152 = arith.divf %150, %151 : vector<2x96xf32>
    %153 = vector.extract_strided_slice %146 {offsets = [0, 96], sizes = [2, 32], strides = [1, 1]} : vector<2x128xf32> to vector<2x32xf32>
    %154 = math.tanh %153 : vector<2x32xf32>
    %155 = vector.extract_strided_slice %152 {offsets = [0, 0], sizes = [2, 32], strides = [1, 1]} : vector<2x96xf32> to vector<2x32xf32>
    %156 = vector.extract_strided_slice %152 {offsets = [0, 32], sizes = [2, 32], strides = [1, 1]} : vector<2x96xf32> to vector<2x32xf32>
    %157 = vector.extract_strided_slice %152 {offsets = [0, 64], sizes = [2, 32], strides = [1, 1]} : vector<2x96xf32> to vector<2x32xf32>
    %158 = arith.mulf %156, %140 : vector<2x32xf32>
    %159 = arith.mulf %155, %154 : vector<2x32xf32>
    %160 = arith.addf %158, %159 : vector<2x32xf32>
    %161 = math.tanh %160 : vector<2x32xf32>
    %162 = arith.mulf %157, %161 : vector<2x32xf32>
    %163 = vector.extract_strided_slice %20 {offsets = [14, 0], sizes = [2, 128], strides = [1, 1]} : vector<16x128xf32> to vector<2x128xf32>
    %164 = arith.truncf %162 : vector<2x32xf32> to vector<2x32xbf16>
    %cst_33 = arith.constant dense<0.000000e+00> : vector<2x128xf32>
    %165 = tpu.matmul %164, %1, %cst_33 {dimension_numbers = #tpu.dot_dimension_numbers<[1], [0], [0], [1], [0, 0, 1, 1], [], []>} : vector<2x32xbf16>, vector<32x128xbf16>, vector<2x128xf32> -> vector<2x128xf32>
    %166 = arith.addf %163, %165 : vector<2x128xf32>
    %167 = vector.extract_strided_slice %166 {offsets = [0, 0], sizes = [2, 96], strides = [1, 1]} : vector<2x128xf32> to vector<2x96xf32>
    %168 = arith.negf %167 : vector<2x96xf32>
    %169 = math.exp %168 : vector<2x96xf32>
    %cst_34 = arith.constant 1.000000e+00 : f32
    %170 = vector.broadcast %cst_34 : f32 to vector<2x96xf32>
    %171 = arith.addf %170, %169 : vector<2x96xf32>
    %172 = arith.divf %170, %171 : vector<2x96xf32>
    %173 = vector.extract_strided_slice %166 {offsets = [0, 96], sizes = [2, 32], strides = [1, 1]} : vector<2x128xf32> to vector<2x32xf32>
    %174 = math.tanh %173 : vector<2x32xf32>
    %175 = vector.extract_strided_slice %172 {offsets = [0, 0], sizes = [2, 32], strides = [1, 1]} : vector<2x96xf32> to vector<2x32xf32>
    %176 = vector.extract_strided_slice %172 {offsets = [0, 32], sizes = [2, 32], strides = [1, 1]} : vector<2x96xf32> to vector<2x32xf32>
    %177 = vector.extract_strided_slice %172 {offsets = [0, 64], sizes = [2, 32], strides = [1, 1]} : vector<2x96xf32> to vector<2x32xf32>
    %178 = arith.mulf %176, %160 : vector<2x32xf32>
    %179 = arith.mulf %175, %174 : vector<2x32xf32>
    %180 = arith.addf %178, %179 : vector<2x32xf32>
    %181 = math.tanh %180 : vector<2x32xf32>
    %182 = arith.mulf %177, %181 : vector<2x32xf32>
    %183 = vector.shape_cast %42 : vector<2x32xf32> to vector<2x1x32xf32>
    %184 = vector.shape_cast %62 : vector<2x32xf32> to vector<2x1x32xf32>
    %185 = vector.shape_cast %82 : vector<2x32xf32> to vector<2x1x32xf32>
    %186 = vector.shape_cast %102 : vector<2x32xf32> to vector<2x1x32xf32>
    %187 = vector.shape_cast %122 : vector<2x32xf32> to vector<2x1x32xf32>
    %188 = vector.shape_cast %142 : vector<2x32xf32> to vector<2x1x32xf32>
    %189 = vector.shape_cast %162 : vector<2x32xf32> to vector<2x1x32xf32>
    %190 = vector.shape_cast %182 : vector<2x32xf32> to vector<2x1x32xf32>
    %191 = tpu.concatenate %183, %184, %185, %186, %187, %188, %189, %190 in 1 : vector<2x1x32xf32>, vector<2x1x32xf32>, vector<2x1x32xf32>, vector<2x1x32xf32>, vector<2x1x32xf32>, vector<2x1x32xf32>, vector<2x1x32xf32>, vector<2x1x32xf32> -> vector<2x8x32xf32>
    %cst_35 = arith.constant 0.000000e+00 : f32
    %192 = vector.broadcast %cst_35 : f32 to vector<2x1xf32>
    %193 = vector.shape_cast %182 : vector<2x32xf32> to vector<2x1x32xf32>
    %194 = vector.broadcast %193 : vector<2x1x32xf32> to vector<2x8x32xf32>
    %195 = arith.mulf %194, %191 : vector<2x8x32xf32>
    %cst_36 = arith.constant dense<0.000000e+00> : vector<2x8xf32>
    %196 = vector.multi_reduction <add>, %195, %cst_36 [2] : vector<2x8x32xf32> to vector<2x8xf32>
    %cst_37 = arith.constant dense<0xFF800000> : vector<2xf32>
    %197 = vector.multi_reduction <maximumf>, %196, %cst_37 [1] : vector<2x8xf32> to vector<2xf32>
    %198 = vector.shape_cast %197 : vector<2xf32> to vector<2x1xf32>
    %199 = vector.broadcast %198 : vector<2x1xf32> to vector<2x8xf32>
    %200 = arith.subf %196, %199 : vector<2x8xf32>
    %201 = math.exp %200 : vector<2x8xf32>
    %cst_38 = arith.constant dense<0.000000e+00> : vector<2xf32>
    %202 = vector.multi_reduction <add>, %201, %cst_38 [1] : vector<2x8xf32> to vector<2xf32>
    %203 = vector.shape_cast %202 : vector<2xf32> to vector<2x1xf32>
    %204 = tpu.reciprocal %203 {approx = true} : vector<2x1xf32> -> vector<2x1xf32>
    %205 = vector.broadcast %204 : vector<2x1xf32> to vector<2x8xf32>
    %206 = arith.mulf %201, %205 : vector<2x8xf32>
    %207 = vector.extract_strided_slice %206 {offsets = [0, 0], sizes = [2, 1], strides = [1, 1]} : vector<2x8xf32> to vector<2x1xf32>
    %208 = vector.broadcast %207 : vector<2x1xf32> to vector<2x32xf32>
    %209 = arith.mulf %208, %42 : vector<2x32xf32>
    %210 = vector.extract_strided_slice %206 {offsets = [0, 1], sizes = [2, 1], strides = [1, 1]} : vector<2x8xf32> to vector<2x1xf32>
    %211 = vector.broadcast %210 : vector<2x1xf32> to vector<2x32xf32>
    %212 = arith.mulf %211, %62 : vector<2x32xf32>
    %213 = arith.addf %209, %212 : vector<2x32xf32>
    %214 = vector.extract_strided_slice %206 {offsets = [0, 2], sizes = [2, 1], strides = [1, 1]} : vector<2x8xf32> to vector<2x1xf32>
    %215 = vector.broadcast %214 : vector<2x1xf32> to vector<2x32xf32>
    %216 = arith.mulf %215, %82 : vector<2x32xf32>
    %217 = arith.addf %213, %216 : vector<2x32xf32>
    %218 = vector.extract_strided_slice %206 {offsets = [0, 3], sizes = [2, 1], strides = [1, 1]} : vector<2x8xf32> to vector<2x1xf32>
    %219 = vector.broadcast %218 : vector<2x1xf32> to vector<2x32xf32>
    %220 = arith.mulf %219, %102 : vector<2x32xf32>
    %221 = arith.addf %217, %220 : vector<2x32xf32>
    %222 = vector.extract_strided_slice %206 {offsets = [0, 4], sizes = [2, 1], strides = [1, 1]} : vector<2x8xf32> to vector<2x1xf32>
    %223 = vector.broadcast %222 : vector<2x1xf32> to vector<2x32xf32>
    %224 = arith.mulf %223, %122 : vector<2x32xf32>
    %225 = arith.addf %221, %224 : vector<2x32xf32>
    %226 = vector.extract_strided_slice %206 {offsets = [0, 5], sizes = [2, 1], strides = [1, 1]} : vector<2x8xf32> to vector<2x1xf32>
    %227 = vector.broadcast %226 : vector<2x1xf32> to vector<2x32xf32>
    %228 = arith.mulf %227, %142 : vector<2x32xf32>
    %229 = arith.addf %225, %228 : vector<2x32xf32>
    %230 = vector.extract_strided_slice %206 {offsets = [0, 6], sizes = [2, 1], strides = [1, 1]} : vector<2x8xf32> to vector<2x1xf32>
    %231 = vector.broadcast %230 : vector<2x1xf32> to vector<2x32xf32>
    %232 = arith.mulf %231, %162 : vector<2x32xf32>
    %233 = arith.addf %229, %232 : vector<2x32xf32>
    %234 = vector.extract_strided_slice %206 {offsets = [0, 7], sizes = [2, 1], strides = [1, 1]} : vector<2x8xf32> to vector<2x1xf32>
    %235 = vector.broadcast %234 : vector<2x1xf32> to vector<2x32xf32>
    %236 = arith.mulf %235, %182 : vector<2x32xf32>
    %237 = arith.addf %233, %236 : vector<2x32xf32>
    %238 = tpu.concatenate %237, %182 in 1 : vector<2x32xf32>, vector<2x32xf32> -> vector<2x64xf32>
    %239 = arith.truncf %238 : vector<2x64xf32> to vector<2x64xbf16>
    %240 = vector.broadcast %192 : vector<2x1xf32> to vector<2x128xf32>
    %241 = arith.mulf %240, %5 : vector<2x128xf32>
    %cst_39 = arith.constant dense<0.000000e+00> : vector<2x128xf32>
    %242 = tpu.matmul %239, %2, %cst_39 {dimension_numbers = #tpu.dot_dimension_numbers<[1], [0], [0], [1], [0, 0, 1, 1], [], []>} : vector<2x64xbf16>, vector<64x128xbf16>, vector<2x128xf32> -> vector<2x128xf32>
    %243 = arith.addf %241, %242 : vector<2x128xf32>
    %244 = arith.addf %243, %8 : vector<2x128xf32>
    %245 = vector.extract_strided_slice %244 {offsets = [0, 0], sizes = [2, 96], strides = [1, 1]} : vector<2x128xf32> to vector<2x96xf32>
    %246 = arith.negf %245 : vector<2x96xf32>
    %247 = math.exp %246 : vector<2x96xf32>
    %cst_40 = arith.constant 1.000000e+00 : f32
    %248 = vector.broadcast %cst_40 : f32 to vector<2x96xf32>
    %249 = arith.addf %248, %247 : vector<2x96xf32>
    %250 = arith.divf %248, %249 : vector<2x96xf32>
    %251 = vector.extract_strided_slice %244 {offsets = [0, 96], sizes = [2, 32], strides = [1, 1]} : vector<2x128xf32> to vector<2x32xf32>
    %252 = math.tanh %251 : vector<2x32xf32>
    %253 = vector.extract_strided_slice %250 {offsets = [0, 0], sizes = [2, 32], strides = [1, 1]} : vector<2x96xf32> to vector<2x32xf32>
    %254 = vector.extract_strided_slice %250 {offsets = [0, 32], sizes = [2, 32], strides = [1, 1]} : vector<2x96xf32> to vector<2x32xf32>
    %255 = vector.extract_strided_slice %250 {offsets = [0, 64], sizes = [2, 32], strides = [1, 1]} : vector<2x96xf32> to vector<2x32xf32>
    %256 = arith.mulf %254, %180 : vector<2x32xf32>
    %257 = arith.mulf %253, %252 : vector<2x32xf32>
    %258 = arith.addf %256, %257 : vector<2x32xf32>
    %259 = math.tanh %258 : vector<2x32xf32>
    %260 = arith.mulf %255, %259 : vector<2x32xf32>
    %261 = arith.mulf %260, %11 : vector<2x32xf32>
    %cst_41 = arith.constant dense<0.000000e+00> : vector<2xf32>
    %262 = vector.multi_reduction <add>, %261, %cst_41 [1] : vector<2x32xf32> to vector<2xf32>
    %263 = vector.shape_cast %262 : vector<2xf32> to vector<2x1xf32>
    %264 = arith.addf %263, %14 : vector<2x1xf32>
    %265 = arith.negf %264 : vector<2x1xf32>
    %266 = math.exp %265 : vector<2x1xf32>
    %cst_42 = arith.constant 1.000000e+00 : f32
    %267 = vector.broadcast %cst_42 : f32 to vector<2x1xf32>
    %268 = arith.addf %267, %266 : vector<2x1xf32>
    %269 = arith.divf %267, %268 : vector<2x1xf32>
    %270 = vector.shape_cast %260 : vector<2x32xf32> to vector<2x1x32xf32>
    %271 = vector.broadcast %270 : vector<2x1x32xf32> to vector<2x8x32xf32>
    %272 = arith.mulf %271, %191 : vector<2x8x32xf32>
    %cst_43 = arith.constant dense<0.000000e+00> : vector<2x8xf32>
    %273 = vector.multi_reduction <add>, %272, %cst_43 [2] : vector<2x8x32xf32> to vector<2x8xf32>
    %cst_44 = arith.constant dense<0xFF800000> : vector<2xf32>
    %274 = vector.multi_reduction <maximumf>, %273, %cst_44 [1] : vector<2x8xf32> to vector<2xf32>
    %275 = vector.shape_cast %274 : vector<2xf32> to vector<2x1xf32>
    %276 = vector.broadcast %275 : vector<2x1xf32> to vector<2x8xf32>
    %277 = arith.subf %273, %276 : vector<2x8xf32>
    %278 = math.exp %277 : vector<2x8xf32>
    %cst_45 = arith.constant dense<0.000000e+00> : vector<2xf32>
    %279 = vector.multi_reduction <add>, %278, %cst_45 [1] : vector<2x8xf32> to vector<2xf32>
    %280 = vector.shape_cast %279 : vector<2xf32> to vector<2x1xf32>
    %281 = tpu.reciprocal %280 {approx = true} : vector<2x1xf32> -> vector<2x1xf32>
    %282 = vector.broadcast %281 : vector<2x1xf32> to vector<2x8xf32>
    %283 = arith.mulf %278, %282 : vector<2x8xf32>
    %284 = vector.extract_strided_slice %283 {offsets = [0, 0], sizes = [2, 1], strides = [1, 1]} : vector<2x8xf32> to vector<2x1xf32>
    %285 = vector.broadcast %284 : vector<2x1xf32> to vector<2x32xf32>
    %286 = arith.mulf %285, %42 : vector<2x32xf32>
    %287 = vector.extract_strided_slice %283 {offsets = [0, 1], sizes = [2, 1], strides = [1, 1]} : vector<2x8xf32> to vector<2x1xf32>
    %288 = vector.broadcast %287 : vector<2x1xf32> to vector<2x32xf32>
    %289 = arith.mulf %288, %62 : vector<2x32xf32>
    %290 = arith.addf %286, %289 : vector<2x32xf32>
    %291 = vector.extract_strided_slice %283 {offsets = [0, 2], sizes = [2, 1], strides = [1, 1]} : vector<2x8xf32> to vector<2x1xf32>
    %292 = vector.broadcast %291 : vector<2x1xf32> to vector<2x32xf32>
    %293 = arith.mulf %292, %82 : vector<2x32xf32>
    %294 = arith.addf %290, %293 : vector<2x32xf32>
    %295 = vector.extract_strided_slice %283 {offsets = [0, 3], sizes = [2, 1], strides = [1, 1]} : vector<2x8xf32> to vector<2x1xf32>
    %296 = vector.broadcast %295 : vector<2x1xf32> to vector<2x32xf32>
    %297 = arith.mulf %296, %102 : vector<2x32xf32>
    %298 = arith.addf %294, %297 : vector<2x32xf32>
    %299 = vector.extract_strided_slice %283 {offsets = [0, 4], sizes = [2, 1], strides = [1, 1]} : vector<2x8xf32> to vector<2x1xf32>
    %300 = vector.broadcast %299 : vector<2x1xf32> to vector<2x32xf32>
    %301 = arith.mulf %300, %122 : vector<2x32xf32>
    %302 = arith.addf %298, %301 : vector<2x32xf32>
    %303 = vector.extract_strided_slice %283 {offsets = [0, 5], sizes = [2, 1], strides = [1, 1]} : vector<2x8xf32> to vector<2x1xf32>
    %304 = vector.broadcast %303 : vector<2x1xf32> to vector<2x32xf32>
    %305 = arith.mulf %304, %142 : vector<2x32xf32>
    %306 = arith.addf %302, %305 : vector<2x32xf32>
    %307 = vector.extract_strided_slice %283 {offsets = [0, 6], sizes = [2, 1], strides = [1, 1]} : vector<2x8xf32> to vector<2x1xf32>
    %308 = vector.broadcast %307 : vector<2x1xf32> to vector<2x32xf32>
    %309 = arith.mulf %308, %162 : vector<2x32xf32>
    %310 = arith.addf %306, %309 : vector<2x32xf32>
    %311 = vector.extract_strided_slice %283 {offsets = [0, 7], sizes = [2, 1], strides = [1, 1]} : vector<2x8xf32> to vector<2x1xf32>
    %312 = vector.broadcast %311 : vector<2x1xf32> to vector<2x32xf32>
    %313 = arith.mulf %312, %182 : vector<2x32xf32>
    %314 = arith.addf %310, %313 : vector<2x32xf32>
    %315 = tpu.concatenate %314, %260 in 1 : vector<2x32xf32>, vector<2x32xf32> -> vector<2x64xf32>
    %316 = arith.truncf %315 : vector<2x64xf32> to vector<2x64xbf16>
    %317 = vector.broadcast %264 : vector<2x1xf32> to vector<2x128xf32>
    %318 = arith.mulf %317, %5 : vector<2x128xf32>
    %cst_46 = arith.constant dense<0.000000e+00> : vector<2x128xf32>
    %319 = tpu.matmul %316, %2, %cst_46 {dimension_numbers = #tpu.dot_dimension_numbers<[1], [0], [0], [1], [0, 0, 1, 1], [], []>} : vector<2x64xbf16>, vector<64x128xbf16>, vector<2x128xf32> -> vector<2x128xf32>
    %320 = arith.addf %318, %319 : vector<2x128xf32>
    %321 = arith.addf %320, %8 : vector<2x128xf32>
    %322 = vector.extract_strided_slice %321 {offsets = [0, 0], sizes = [2, 96], strides = [1, 1]} : vector<2x128xf32> to vector<2x96xf32>
    %323 = arith.negf %322 : vector<2x96xf32>
    %324 = math.exp %323 : vector<2x96xf32>
    %cst_47 = arith.constant 1.000000e+00 : f32
    %325 = vector.broadcast %cst_47 : f32 to vector<2x96xf32>
    %326 = arith.addf %325, %324 : vector<2x96xf32>
    %327 = arith.divf %325, %326 : vector<2x96xf32>
    %328 = vector.extract_strided_slice %321 {offsets = [0, 96], sizes = [2, 32], strides = [1, 1]} : vector<2x128xf32> to vector<2x32xf32>
    %329 = math.tanh %328 : vector<2x32xf32>
    %330 = vector.extract_strided_slice %327 {offsets = [0, 0], sizes = [2, 32], strides = [1, 1]} : vector<2x96xf32> to vector<2x32xf32>
    %331 = vector.extract_strided_slice %327 {offsets = [0, 32], sizes = [2, 32], strides = [1, 1]} : vector<2x96xf32> to vector<2x32xf32>
    %332 = vector.extract_strided_slice %327 {offsets = [0, 64], sizes = [2, 32], strides = [1, 1]} : vector<2x96xf32> to vector<2x32xf32>
    %333 = arith.mulf %331, %258 : vector<2x32xf32>
    %334 = arith.mulf %330, %329 : vector<2x32xf32>
    %335 = arith.addf %333, %334 : vector<2x32xf32>
    %336 = math.tanh %335 : vector<2x32xf32>
    %337 = arith.mulf %332, %336 : vector<2x32xf32>
    %338 = arith.mulf %337, %11 : vector<2x32xf32>
    %cst_48 = arith.constant dense<0.000000e+00> : vector<2xf32>
    %339 = vector.multi_reduction <add>, %338, %cst_48 [1] : vector<2x32xf32> to vector<2xf32>
    %340 = vector.shape_cast %339 : vector<2xf32> to vector<2x1xf32>
    %341 = arith.addf %340, %14 : vector<2x1xf32>
    %342 = arith.negf %341 : vector<2x1xf32>
    %343 = math.exp %342 : vector<2x1xf32>
    %cst_49 = arith.constant 1.000000e+00 : f32
    %344 = vector.broadcast %cst_49 : f32 to vector<2x1xf32>
    %345 = arith.addf %344, %343 : vector<2x1xf32>
    %346 = arith.divf %344, %345 : vector<2x1xf32>
    %347 = vector.shape_cast %337 : vector<2x32xf32> to vector<2x1x32xf32>
    %348 = vector.broadcast %347 : vector<2x1x32xf32> to vector<2x8x32xf32>
    %349 = arith.mulf %348, %191 : vector<2x8x32xf32>
    %cst_50 = arith.constant dense<0.000000e+00> : vector<2x8xf32>
    %350 = vector.multi_reduction <add>, %349, %cst_50 [2] : vector<2x8x32xf32> to vector<2x8xf32>
    %cst_51 = arith.constant dense<0xFF800000> : vector<2xf32>
    %351 = vector.multi_reduction <maximumf>, %350, %cst_51 [1] : vector<2x8xf32> to vector<2xf32>
    %352 = vector.shape_cast %351 : vector<2xf32> to vector<2x1xf32>
    %353 = vector.broadcast %352 : vector<2x1xf32> to vector<2x8xf32>
    %354 = arith.subf %350, %353 : vector<2x8xf32>
    %355 = math.exp %354 : vector<2x8xf32>
    %cst_52 = arith.constant dense<0.000000e+00> : vector<2xf32>
    %356 = vector.multi_reduction <add>, %355, %cst_52 [1] : vector<2x8xf32> to vector<2xf32>
    %357 = vector.shape_cast %356 : vector<2xf32> to vector<2x1xf32>
    %358 = tpu.reciprocal %357 {approx = true} : vector<2x1xf32> -> vector<2x1xf32>
    %359 = vector.broadcast %358 : vector<2x1xf32> to vector<2x8xf32>
    %360 = arith.mulf %355, %359 : vector<2x8xf32>
    %361 = vector.extract_strided_slice %360 {offsets = [0, 0], sizes = [2, 1], strides = [1, 1]} : vector<2x8xf32> to vector<2x1xf32>
    %362 = vector.broadcast %361 : vector<2x1xf32> to vector<2x32xf32>
    %363 = arith.mulf %362, %42 : vector<2x32xf32>
    %364 = vector.extract_strided_slice %360 {offsets = [0, 1], sizes = [2, 1], strides = [1, 1]} : vector<2x8xf32> to vector<2x1xf32>
    %365 = vector.broadcast %364 : vector<2x1xf32> to vector<2x32xf32>
    %366 = arith.mulf %365, %62 : vector<2x32xf32>
    %367 = arith.addf %363, %366 : vector<2x32xf32>
    %368 = vector.extract_strided_slice %360 {offsets = [0, 2], sizes = [2, 1], strides = [1, 1]} : vector<2x8xf32> to vector<2x1xf32>
    %369 = vector.broadcast %368 : vector<2x1xf32> to vector<2x32xf32>
    %370 = arith.mulf %369, %82 : vector<2x32xf32>
    %371 = arith.addf %367, %370 : vector<2x32xf32>
    %372 = vector.extract_strided_slice %360 {offsets = [0, 3], sizes = [2, 1], strides = [1, 1]} : vector<2x8xf32> to vector<2x1xf32>
    %373 = vector.broadcast %372 : vector<2x1xf32> to vector<2x32xf32>
    %374 = arith.mulf %373, %102 : vector<2x32xf32>
    %375 = arith.addf %371, %374 : vector<2x32xf32>
    %376 = vector.extract_strided_slice %360 {offsets = [0, 4], sizes = [2, 1], strides = [1, 1]} : vector<2x8xf32> to vector<2x1xf32>
    %377 = vector.broadcast %376 : vector<2x1xf32> to vector<2x32xf32>
    %378 = arith.mulf %377, %122 : vector<2x32xf32>
    %379 = arith.addf %375, %378 : vector<2x32xf32>
    %380 = vector.extract_strided_slice %360 {offsets = [0, 5], sizes = [2, 1], strides = [1, 1]} : vector<2x8xf32> to vector<2x1xf32>
    %381 = vector.broadcast %380 : vector<2x1xf32> to vector<2x32xf32>
    %382 = arith.mulf %381, %142 : vector<2x32xf32>
    %383 = arith.addf %379, %382 : vector<2x32xf32>
    %384 = vector.extract_strided_slice %360 {offsets = [0, 6], sizes = [2, 1], strides = [1, 1]} : vector<2x8xf32> to vector<2x1xf32>
    %385 = vector.broadcast %384 : vector<2x1xf32> to vector<2x32xf32>
    %386 = arith.mulf %385, %162 : vector<2x32xf32>
    %387 = arith.addf %383, %386 : vector<2x32xf32>
    %388 = vector.extract_strided_slice %360 {offsets = [0, 7], sizes = [2, 1], strides = [1, 1]} : vector<2x8xf32> to vector<2x1xf32>
    %389 = vector.broadcast %388 : vector<2x1xf32> to vector<2x32xf32>
    %390 = arith.mulf %389, %182 : vector<2x32xf32>
    %391 = arith.addf %387, %390 : vector<2x32xf32>
    %392 = tpu.concatenate %391, %337 in 1 : vector<2x32xf32>, vector<2x32xf32> -> vector<2x64xf32>
    %393 = arith.truncf %392 : vector<2x64xf32> to vector<2x64xbf16>
    %394 = vector.broadcast %341 : vector<2x1xf32> to vector<2x128xf32>
    %395 = arith.mulf %394, %5 : vector<2x128xf32>
    %cst_53 = arith.constant dense<0.000000e+00> : vector<2x128xf32>
    %396 = tpu.matmul %393, %2, %cst_53 {dimension_numbers = #tpu.dot_dimension_numbers<[1], [0], [0], [1], [0, 0, 1, 1], [], []>} : vector<2x64xbf16>, vector<64x128xbf16>, vector<2x128xf32> -> vector<2x128xf32>
    %397 = arith.addf %395, %396 : vector<2x128xf32>
    %398 = arith.addf %397, %8 : vector<2x128xf32>
    %399 = vector.extract_strided_slice %398 {offsets = [0, 0], sizes = [2, 96], strides = [1, 1]} : vector<2x128xf32> to vector<2x96xf32>
    %400 = arith.negf %399 : vector<2x96xf32>
    %401 = math.exp %400 : vector<2x96xf32>
    %cst_54 = arith.constant 1.000000e+00 : f32
    %402 = vector.broadcast %cst_54 : f32 to vector<2x96xf32>
    %403 = arith.addf %402, %401 : vector<2x96xf32>
    %404 = arith.divf %402, %403 : vector<2x96xf32>
    %405 = vector.extract_strided_slice %398 {offsets = [0, 96], sizes = [2, 32], strides = [1, 1]} : vector<2x128xf32> to vector<2x32xf32>
    %406 = math.tanh %405 : vector<2x32xf32>
    %407 = vector.extract_strided_slice %404 {offsets = [0, 0], sizes = [2, 32], strides = [1, 1]} : vector<2x96xf32> to vector<2x32xf32>
    %408 = vector.extract_strided_slice %404 {offsets = [0, 32], sizes = [2, 32], strides = [1, 1]} : vector<2x96xf32> to vector<2x32xf32>
    %409 = vector.extract_strided_slice %404 {offsets = [0, 64], sizes = [2, 32], strides = [1, 1]} : vector<2x96xf32> to vector<2x32xf32>
    %410 = arith.mulf %408, %335 : vector<2x32xf32>
    %411 = arith.mulf %407, %406 : vector<2x32xf32>
    %412 = arith.addf %410, %411 : vector<2x32xf32>
    %413 = math.tanh %412 : vector<2x32xf32>
    %414 = arith.mulf %409, %413 : vector<2x32xf32>
    %415 = arith.mulf %414, %11 : vector<2x32xf32>
    %cst_55 = arith.constant dense<0.000000e+00> : vector<2xf32>
    %416 = vector.multi_reduction <add>, %415, %cst_55 [1] : vector<2x32xf32> to vector<2xf32>
    %417 = vector.shape_cast %416 : vector<2xf32> to vector<2x1xf32>
    %418 = arith.addf %417, %14 : vector<2x1xf32>
    %419 = arith.negf %418 : vector<2x1xf32>
    %420 = math.exp %419 : vector<2x1xf32>
    %cst_56 = arith.constant 1.000000e+00 : f32
    %421 = vector.broadcast %cst_56 : f32 to vector<2x1xf32>
    %422 = arith.addf %421, %420 : vector<2x1xf32>
    %423 = arith.divf %421, %422 : vector<2x1xf32>
    %424 = vector.shape_cast %414 : vector<2x32xf32> to vector<2x1x32xf32>
    %425 = vector.broadcast %424 : vector<2x1x32xf32> to vector<2x8x32xf32>
    %426 = arith.mulf %425, %191 : vector<2x8x32xf32>
    %cst_57 = arith.constant dense<0.000000e+00> : vector<2x8xf32>
    %427 = vector.multi_reduction <add>, %426, %cst_57 [2] : vector<2x8x32xf32> to vector<2x8xf32>
    %cst_58 = arith.constant dense<0xFF800000> : vector<2xf32>
    %428 = vector.multi_reduction <maximumf>, %427, %cst_58 [1] : vector<2x8xf32> to vector<2xf32>
    %429 = vector.shape_cast %428 : vector<2xf32> to vector<2x1xf32>
    %430 = vector.broadcast %429 : vector<2x1xf32> to vector<2x8xf32>
    %431 = arith.subf %427, %430 : vector<2x8xf32>
    %432 = math.exp %431 : vector<2x8xf32>
    %cst_59 = arith.constant dense<0.000000e+00> : vector<2xf32>
    %433 = vector.multi_reduction <add>, %432, %cst_59 [1] : vector<2x8xf32> to vector<2xf32>
    %434 = vector.shape_cast %433 : vector<2xf32> to vector<2x1xf32>
    %435 = tpu.reciprocal %434 {approx = true} : vector<2x1xf32> -> vector<2x1xf32>
    %436 = vector.broadcast %435 : vector<2x1xf32> to vector<2x8xf32>
    %437 = arith.mulf %432, %436 : vector<2x8xf32>
    %438 = vector.extract_strided_slice %437 {offsets = [0, 0], sizes = [2, 1], strides = [1, 1]} : vector<2x8xf32> to vector<2x1xf32>
    %439 = vector.broadcast %438 : vector<2x1xf32> to vector<2x32xf32>
    %440 = arith.mulf %439, %42 : vector<2x32xf32>
    %441 = vector.extract_strided_slice %437 {offsets = [0, 1], sizes = [2, 1], strides = [1, 1]} : vector<2x8xf32> to vector<2x1xf32>
    %442 = vector.broadcast %441 : vector<2x1xf32> to vector<2x32xf32>
    %443 = arith.mulf %442, %62 : vector<2x32xf32>
    %444 = arith.addf %440, %443 : vector<2x32xf32>
    %445 = vector.extract_strided_slice %437 {offsets = [0, 2], sizes = [2, 1], strides = [1, 1]} : vector<2x8xf32> to vector<2x1xf32>
    %446 = vector.broadcast %445 : vector<2x1xf32> to vector<2x32xf32>
    %447 = arith.mulf %446, %82 : vector<2x32xf32>
    %448 = arith.addf %444, %447 : vector<2x32xf32>
    %449 = vector.extract_strided_slice %437 {offsets = [0, 3], sizes = [2, 1], strides = [1, 1]} : vector<2x8xf32> to vector<2x1xf32>
    %450 = vector.broadcast %449 : vector<2x1xf32> to vector<2x32xf32>
    %451 = arith.mulf %450, %102 : vector<2x32xf32>
    %452 = arith.addf %448, %451 : vector<2x32xf32>
    %453 = vector.extract_strided_slice %437 {offsets = [0, 4], sizes = [2, 1], strides = [1, 1]} : vector<2x8xf32> to vector<2x1xf32>
    %454 = vector.broadcast %453 : vector<2x1xf32> to vector<2x32xf32>
    %455 = arith.mulf %454, %122 : vector<2x32xf32>
    %456 = arith.addf %452, %455 : vector<2x32xf32>
    %457 = vector.extract_strided_slice %437 {offsets = [0, 5], sizes = [2, 1], strides = [1, 1]} : vector<2x8xf32> to vector<2x1xf32>
    %458 = vector.broadcast %457 : vector<2x1xf32> to vector<2x32xf32>
    %459 = arith.mulf %458, %142 : vector<2x32xf32>
    %460 = arith.addf %456, %459 : vector<2x32xf32>
    %461 = vector.extract_strided_slice %437 {offsets = [0, 6], sizes = [2, 1], strides = [1, 1]} : vector<2x8xf32> to vector<2x1xf32>
    %462 = vector.broadcast %461 : vector<2x1xf32> to vector<2x32xf32>
    %463 = arith.mulf %462, %162 : vector<2x32xf32>
    %464 = arith.addf %460, %463 : vector<2x32xf32>
    %465 = vector.extract_strided_slice %437 {offsets = [0, 7], sizes = [2, 1], strides = [1, 1]} : vector<2x8xf32> to vector<2x1xf32>
    %466 = vector.broadcast %465 : vector<2x1xf32> to vector<2x32xf32>
    %467 = arith.mulf %466, %182 : vector<2x32xf32>
    %468 = arith.addf %464, %467 : vector<2x32xf32>
    %469 = tpu.concatenate %468, %414 in 1 : vector<2x32xf32>, vector<2x32xf32> -> vector<2x64xf32>
    %470 = arith.truncf %469 : vector<2x64xf32> to vector<2x64xbf16>
    %471 = vector.broadcast %418 : vector<2x1xf32> to vector<2x128xf32>
    %472 = arith.mulf %471, %5 : vector<2x128xf32>
    %cst_60 = arith.constant dense<0.000000e+00> : vector<2x128xf32>
    %473 = tpu.matmul %470, %2, %cst_60 {dimension_numbers = #tpu.dot_dimension_numbers<[1], [0], [0], [1], [0, 0, 1, 1], [], []>} : vector<2x64xbf16>, vector<64x128xbf16>, vector<2x128xf32> -> vector<2x128xf32>
    %474 = arith.addf %472, %473 : vector<2x128xf32>
    %475 = arith.addf %474, %8 : vector<2x128xf32>
    %476 = vector.extract_strided_slice %475 {offsets = [0, 0], sizes = [2, 96], strides = [1, 1]} : vector<2x128xf32> to vector<2x96xf32>
    %477 = arith.negf %476 : vector<2x96xf32>
    %478 = math.exp %477 : vector<2x96xf32>
    %cst_61 = arith.constant 1.000000e+00 : f32
    %479 = vector.broadcast %cst_61 : f32 to vector<2x96xf32>
    %480 = arith.addf %479, %478 : vector<2x96xf32>
    %481 = arith.divf %479, %480 : vector<2x96xf32>
    %482 = vector.extract_strided_slice %475 {offsets = [0, 96], sizes = [2, 32], strides = [1, 1]} : vector<2x128xf32> to vector<2x32xf32>
    %483 = math.tanh %482 : vector<2x32xf32>
    %484 = vector.extract_strided_slice %481 {offsets = [0, 0], sizes = [2, 32], strides = [1, 1]} : vector<2x96xf32> to vector<2x32xf32>
    %485 = vector.extract_strided_slice %481 {offsets = [0, 32], sizes = [2, 32], strides = [1, 1]} : vector<2x96xf32> to vector<2x32xf32>
    %486 = vector.extract_strided_slice %481 {offsets = [0, 64], sizes = [2, 32], strides = [1, 1]} : vector<2x96xf32> to vector<2x32xf32>
    %487 = arith.mulf %485, %412 : vector<2x32xf32>
    %488 = arith.mulf %484, %483 : vector<2x32xf32>
    %489 = arith.addf %487, %488 : vector<2x32xf32>
    %490 = math.tanh %489 : vector<2x32xf32>
    %491 = arith.mulf %486, %490 : vector<2x32xf32>
    %492 = arith.mulf %491, %11 : vector<2x32xf32>
    %cst_62 = arith.constant dense<0.000000e+00> : vector<2xf32>
    %493 = vector.multi_reduction <add>, %492, %cst_62 [1] : vector<2x32xf32> to vector<2xf32>
    %494 = vector.shape_cast %493 : vector<2xf32> to vector<2x1xf32>
    %495 = arith.addf %494, %14 : vector<2x1xf32>
    %496 = arith.negf %495 : vector<2x1xf32>
    %497 = math.exp %496 : vector<2x1xf32>
    %cst_63 = arith.constant 1.000000e+00 : f32
    %498 = vector.broadcast %cst_63 : f32 to vector<2x1xf32>
    %499 = arith.addf %498, %497 : vector<2x1xf32>
    %500 = arith.divf %498, %499 : vector<2x1xf32>
    %501 = tpu.concatenate %269, %346, %423, %500 in 1 : vector<2x1xf32>, vector<2x1xf32>, vector<2x1xf32>, vector<2x1xf32> -> vector<2x4xf32>
    %c0_64 = arith.constant 0 : index
    %c0_65 = arith.constant 0 : index
    %502 = vector.load %arg9[%c0_64, %c0_65] : memref<2x4xf32, #tpu.memory_space<vmem>>, vector<2x4xf32>
    tpu.vector_store %arg9[%c0_64, %c0_65], %501 {strides = array<i32>} : memref<2x4xf32, #tpu.memory_space<vmem>>, vector<2x4xf32>,
    return
  }
}

</mosaic_0001>

<bundles_post_ra>
// kernel: tpu_custom_call.1
= control target key start
LH: loop header
LB: loop body
LE: loop exit
PB: predicated region body
PF: predicated region fallthrough
CT: control target
= control target key end

     0   :  { %s5518_s0 = inlined_call_operand.vmem [shape: bf16[16,4], index: 0, kind: input, shape index: {}]   ;;  %s5519_s1 = inlined_call_operand.hbm [shape: bf16[4,128], index: 1, kind: input, shape index: {}]   ;;  %s5520_s2 = inlined_call_operand.hbm [shape: bf16[32,128], index: 2, kind: input, shape index: {}]   ;;  %s5521_s3 = inlined_call_operand.hbm [shape: f32[1,128], index: 3, kind: input, shape index: {}]   ;;  %s5522_s4 = inlined_call_operand.hbm [shape: f32[1,128], index: 4, kind: input, shape index: {}]   ;;  %s5523_s5 = inlined_call_operand.vmem [shape: bf16[64,128], index: 5, kind: input, shape index: {}]   ;;  %s5524_s6 = inlined_call_operand.vmem [shape: f32[1,128], index: 6, kind: input, shape index: {}]   ;;  %s5525_s7 = inlined_call_operand.vmem [shape: f32[1,32], index: 7, kind: input, shape index: {}]   ;;  %s5526_s8 = inlined_call_operand.<no memory space> [shape: f32[1,1], index: 8, kind: input, shape index: {}]   ;;  %s5527_s9 = inlined_call_operand.hbm [shape: f32[2,4], index: 9, kind: output, shape index: {}]  }
   0x1   :  { %v14_v0 = vstv %s5526_s8 }
   0x2   :  { %15 = vst [vmem:[#allocation2] sm:$0x1] %v14_v0 }
   0x3   :  { %16 = vsyncpa [#allocation4], 0 }
   0x4   :  { %17 = vsyncpa [#allocation7], 0 }
   0x5   :  { %18 = vsyncpa [#allocation10], 0 }
   0x6   :  { %19 = vsyncpa [#allocation5], 0  ;;  %s3966_s11 = smov [#allocation6]   ;;  %s3848_s15 = scalar_lea.hbm %s5520_s2, 256 }
   0x7   :  { %s37_s12 = sshll.u32 %s3966_s11, 4  ;;  %p3849_p0 = scmp.ne.s32.totalorder %s5520_s2, %s3848_s15  ;;  %s38_s12 = int_to_ptr.vmem [resolvable:$true] %s37_s12 }
   0x8   :  { %p3852_p1 = scmp.lt.u32.totalorder %s3848_s15, %s5520_s2 }
   0xa   :  { %p3854_p2 = pnand %p3852_p1, %p3849_p0 }
   0xc   :  { %3857 = shalt.err (!%p3854_p2)
}
   0xd   :  { %s3858_s8 = scalar_lea.vmem %s38_s12, 256  ;;  %p3863_p4 = scmp.lt.s32.totalorder %s38_s12, %s38_s12 }
   0xe   :  { %p3859_p3 = scmp.ne.s32.totalorder %s38_s12, %s3858_s8  ;;  %p3864_p5 = scmp.lt.s32.totalorder %s3858_s8, %s3858_s8 }
  0x10   :  { %p3865_p6 = por %p3864_p5, %p3863_p4 }
  0x12   :  { %p3866_p7 = pnand %p3865_p6, %p3859_p3 }
  0x14   :  { %3869 = shalt.err (!%p3866_p7)
}
  0x15   :  { %s3967_s20 = smov 64   ;;  %s3968_s21 = smov 4  }
  0x16   :  { %43 = dma.hbm_to_vmem [thread:$0]  %s5520_s2, 256, %s38_s12, [#allocation7], %s3967_s20, %s3967_s20, %s3968_s21  }
  0x17   :  { %s3969_s24 = smov [#allocation3]   ;;  %s3970_s26 = smov [#allocation8]  }
  0x18   :  { %s28_s25 = sshll.u32 %s3969_s24, 4  ;;  %s50_s27 = sshll.u32 %s3970_s26, 4  ;;  %s29_s25 = int_to_ptr.vmem [resolvable:$true] %s28_s25  ;;  %s51_s27 = int_to_ptr.vmem [resolvable:$true] %s50_s27 }
  0x19   :  { %s3870_s30 = scalar_lea.hbm %s5519_s1, 32 }
  0x1a   :  { %p3871_p8 = scmp.ne.s32.totalorder %s5519_s1, %s3870_s30  ;;  %p3874_p9 = scmp.lt.u32.totalorder %s3870_s30, %s5519_s1 }
  0x1c   :  { %p3876_p10 = pnand %p3874_p9, %p3871_p8 }
  0x1e   :  { %3879 = shalt.err (!%p3876_p10)
}
  0x1f   :  { %s3880_s2 = scalar_lea.vmem %s29_s25, 32  ;;  %p3885_p12 = scmp.lt.s32.totalorder %s29_s25, %s29_s25 }
  0x20   :  { %p3881_p11 = scmp.ne.s32.totalorder %s29_s25, %s3880_s2  ;;  %p3886_p13 = scmp.lt.s32.totalorder %s3880_s2, %s3880_s2 }
  0x22   :  { %p3887_p0 = por %p3886_p13, %p3885_p12 }
  0x24   :  { %p3888_p1 = pnand %p3887_p0, %p3881_p11 }
  0x26   :  { %3891 = shalt.err (!%p3888_p1)
}
  0x27   :  { %31 = dma.hbm_to_vmem [thread:$0]  %s5519_s1, 32, %s29_s25, [#allocation4]  }
  0x28   :  { %s3892_s18 = scalar_lea.hbm %s5521_s3, 16 }
  0x29   :  { %p3893_p2 = scmp.ne.s32.totalorder %s5521_s3, %s3892_s18  ;;  %p3896_p3 = scmp.lt.u32.totalorder %s3892_s18, %s5521_s3 }
  0x2b   :  { %p3898_p4 = pnand %p3896_p3, %p3893_p2 }
  0x2d   :  { %3901 = shalt.err (!%p3898_p4)
}
  0x2e   :  { %s3902_s23 = scalar_lea.vmem %s51_s27, 16  ;;  %s3906_s24 = scalar_lea.vmem %s51_s27, 32 }
  0x2f   :  { %p3903_p5 = scmp.ne.s32.totalorder %s51_s27, %s3902_s23  ;;  %p3907_p6 = scmp.lt.s32.totalorder %s51_s27, %s51_s27 }
  0x30   :  { %p3908_p7 = scmp.lt.s32.totalorder %s3906_s24, %s3902_s23 }
  0x32   :  { %p3909_p8 = por %p3908_p7, %p3907_p6 }
  0x34   :  { %p3910_p9 = pnand %p3909_p8, %p3903_p5 }
  0x36   :  { %3913 = shalt.err (!%p3910_p9)
}
  0x37   :  { %53 = dma.hbm_to_vmem [thread:$0]  %s5521_s3, 16, %s51_s27, [#allocation7]  }
  0x38   :  { %s3971_s26 = smov [#allocation9]   ;;  %s3914_s10 = scalar_lea.hbm %s5522_s4, 16 }
  0x39   :  { %s60_s28 = sshll.u32 %s3971_s26, 4  ;;  %p3915_p10 = scmp.ne.s32.totalorder %s5522_s4, %s3914_s10  ;;  %s61_s28 = int_to_ptr.vmem [resolvable:$true] %s60_s28 }
  0x3a   :  { %p3918_p11 = scmp.lt.u32.totalorder %s3914_s10, %s5522_s4 }
  0x3c   :  { %p3920_p12 = pnand %p3918_p11, %p3915_p10 }
  0x3e   :  { %3923 = shalt.err (!%p3920_p12)
}
  0x3f   :  { %s3924_s12 = scalar_lea.vmem %s61_s28, 16  ;;  %s3928_s3 = scalar_lea.vmem %s61_s28, 32 }
  0x40   :  { %p3925_p13 = scmp.ne.s32.totalorder %s61_s28, %s3924_s12  ;;  %p3929_p0 = scmp.lt.s32.totalorder %s61_s28, %s61_s28 }
  0x41   :  { %p3930_p1 = scmp.lt.s32.totalorder %s3928_s3, %s3924_s12 }
  0x43   :  { %p3931_p2 = por %p3930_p1, %p3929_p0 }
  0x45   :  { %p3932_p3 = pnand %p3931_p2, %p3925_p13 }
  0x47   :  { %3935 = shalt.err (!%p3932_p3)
}
  0x48   :  { %63 = dma.hbm_to_vmem [thread:$0]  %s5522_s4, 16, %s61_s28, [#allocation10]  }
  0x49   :  { %3958 = dma.done.wait [#allocation4], 32  }
  0x4a   :  { %3959 = vsyncadd [#allocation4], 4294967264 }
  0x4b   :  { %3960 = dma.done.wait [#allocation7], 272  }
  0x4c   :  { %3961 = vsyncadd [#allocation7], 4294967024 }
  0x4d   :  { %3962 = dma.done.wait [#allocation10], 16  }
  0x4e   :  { %3963 = vsyncadd [#allocation10], 4294967280  ;;  %v5528_v1 = vmov 0.0   ;;  %vm3973_vm0 = vmmov 0   ;;  %v3974_v2 = vmov 0   ;;  %vm143_vm1 = vcmask 1041408  }
  0x4f   :  { %3485 = vmatprep.subr.bf16.mxu0 %v5528_v1  ;;  %3491 = vmatprep.subr.bf16.mxu1 %v5528_v1  ;;  %v85_v3 = vld [vmem:[#allocation3] sm:$0x3]  ;;  %v4092_v5 = vld [vmem:[#allocation6] sm:$0xff]   ;;  %vm139_vm2 = vcmask 31744   ;;  %v4098_v7 = vld [vmem:[#allocation6 + $0x8] sm:$0xff]   ;;  %vm200_vm3 = vcmask 261120   ;;  %v821_v55 = vlaneseq }
  0x50   :  { %3487 = vmatprep.mubr.msk.bf16.mxu0 %vm3973_vm0, %v5528_v1  ;;  %3495 = vmatprep.mubr.msk.bf16.mxu1 %vm3973_vm0, %v5528_v1  ;;  %v145_v4 = vsel %vm143_vm1, %v85_v3, 0  ;;  %v3702_v6 = vld [vmem:[%s5518_s0] sm:$0xff]   ;;  %v3403_v8 = vld [vmem:[#allocation8] ss:$0 sm:$0xff]  ;;  %s3975_s0 = smov 32   ;;  %vm1085_vm4 = vcmask 1040384  }
  0x51   :  { %3620 = vset.pattern.permute.xlu0 %v3974_v2  ;;  %3619 = vset.pattern.permute.xlu1 %v3974_v2  ;;  %v3976_v53 = vmov 1966171168   ;;  %v4141_v57 = vshrl.u32 %v821_v55, 7  ;;  %vm1090_vm5 = vcmask 1042432   ;;  %vm1093_vm6 = vcmask 1043456   ;;  %s3977_s21 = smov 96  }
  0x52   :  { %3486 = vmatpush3.bf16.msra.mxu0 %v145_v4  ;;  %3492 = vmatpush3.bf16.msra.mxu1 %v4092_v5  ;;  %v819_v54 = vunpack.c.l.s4 %v3976_v53  ;;  %vm1096_vm7 = vcmask 1044480   ;;  %vm1099_vm8 = vcmask 1045504   ;;  %vm1102_vm9 = vcmask 1046528   ;;  %s3979_s11 = smov 2   ;;  %s3980_s13 = smov 3  }
  0x53   :  { %3499 = vmatprep.subr.bf16.mxu0 %v5528_v1  ;;  %3493 = vmatprep.subr.bf16.mxu1 %v5528_v1  ;;  %5718 = vst [vmem:[#allocation16_spill] sm:$0xff] %v4141_v57  ;;  %vm1133_vm10 = vcmask 1041409   ;;  %vm1136_vm11 = vcmask 58368   ;;  %vm1801_vm12 = vcmask 130112   ;;  %vm1808_vm13 = vcmask 195712  }
  0x54   :  { %v820_v56 = vunpack.c.0.s8 %v819_v54  ;;  %vm1815_vm14 = vcmask 261312   ;;  %vm1869_vm15 = vcmask 523264  }
  0x55   :  { %3488 = vmatmul.mubr.msk.bf16.vlgmr.msra.gmra.mrb[0].mxu0 %vm139_vm2, %v3702_v6  ;;  %v4156_v6 = vsub.s32 0, %v4141_v57  ;;  %vm3376_vm2 = vcmask 15360  }
  0x56   :  { %3500 = vmatpush3.bf16.msra.mxu0 %v4092_v5  ;;  %3503 = vmatprep.mubr.msk.bf16.mxu0 %vm3973_vm0, %v5528_v1  ;;  %v4144_v58 = vsub.s32 %v820_v56, %v4141_v57 }
  0x57   :  { %3494 = vmatpush3.bf16.msra.mxu1 %v4098_v7  ;;  %3501 = vmatprep.subr.bf16.mxu0 %v5528_v1  ;;  %5720 = vst [vmem:[#allocation18_spill] sm:$0xff] %v4156_v6 }
  0x58   :  { %3507 = vmatprep.subr.bf16.mxu1 %v5528_v1  ;;  %5719 = vst [vmem:[#allocation17_spill] sm:$0xff] %v4144_v58 }
  0x5a   :  { %3496 = vmatmul.mubr.bf16.vlgmr.msra.gmra.mrb[0].mxu1 %v3974_v2  ;;  %3502 = vmatpush3.bf16.msra.mxu0 %v4098_v7 }
  0x5b   :  { %3508 = vmatpush3.bf16.msra.mxu1 %v4092_v5  ;;  %3511 = vmatprep.mubr.msk.bf16.mxu1 %vm3973_vm0, %v5528_v1 }
  0x5c   :  { %3509 = vmatprep.subr.bf16.mxu1 %v5528_v1  ;;  %3515 = vmatprep.subr.bf16.mxu0 %v5528_v1 }
  0x5f   :  { %3510 = vmatpush3.bf16.msra.mxu1 %v4098_v7 }
  0x60   :  { %3523 = vmatprep.subr.bf16.mxu1 %v5528_v1 }
 0x128   :  { %v181_v9 = vpop.f32.mrb[0].mxu0 }
 0x129   :  { %v3489_v10 = vpop.f32.mrb[1].mxu0  ;;  %v4116_v11 = vadd.f32 %v3403_v8, %v181_v9 }
 0x12a   :  { %v184_v12 = vpop.f32.mrb[2].mxu0 }
 0x12b   :  { %v4118_v13 = vadd.f32 %v3403_v8, %v184_v12  ;;  %v3490_v14 = vpop.f32.mrb[3].mxu0 }
 0x12d   :  { %v238_v15 = vpop.f32.mrb[0].mxu1 }
 0x12e   :  { %v244_v16 = vadd.f32 %v238_v15, %v4116_v11  ;;  %v3497_v17 = vpop.f32.mrb[1].mxu1 }
 0x12f   :  { %v241_v18 = vpop.f32.mrb[2].mxu1 }
 0x130   :  { %3708 = vtanh.f32 %v244_v16  ;;  %v3498_v19 = vpop.f32.mrb[3].mxu1  ;;  %v3408_v21 = vmul.f32 -1.442695, %v244_v16 }
 0x132   :  { %3710 = vpow2.f32 %v3408_v21 }
 0x13a   :  { %v3709_v20 = vpop.eup %3708 }
 0x13b   :  { %254 = vrot.lane.b32.xlu0 %v3709_v20, %s3975_s0 }
 0x13c   :  { %v3711_v22 = vpop.eup %3710 }
 0x13d   :  { %v248_v23 = vadd.f32 1.0, %v3711_v22 }
 0x13f   :  { %3712 = vrcp.f32 %v248_v23 }
 0x149   :  { %v3713_v24 = vpop.eup %3712 }
 0x14a   :  { %v252_v27 = vmul.f32 0.0, %v3713_v24 }
 0x1ad   :  { %v255_v25 = vpop.permute.xlu0 %254 }
 0x1ae   :  { %v257_v26 = vmul.f32 %v3713_v24, %v255_v25 }
 0x1b0   :  { %259 = vrot.lane.b32.xlu0 %v257_v26, %s3975_s0 }
 0x222   :  { %v260_v28 = vpop.permute.xlu0 %259 }
 0x223   :  { %v262_v29 = vadd.f32 %v260_v28, %v252_v27 }
 0x225   :  { %3714 = vtanh.f32 %v262_v29  ;;  %v328_v48 = vrot.slane %v262_v29, 6 }
 0x22f   :  { %v3715_v30 = vpop.eup %3714 }
 0x230   :  { %265 = vrot.lane.b32.xlu1 %v3715_v30, %s3975_s0 }
 0x2a2   :  { %v266_v31 = vpop.permute.xlu1 %265 }
 0x2a3   :  { %v4124_v32 = vmul.f32 %v3713_v24, %v266_v31 }
 0x2a5   :  { %v269_v33 = vpack.c.bf16 %v4124_v32, %v4124_v32  ;;  %v824_v61 = vrot.slane %v4124_v32, %v4144_v58 }
 0x2a7   :  { %271 = vrot.lane.b32.xlu1 %v269_v33, %s3967_s20  ;;  %v825_v4 = vcombine.high %v824_v61, %v824_v61  ;;  %v832_v10 = vrot.slane %v824_v61, %v4144_v58 }
 0x2a9   :  { %v839_v15 = vrot.slane %v825_v4, %v4144_v58 }
 0x319   :  { %v272_v34 = vpop.permute.xlu1 %271 }
 0x31a   :  { %3504 = vmatmul.mubr.msk.bf16.vlgmr.msra.gmra.mrb[4].mxu0 %vm200_vm3, %v272_v34 }
 0x31b   :  { %3516 = vmatpush3.bf16.msra.mxu0 %v4092_v5  ;;  %3519 = vmatprep.mubr.msk.bf16.mxu0 %vm3973_vm0, %v5528_v1 }
 0x31c   :  { %3517 = vmatprep.subr.bf16.mxu0 %v5528_v1 }
 0x31f   :  { %3518 = vmatpush3.bf16.msra.mxu0 %v4098_v7 }
 0x320   :  { %3531 = vmatprep.subr.bf16.mxu0 %v5528_v1 }
 0x3ed   :  { %v310_v35 = vpop.f32.mrb[4].mxu0 }
 0x3ee   :  { %v317_v36 = vrot.slane %v310_v35, 6  ;;  %v3505_v37 = vpop.f32.mrb[5].mxu0 }
 0x3ef   :  { %v313_v38 = vpop.f32.mrb[6].mxu0 }
 0x3f0   :  { %v319_v39 = vadd.f32 %v317_v36, %v4116_v11  ;;  %v3506_v40 = vpop.f32.mrb[7].mxu0 }
 0x3f2   :  { %3716 = vtanh.f32 %v319_v39  ;;  %v3410_v42 = vmul.f32 -1.442695, %v319_v39 }
 0x3f4   :  { %3718 = vpow2.f32 %v3410_v42 }
 0x3fc   :  { %v3717_v41 = vpop.eup %3716 }
 0x3fd   :  { %332 = vrot.lane.b32.xlu0 %v3717_v41, %s3975_s0 }
 0x3fe   :  { %v3719_v43 = vpop.eup %3718 }
 0x3ff   :  { %v323_v44 = vadd.f32 1.0, %v3719_v43 }
 0x401   :  { %3720 = vrcp.f32 %v323_v44 }
 0x40b   :  { %v3721_v45 = vpop.eup %3720 }
 0x40c   :  { %v330_v49 = vmul.f32 %v3721_v45, %v328_v48 }
 0x46f   :  { %v333_v46 = vpop.permute.xlu0 %332 }
 0x470   :  { %v335_v47 = vmul.f32 %v3721_v45, %v333_v46 }
 0x472   :  { %337 = vrot.lane.b32.xlu1 %v335_v47, %s3975_s0 }
 0x4e4   :  { %v338_v50 = vpop.permute.xlu1 %337 }
 0x4e5   :  { %v340_v51 = vadd.f32 %v338_v50, %v330_v49 }
 0x4e7   :  { %3722 = vtanh.f32 %v340_v51  ;;  %v407_v34 = vrot.slane %v340_v51, 6 }
 0x4f1   :  { %v3723_v52 = vpop.eup %3722 }
 0x4f2   :  { %343 = vrot.lane.b32.xlu0 %v3723_v52, %s3975_s0 }
 0x564   :  { %v344_v59 = vpop.permute.xlu0 %343 }
 0x565   :  { %v4146_v60 = vmul.f32 %v3721_v45, %v344_v59 }
 0x567   :  { %v849_v62 = vrot.slane %v4146_v60, %v4144_v58  ;;  %v347_v63 = vpack.c.bf16 %v4146_v60, %v4146_v60 }
 0x569   :  { %v850_v0 = vcombine.high %v849_v62, %v849_v62  ;;  %v857_v2 = vrot.slane %v849_v62, %v4144_v58  ;;  %v349_v3 = vrot.slane %v347_v63, 1 }
 0x56b   :  { %v864_v8 = vrot.slane %v850_v0, %v4144_v58  ;;  %v865_v9 = vcombine.high %v857_v2, %v857_v2  ;;  %350 = vrot.lane.b32.xlu1 %v349_v3, %s3967_s20 }
 0x56d   :  { %v866_v12 = vcombine.high %v864_v8, %v864_v8  ;;  %v1018_v14 = vrot.slane %v865_v9, %v4156_v6 }
 0x56f   :  { %v1022_v16 = vrot.slane %v866_v12, %v4156_v6  ;;  %v1086_v17 = vsel %vm1085_vm4, %v832_v10, %v1018_v14 }
 0x571   :  { %v1087_v18 = vsel %vm1085_vm4, %v839_v15, %v1022_v16  ;;  %vm3380_vm4 = vcmask 25600  }
 0x5dd   :  { %v351_v19 = vpop.permute.xlu1 %350 }
 0x5de   :  { %3512 = vmatmul.mubr.msk.bf16.vlgmr.msra.gmra.mrb[4].mxu1 %vm200_vm3, %v351_v19 }
 0x5df   :  { %3524 = vmatpush3.bf16.msra.mxu1 %v4092_v5  ;;  %3527 = vmatprep.mubr.msk.bf16.mxu1 %vm3973_vm0, %v5528_v1 }
 0x5e0   :  { %3525 = vmatprep.subr.bf16.mxu1 %v5528_v1 }
 0x5e3   :  { %3526 = vmatpush3.bf16.msra.mxu1 %v4098_v7 }
 0x5e4   :  { %3539 = vmatprep.subr.bf16.mxu1 %v5528_v1 }
 0x6b1   :  { %v389_v20 = vpop.f32.mrb[4].mxu1 }
 0x6b2   :  { %v396_v21 = vrot.slane %v389_v20, 4  ;;  %v3513_v22 = vpop.f32.mrb[5].mxu1 }
 0x6b3   :  { %v392_v23 = vpop.f32.mrb[6].mxu1 }
 0x6b4   :  { %v398_v24 = vadd.f32 %v396_v21, %v4116_v11  ;;  %v3514_v25 = vpop.f32.mrb[7].mxu1 }
 0x6b6   :  { %3724 = vtanh.f32 %v398_v24  ;;  %v3412_v27 = vmul.f32 -1.442695, %v398_v24 }
 0x6b8   :  { %3726 = vpow2.f32 %v3412_v27 }
 0x6c0   :  { %v3725_v26 = vpop.eup %3724 }
 0x6c1   :  { %411 = vrot.lane.b32.xlu0 %v3725_v26, %s3975_s0 }
 0x6c2   :  { %v3727_v28 = vpop.eup %3726 }
 0x6c3   :  { %v402_v29 = vadd.f32 1.0, %v3727_v28 }
 0x6c5   :  { %3728 = vrcp.f32 %v402_v29 }
 0x6cf   :  { %v3729_v30 = vpop.eup %3728 }
 0x6d0   :  { %v409_v35 = vmul.f32 %v3729_v30, %v407_v34 }
 0x733   :  { %v412_v31 = vpop.permute.xlu0 %411 }
 0x734   :  { %v414_v33 = vmul.f32 %v3729_v30, %v412_v31 }
 0x736   :  { %416 = vrot.lane.b32.xlu1 %v414_v33, %s3975_s0 }
 0x7a8   :  { %v417_v36 = vpop.permute.xlu1 %416 }
 0x7a9   :  { %v419_v37 = vadd.f32 %v417_v36, %v409_v35 }
 0x7ab   :  { %3730 = vtanh.f32 %v419_v37  ;;  %v486_v10 = vrot.slane %v419_v37, 6 }
 0x7b5   :  { %v3731_v38 = vpop.eup %3730 }
 0x7b6   :  { %422 = vrot.lane.b32.xlu0 %v3731_v38, %s3975_s0 }
 0x828   :  { %v423_v39 = vpop.permute.xlu0 %422 }
 0x829   :  { %v4175_v40 = vmul.f32 %v3729_v30, %v423_v39 }
 0x82b   :  { %v868_v41 = vcombine.high %v4175_v40, %v4175_v40  ;;  %v426_v42 = vpack.c.bf16 %v4175_v40, %v4175_v40 }
 0x82d   :  { %v875_v43 = vrot.slane %v868_v41, %v4144_v58  ;;  %v428_v44 = vrot.slane %v426_v42, 2 }
 0x82f   :  { %v876_v45 = vcombine.high %v875_v43, %v875_v43  ;;  %v883_v46 = vrot.slane %v875_v43, %v4144_v58  ;;  %429 = vrot.lane.b32.xlu1 %v428_v44, %s3967_s20 }
 0x831   :  { %v890_v47 = vrot.slane %v876_v45, %v4144_v58  ;;  %v1028_v48 = vrot.slane %v883_v46, %v4156_v6 }
 0x833   :  { %v1032_v49 = vrot.slane %v890_v47, %v4156_v6  ;;  %v1088_v50 = vsel %vm143_vm1, %v1086_v17, %v1028_v48 }
 0x835   :  { %v1089_v51 = vsel %vm143_vm1, %v1087_v18, %v1032_v49  ;;  %vm1950_vm1 = vcmask 254976  }
 0x8a1   :  { %v430_v52 = vpop.permute.xlu1 %429 }
 0x8a2   :  { %3520 = vmatmul.mubr.msk.bf16.vlgmr.msra.gmra.mrb[8].mxu0 %vm200_vm3, %v430_v52 }
 0x8a3   :  { %3532 = vmatpush3.bf16.msra.mxu0 %v4092_v5  ;;  %3535 = vmatprep.mubr.msk.bf16.mxu0 %vm3973_vm0, %v5528_v1 }
 0x8a4   :  { %3533 = vmatprep.subr.bf16.mxu0 %v5528_v1 }
 0x8a7   :  { %3534 = vmatpush3.bf16.msra.mxu0 %v4098_v7 }
 0x8a8   :  { %3547 = vmatprep.subr.bf16.mxu0 %v5528_v1 }
 0x975   :  { %v468_v53 = vpop.f32.mrb[8].mxu0 }
 0x976   :  { %v475_v54 = vrot.slane %v468_v53, 2  ;;  %v3521_v56 = vpop.f32.mrb[9].mxu0 }
 0x977   :  { %v471_v59 = vpop.f32.mrb[10].mxu0 }
 0x978   :  { %v477_v61 = vadd.f32 %v475_v54, %v4116_v11  ;;  %v3522_v62 = vpop.f32.mrb[11].mxu0 }
 0x97a   :  { %3732 = vtanh.f32 %v477_v61  ;;  %v3414_v0 = vmul.f32 -1.442695, %v477_v61 }
 0x97c   :  { %3734 = vpow2.f32 %v3414_v0 }
 0x984   :  { %v3733_v63 = vpop.eup %3732 }
 0x985   :  { %490 = vrot.lane.b32.xlu0 %v3733_v63, %s3975_s0 }
 0x986   :  { %v3735_v2 = vpop.eup %3734 }
 0x987   :  { %v481_v3 = vadd.f32 1.0, %v3735_v2 }
 0x989   :  { %3736 = vrcp.f32 %v481_v3 }
 0x993   :  { %v3737_v4 = vpop.eup %3736 }
 0x994   :  { %v488_v12 = vmul.f32 %v3737_v4, %v486_v10 }
 0x9f7   :  { %v491_v8 = vpop.permute.xlu0 %490 }
 0x9f8   :  { %v493_v9 = vmul.f32 %v3737_v4, %v491_v8 }
 0x9fa   :  { %495 = vrot.lane.b32.xlu1 %v493_v9, %s3975_s0 }
 0xa6c   :  { %v496_v14 = vpop.permute.xlu1 %495 }
 0xa6d   :  { %v498_v15 = vadd.f32 %v496_v14, %v488_v12 }
 0xa6f   :  { %3738 = vtanh.f32 %v498_v15  ;;  %v562_v46 = vrot.slane %v498_v15, 6 }
 0xa79   :  { %v3739_v11 = vpop.eup %3738 }
 0xa7a   :  { %501 = vrot.lane.b32.xlu0 %v3739_v11, %s3975_s0 }
 0xaec   :  { %v502_v16 = vpop.permute.xlu0 %501 }
 0xaed   :  { %v4200_v17 = vmul.f32 %v3737_v4, %v502_v16 }
 0xaef   :  { %v892_v18 = vcombine.high %v4200_v17, %v4200_v17  ;;  %v505_v19 = vpack.c.bf16 %v4200_v17, %v4200_v17 }
 0xaf1   :  { %v899_v20 = vrot.slane %v892_v18, %v4144_v58  ;;  %v507_v21 = vrot.slane %v505_v19, 3 }
 0xaf3   :  { %v900_v22 = vcombine.high %v899_v20, %v899_v20  ;;  %v907_v23 = vrot.slane %v899_v20, %v4144_v58  ;;  %508 = vrot.lane.b32.xlu1 %v507_v21, %s3967_s20 }
 0xaf5   :  { %v914_v24 = vrot.slane %v900_v22, %v4144_v58  ;;  %v915_v25 = vcombine.high %v907_v23, %v907_v23 }
 0xaf7   :  { %v916_v26 = vcombine.high %v914_v24, %v914_v24  ;;  %v1038_v27 = vrot.slane %v915_v25, %v4156_v6 }
 0xaf9   :  { %v1042_v28 = vrot.slane %v916_v26, %v4156_v6  ;;  %v1091_v29 = vsel %vm1090_vm5, %v1088_v50, %v1038_v27 }
 0xafb   :  { %v1092_v30 = vsel %vm1090_vm5, %v1089_v51, %v1042_v28 }
 0xb65   :  { %v509_v31 = vpop.permute.xlu1 %508 }
 0xb66   :  { %3528 = vmatmul.mubr.msk.bf16.vlgmr.msra.gmra.mrb[8].mxu1 %vm200_vm3, %v509_v31 }
 0xb67   :  { %3540 = vmatpush3.bf16.msra.mxu1 %v4092_v5  ;;  %3543 = vmatprep.mubr.msk.bf16.mxu1 %vm3973_vm0, %v5528_v1 }
 0xb68   :  { %3541 = vmatprep.subr.bf16.mxu1 %v5528_v1 }
 0xb6b   :  { %3542 = vmatpush3.bf16.msra.mxu1 %v4098_v7 }
 0xb6c   :  { %3555 = vmatprep.subr.bf16.mxu1 %v5528_v1 }
 0xc39   :  { %v547_v33 = vpop.f32.mrb[8].mxu1 }
 0xc3a   :  { %v553_v34 = vadd.f32 %v547_v33, %v4118_v13  ;;  %v3529_v35 = vpop.f32.mrb[9].mxu1 }
 0xc3b   :  { %v550_v36 = vpop.f32.mrb[10].mxu1 }
 0xc3c   :  { %3740 = vtanh.f32 %v553_v34  ;;  %v3530_v37 = vpop.f32.mrb[11].mxu1  ;;  %v3416_v39 = vmul.f32 -1.442695, %v553_v34 }
 0xc3e   :  { %3742 = vpow2.f32 %v3416_v39 }
 0xc46   :  { %v3741_v38 = vpop.eup %3740 }
 0xc47   :  { %566 = vrot.lane.b32.xlu0 %v3741_v38, %s3975_s0 }
 0xc48   :  { %v3743_v41 = vpop.eup %3742 }
 0xc49   :  { %v557_v42 = vadd.f32 1.0, %v3743_v41 }
 0xc4b   :  { %3744 = vrcp.f32 %v557_v42 }
 0xc55   :  { %v3745_v43 = vpop.eup %3744 }
 0xc56   :  { %v564_v47 = vmul.f32 %v3745_v43, %v562_v46 }
 0xcb9   :  { %v567_v44 = vpop.permute.xlu0 %566 }
 0xcba   :  { %v569_v45 = vmul.f32 %v3745_v43, %v567_v44 }
 0xcbc   :  { %571 = vrot.lane.b32.xlu1 %v569_v45, %s3975_s0 }
 0xd2e   :  { %v572_v48 = vpop.permute.xlu1 %571 }
 0xd2f   :  { %v574_v49 = vadd.f32 %v572_v48, %v564_v47 }
 0xd31   :  { %3746 = vtanh.f32 %v574_v49  ;;  %v640_v20 = vrot.slane %v574_v49, 6 }
 0xd3b   :  { %v3747_v50 = vpop.eup %3746 }
 0xd3c   :  { %577 = vrot.lane.b32.xlu0 %v3747_v50, %s3975_s0 }
 0xdae   :  { %v578_v51 = vpop.permute.xlu0 %577 }
 0xdaf   :  { %v4223_v52 = vmul.f32 %v3745_v43, %v578_v51 }
 0xdb1   :  { %v924_v53 = vrot.slane %v4223_v52, %v4144_v58  ;;  %v581_v54 = vpack.c.bf16 %v4223_v52, %v4223_v52 }
 0xdb3   :  { %v925_v56 = vcombine.high %v924_v53, %v924_v53  ;;  %v932_v59 = vrot.slane %v924_v53, %v4144_v58  ;;  %583 = vrot.lane.b32.xlu1 %v581_v54, %s3967_s20 }
 0xdb5   :  { %v939_v61 = vrot.slane %v925_v56, %v4144_v58  ;;  %v1048_v62 = vrot.slane %v932_v59, %v4156_v6 }
 0xdb7   :  { %v1052_v63 = vrot.slane %v939_v61, %v4156_v6  ;;  %v1094_v0 = vsel %vm1093_vm6, %v1091_v29, %v1048_v62 }
 0xdb9   :  { %v1095_v2 = vsel %vm1093_vm6, %v1092_v30, %v1052_v63 }
 0xe25   :  { %v584_v3 = vpop.permute.xlu1 %583 }
 0xe26   :  { %3536 = vmatmul.mubr.msk.bf16.vlgmr.msra.gmra.mrb[12].mxu0 %vm200_vm3, %v584_v3 }
 0xe27   :  { %3548 = vmatpush3.bf16.msra.mxu0 %v4092_v5  ;;  %3551 = vmatprep.mubr.msk.bf16.mxu0 %vm3973_vm0, %v5528_v1 }
 0xe28   :  { %3549 = vmatprep.subr.bf16.mxu0 %v5528_v1 }
 0xe2b   :  { %3550 = vmatpush3.bf16.msra.mxu0 %v4098_v7 }
 0xe2c   :  { %3567 = vmatprep.subr.bf16.mxu0 %v5528_v1 }
 0xef9   :  { %v622_v4 = vpop.f32.mrb[12].mxu0 }
 0xefa   :  { %v629_v8 = vrot.slane %v622_v4, 6  ;;  %v3537_v9 = vpop.f32.mrb[13].mxu0 }
 0xefb   :  { %v625_v10 = vpop.f32.mrb[14].mxu0 }
 0xefc   :  { %v631_v12 = vadd.f32 %v629_v8, %v4118_v13  ;;  %v3538_v14 = vpop.f32.mrb[15].mxu0 }
 0xefe   :  { %3748 = vtanh.f32 %v631_v12  ;;  %v3418_v5 = vmul.f32 -1.442695, %v631_v12 }
 0xf00   :  { %3750 = vpow2.f32 %v3418_v5 }
 0xf08   :  { %v3749_v15 = vpop.eup %3748 }
 0xf09   :  { %644 = vrot.lane.b32.xlu0 %v3749_v15, %s3975_s0 }
 0xf0a   :  { %v3751_v11 = vpop.eup %3750 }
 0xf0b   :  { %v635_v16 = vadd.f32 1.0, %v3751_v11 }
 0xf0d   :  { %3752 = vrcp.f32 %v635_v16 }
 0xf17   :  { %v3753_v18 = vpop.eup %3752 }
 0xf18   :  { %v642_v21 = vmul.f32 %v3753_v18, %v640_v20 }
 0xf7b   :  { %v645_v7 = vpop.permute.xlu0 %644 }
 0xf7c   :  { %v647_v19 = vmul.f32 %v3753_v18, %v645_v7 }
 0xf7e   :  { %649 = vrot.lane.b32.xlu1 %v647_v19, %s3975_s0 }
 0xff0   :  { %v650_v22 = vpop.permute.xlu1 %649 }
 0xff1   :  { %v652_v23 = vadd.f32 %v650_v22, %v642_v21 }
 0xff3   :  { %3754 = vtanh.f32 %v652_v23  ;;  %v719_v59 = vrot.slane %v652_v23, 6 }
 0xffd   :  { %v3755_v24 = vpop.eup %3754 }
 0xffe   :  { %655 = vrot.lane.b32.xlu0 %v3755_v24, %s3975_s0 }
0x1070   :  { %v656_v25 = vpop.permute.xlu0 %655 }
0x1071   :  { %v4245_v26 = vmul.f32 %v3753_v18, %v656_v25 }
0x1073   :  { %v947_v27 = vrot.slane %v4245_v26, %v4144_v58  ;;  %v659_v28 = vpack.c.bf16 %v4245_v26, %v4245_v26 }
0x1075   :  { %v948_v29 = vcombine.high %v947_v27, %v947_v27  ;;  %v955_v30 = vrot.slane %v947_v27, %v4144_v58  ;;  %v661_v31 = vrot.slane %v659_v28, 1 }
0x1077   :  { %v962_v33 = vrot.slane %v948_v29, %v4144_v58  ;;  %v963_v34 = vcombine.high %v955_v30, %v955_v30  ;;  %662 = vrot.lane.b32.xlu1 %v661_v31, %s3967_s20 }
0x1079   :  { %v964_v35 = vcombine.high %v962_v33, %v962_v33  ;;  %v1058_v36 = vrot.slane %v963_v34, %v4156_v6 }
0x107b   :  { %v1097_v37 = vsel %vm1096_vm7, %v1094_v0, %v1058_v36  ;;  %v1062_v38 = vrot.slane %v964_v35, %v4156_v6 }
0x107d   :  { %v1098_v39 = vsel %vm1096_vm7, %v1095_v2, %v1062_v38 }
0x10e9   :  { %v663_v41 = vpop.permute.xlu1 %662 }
0x10ea   :  { %3544 = vmatmul.mubr.msk.bf16.vlgmr.msra.gmra.mrb[12].mxu1 %vm200_vm3, %v663_v41 }
0x10eb   :  { %3563 = vmatprep.mubr.msk.bf16.mxu1 %vm3973_vm0, %v5528_v1 }
0x11bd   :  { %v701_v42 = vpop.f32.mrb[12].mxu1 }
0x11be   :  { %v708_v43 = vrot.slane %v701_v42, 4  ;;  %v3545_v44 = vpop.f32.mrb[13].mxu1 }
0x11bf   :  { %v704_v45 = vpop.f32.mrb[14].mxu1 }
0x11c0   :  { %v710_v46 = vadd.f32 %v708_v43, %v4118_v13  ;;  %v3546_v47 = vpop.f32.mrb[15].mxu1 }
0x11c2   :  { %3756 = vtanh.f32 %v710_v46  ;;  %v3420_v49 = vmul.f32 -1.442695, %v710_v46 }
0x11c4   :  { %3758 = vpow2.f32 %v3420_v49 }
0x11cc   :  { %v3757_v48 = vpop.eup %3756 }
0x11cd   :  { %723 = vrot.lane.b32.xlu0 %v3757_v48, %s3975_s0 }
0x11ce   :  { %v3759_v50 = vpop.eup %3758 }
0x11cf   :  { %v714_v51 = vadd.f32 1.0, %v3759_v50 }
0x11d1   :  { %3760 = vrcp.f32 %v714_v51 }
0x11db   :  { %v3761_v53 = vpop.eup %3760 }
0x11dc   :  { %v721_v61 = vmul.f32 %v3761_v53, %v719_v59 }
0x123f   :  { %v724_v54 = vpop.permute.xlu0 %723 }
0x1240   :  { %v726_v56 = vmul.f32 %v3761_v53, %v724_v54 }
0x1242   :  { %728 = vrot.lane.b32.xlu1 %v726_v56, %s3975_s0 }
0x12b4   :  { %v729_v62 = vpop.permute.xlu1 %728 }
0x12b5   :  { %v731_v63 = vadd.f32 %v729_v62, %v721_v61 }
0x12b7   :  { %3762 = vtanh.f32 %v731_v63  ;;  %v798_v34 = vrot.slane %v731_v63, 6  ;;  %v4305_v63 = vsub.s32 1, %v4141_v57 }
0x12b9   :  { %5725 = vst [vmem:[#allocation23_spill] sm:$0xff] %v4305_v63 }
0x12c1   :  { %v3763_v0 = vpop.eup %3762 }
0x12c2   :  { %734 = vrot.lane.b32.xlu0 %v3763_v0, %s3975_s0  ;;  %v1223_v0 = vrot.slane %v4124_v32, %v4305_v63 }
0x1334   :  { %v735_v2 = vpop.permute.xlu0 %734 }
0x1335   :  { %v4263_v3 = vmul.f32 %v3761_v53, %v735_v2  ;;  %v4310_v2 = vand.u32 127, %v821_v55  ;;  %v1203_v55 = vrot.slane %v4124_v32, %v4156_v6 }
0x1337   :  { %v966_v4 = vcombine.high %v4263_v3, %v4263_v3  ;;  %v738_v8 = vpack.c.bf16 %v4263_v3, %v4263_v3  ;;  %5726 = vst [vmem:[#allocation24_spill] sm:$0xff] %v4310_v2 }
0x1339   :  { %v973_v9 = vrot.slane %v966_v4, %v4144_v58  ;;  %v740_v10 = vrot.slane %v738_v8, 2  ;;  %v4314_v4 = vsub.s32 %v4310_v2, %v4141_v57 }
0x133b   :  { %v974_v12 = vcombine.high %v973_v9, %v973_v9  ;;  %v981_v14 = vrot.slane %v973_v9, %v4144_v58  ;;  %741 = vrot.lane.b32.xlu1 %v740_v10, %s3967_s20  ;;  %5727 = vst [vmem:[#allocation25_spill] sm:$0xff] %v4314_v4 }
0x133d   :  { %v1068_v15 = vrot.slane %v981_v14, %v4156_v6  ;;  %v988_v5 = vrot.slane %v974_v12, %v4144_v58 }
0x133f   :  { %v1100_v11 = vsel %vm1099_vm8, %v1097_v37, %v1068_v15  ;;  %v1072_v16 = vrot.slane %v988_v5, %v4156_v6  ;;  %v4323_v5 = vsub.s32 2, %v4141_v57 }
0x1341   :  { %v1101_v18 = vsel %vm1099_vm8, %v1098_v39, %v1072_v16  ;;  %5728 = vst [vmem:[#allocation26_spill] sm:$0xff] %v4323_v5 }
0x13ad   :  { %v742_v7 = vpop.permute.xlu1 %741 }
0x13ae   :  { %3552 = vmatmul.mubr.msk.bf16.vlgmr.msra.gmra.mrb[16].mxu0 %vm200_vm3, %v742_v7 }
0x13af   :  { %3575 = vmatprep.mubr.msk.bf16.mxu0 %vm3973_vm0, %v5528_v1 }
0x1481   :  { %v780_v19 = vpop.f32.mrb[16].mxu0 }
0x1482   :  { %v787_v20 = vrot.slane %v780_v19, 2  ;;  %v3553_v21 = vpop.f32.mrb[17].mxu0 }
0x1483   :  { %v783_v22 = vpop.f32.mrb[18].mxu0 }
0x1484   :  { %v789_v23 = vadd.f32 %v787_v20, %v4118_v13  ;;  %v3554_v24 = vpop.f32.mrb[19].mxu0  ;;  %v4330_v22 = vsub.s32 3, %v4141_v57 }
0x1486   :  { %3764 = vtanh.f32 %v789_v23  ;;  %v3422_v27 = vmul.f32 -1.442695, %v789_v23  ;;  %5729 = vst [vmem:[#allocation27_spill] sm:$0xff] %v4330_v22 }
0x1488   :  { %3766 = vpow2.f32 %v3422_v27  ;;  %v4341_v27 = vsub.s32 4, %v4141_v57 }
0x148a   :  { %5730 = vst [vmem:[#allocation28_spill] sm:$0xff] %v4341_v27 }
0x1490   :  { %v3765_v25 = vpop.eup %3764 }
0x1491   :  { %802 = vrot.lane.b32.xlu0 %v3765_v25, %s3975_s0  ;;  %v1287_v25 = vrot.slane %v4146_v60, %v4330_v22 }
0x1492   :  { %v3767_v28 = vpop.eup %3766 }
0x1493   :  { %v793_v29 = vadd.f32 1.0, %v3767_v28  ;;  %v1339_v28 = vrot.slane %v4175_v40, %v4341_v27 }
0x1495   :  { %3768 = vrcp.f32 %v793_v29  ;;  %v4346_v29 = vsub.s32 5, %v4141_v57 }
0x149f   :  { %v3769_v30 = vpop.eup %3768 }
0x14a0   :  { %v800_v35 = vmul.f32 %v3769_v30, %v798_v34  ;;  %v1483_v34 = vrot.slane %v4223_v52, %v4156_v6 }
0x1503   :  { %v803_v31 = vpop.permute.xlu0 %802 }
0x1504   :  { %v805_v33 = vmul.f32 %v3769_v30, %v803_v31 }
0x1506   :  { %807 = vrot.lane.b32.xlu1 %v805_v33, %s3975_s0  ;;  %v4356_v33 = vsub.s32 7, %v4141_v57 }
0x1578   :  { %v808_v36 = vpop.permute.xlu1 %807 }
0x1579   :  { %v4281_v37 = vadd.f32 %v808_v36, %v800_v35  ;;  %v1503_v35 = vrot.slane %v4223_v52, %v4305_v63  ;;  %v1575_v36 = vrot.slane %v4245_v26, %v4330_v22  ;;  %v1627_v52 = vrot.slane %v4263_v3, %v4341_v27 }
0x157b   :  { %5721 = vst [vmem:[#allocation19_spill] sm:$0xff] %v4281_v37  ;;  %3770 = vtanh.f32 %v4281_v37 }
0x1585   :  { %v3771_v13 = vpop.eup %3770 }
0x1586   :  { %813 = vrot.lane.b32.xlu0 %v3771_v13, %s3975_s0  ;;  %v1647_v13 = vrot.slane %v4263_v3, %v4346_v29 }
0x15f8   :  { %v814_v38 = vpop.permute.xlu0 %813 }
0x15f9   :  { %v4285_v39 = vmul.f32 %v3769_v30, %v814_v38  ;;  %v4351_v30 = vsub.s32 6, %v4141_v57 }
0x15fb   :  { %5722 = vst [vmem:[#allocation20_spill] sm:$0xff] %v4285_v39  ;;  %v990_v41 = vcombine.high %v4285_v39, %v4285_v39  ;;  %v1411_v31 = vrot.slane %v4200_v17, %v4351_v30 }
0x15fd   :  { %v997_v42 = vrot.slane %v990_v41, %v4144_v58 }
0x15ff   :  { %v1005_v43 = vrot.slane %v997_v42, %v4144_v58  ;;  %v998_v44 = vcombine.high %v997_v42, %v997_v42  ;;  %v1719_v42 = vrot.slane %v4285_v39, %v4356_v33 }
0x1601   :  { %v1013_v45 = vcombine.high %v1005_v43, %v1005_v43  ;;  %v1012_v46 = vrot.slane %v998_v44, %v4144_v58 }
0x1603   :  { %v1078_v47 = vrot.slane %v1013_v45, %v4156_v6  ;;  %v1014_v48 = vcombine.high %v1012_v46, %v1012_v46 }
0x1605   :  { %v4293_v49 = vsel %vm1102_vm9, %v1100_v11, %v1078_v47  ;;  %v1082_v50 = vrot.slane %v1014_v48, %v4156_v6  ;;  %v1267_v11 = vrot.slane %v4146_v60, %v4323_v5  ;;  %v1359_v60 = vrot.slane %v4175_v40, %v4346_v29 }
0x1606   :  { %5723 = vst [vmem:[#allocation21_spill] sm:$0xff] %v4293_v49  ;;  %v1105_v51 = vmul.f32 %v4293_v49, %v1078_v47  ;;  %v1431_v40 = vrot.slane %v4200_v17, %v4356_v33  ;;  %v1555_v17 = vrot.slane %v4245_v26, %v4323_v5  ;;  %v1699_v26 = vrot.slane %v4285_v39, %v4351_v30 }
0x1607   :  { %v4297_v53 = vsel %vm1102_vm9, %v1101_v18, %v1082_v50 }
0x1608   :  { %5724 = vst [vmem:[#allocation22_spill] sm:$0xff] %v4297_v53  ;;  %1109 = vrot.lane.b32.xlu1 %v1105_v51, %s3967_s20  ;;  %v1106_v54 = vmul.f32 %v4297_v53, %v1082_v50 }
0x160a   :  { %1111 = vrot.lane.b32.xlu0 %v1106_v54, %s3967_s20 }
0x167a   :  { %v1110_v56 = vpop.permute.xlu1 %1109 }
0x167b   :  { %v1115_v59 = vsel %vm200_vm3, %v1110_v56, 0.0 }
0x167c   :  { %1116 = vadd.xlane.f32.xlu1 %v1115_v59  ;;  %v1112_v61 = vpop.permute.xlu0 %1111 }
0x167d   :  { %v1118_v62 = vsel %vm200_vm3, %v1112_v61, 0.0 }
0x167e   :  { %1119 = vadd.xlane.f32.xlu0 %v1118_v62 }
0x168d   :  { %1226 = vbcast.lane.b32.xlu1 %v1223_v0, 320 }
0x1709   :  { %v1117_v8 = vpop.xlane.xlu1 %1116 }
0x170a   :  { %v1128_v10 = vrot.slane %v1117_v8, %v4314_v4 }
0x170b   :  { %v1120_v9 = vpop.xlane.xlu0 %1119 }
0x170c   :  { %v1132_v12 = vrot.slane %v1120_v9, %v4314_v4 }
0x170d   :  { %v4384_v44 = vpop.permute.xlu1 %1226 }
0x170e   :  { %v1134_v14 = vsel %vm1133_vm10, %v1132_v12, %v1128_v10  ;;  %5735 = vst [vmem:[#allocation33_spill] sm:$0xff] %v4384_v44 }
0x170f   :  { %v1137_v15 = vsel %vm1136_vm11, %v1134_v14, -inf }
0x1710   :  { %1138 = vmax.xlane.f32.xlu0 %v1137_v15 }
0x1726   :  { %1206 = vbcast.lane.b32.xlu0 %v1203_v55, 320 }
0x172a   :  { %1210 = vbcast.lane.b32.xlu0 %v1203_v55, 328 }
0x172e   :  { %1230 = vbcast.lane.b32.xlu0 %v1223_v0, 328 }
0x1732   :  { %1270 = vbcast.lane.b32.xlu0 %v1267_v11, 320 }
0x1736   :  { %1274 = vbcast.lane.b32.xlu0 %v1267_v11, 328 }
0x179d   :  { %v1139_v16 = vpop.xlane.xlu0 %1138 }
0x179e   :  { %v1144_v18 = vrot.slane %v1139_v16, %v4156_v6  ;;  %v1148_v7 = vrot.slane %v1139_v16, %v4305_v63 }
0x17a0   :  { %v1151_v19 = vsub.f32 %v1117_v8, %v1144_v18  ;;  %v1152_v20 = vsub.f32 %v1120_v9, %v1148_v7 }
0x17a1   :  { %v4372_v38 = vpop.permute.xlu0 %1206 }
0x17a2   :  { %v1153_v21 = vmul.f32 1.442695, %v1151_v19  ;;  %v1155_v32 = vmul.f32 1.442695, %v1152_v20  ;;  %5731 = vst [vmem:[#allocation29_spill] sm:$0xff] %v4372_v38 }
0x17a4   :  { %3772 = vpow2.f32 %v1153_v21 }
0x17a5   :  { %3774 = vpow2.f32 %v1155_v32  ;;  %v4376_v41 = vpop.permute.xlu0 %1210 }
0x17a6   :  { %5732 = vst [vmem:[#allocation30_spill] sm:$0xff] %v4376_v41 }
0x17a9   :  { %v4380_v43 = vpop.permute.xlu0 %1230 }
0x17aa   :  { %5733 = vst [vmem:[#allocation31_spill] sm:$0xff] %v4380_v43 }
0x17ad   :  { %v4382_v3 = vpop.permute.xlu0 %1270 }
0x17ae   :  { %v4332_v23 = vpop.eup %3772  ;;  %5734 = vst [vmem:[#allocation32_spill] sm:$0xff] %v4382_v3 }
0x17af   :  { %v4334_v24 = vpop.eup %3774  ;;  %1160 = vperm.xlu1 %3619, %v4332_v23  }
0x17b0   :  { %1163 = vperm.xlu0 %3620, %v4334_v24  }
0x17b1   :  { %v4386_v45 = vpop.permute.xlu0 %1274 }
0x17b2   :  { %5736 = vst [vmem:[#allocation34_spill] sm:$0xff] %v4386_v45 }
0x17b3   :  { %1294 = vbcast.lane.b32.xlu1 %v1287_v25, 328 }
0x17b4   :  { %1290 = vbcast.lane.b32.xlu0 %v1287_v25, 320 }
0x17b7   :  { %1234 = vbcast.lane.b32.xlu1 %v1223_v0, 336 }
0x17b8   :  { %1214 = vbcast.lane.b32.xlu0 %v1203_v55, 336 }
0x17bb   :  { %1298 = vbcast.lane.b32.xlu1 %v1287_v25, 336 }
0x17bc   :  { %1278 = vbcast.lane.b32.xlu0 %v1267_v11, 336 }
0x17bf   :  { %1238 = vbcast.lane.b32.xlu1 %v1223_v0, 344 }
0x17c0   :  { %1218 = vbcast.lane.b32.xlu0 %v1203_v55, 344 }
0x17c3   :  { %1302 = vbcast.lane.b32.xlu1 %v1287_v25, 344 }
0x17c4   :  { %1282 = vbcast.lane.b32.xlu0 %v1267_v11, 344 }
0x17c7   :  { %1346 = vbcast.lane.b32.xlu1 %v1339_v28, 328 }
0x17c8   :  { %1342 = vbcast.lane.b32.xlu0 %v1339_v28, 320 }
0x17cb   :  { %1366 = vbcast.lane.b32.xlu1 %v1359_v60, 328 }
0x17cc   :  { %1362 = vbcast.lane.b32.xlu0 %v1359_v60, 320 }
0x17cf   :  { %1370 = vbcast.lane.b32.xlu1 %v1359_v60, 336 }
0x17d0   :  { %1350 = vbcast.lane.b32.xlu0 %v1339_v28, 336 }
0x17d3   :  { %1374 = vbcast.lane.b32.xlu1 %v1359_v60, 344 }
0x17d4   :  { %1354 = vbcast.lane.b32.xlu0 %v1339_v28, 344 }
0x17d7   :  { %1418 = vbcast.lane.b32.xlu1 %v1411_v31, 328 }
0x17d8   :  { %1414 = vbcast.lane.b32.xlu0 %v1411_v31, 320 }
0x17db   :  { %1438 = vbcast.lane.b32.xlu1 %v1431_v40, 328 }
0x17dc   :  { %1434 = vbcast.lane.b32.xlu0 %v1431_v40, 320 }
0x17df   :  { %1442 = vbcast.lane.b32.xlu1 %v1431_v40, 336 }
0x17e0   :  { %1422 = vbcast.lane.b32.xlu0 %v1411_v31, 336 }
0x17e3   :  { %1446 = vbcast.lane.b32.xlu1 %v1431_v40, 344 }
0x17e4   :  { %1426 = vbcast.lane.b32.xlu0 %v1411_v31, 344  ;;  %v4441_v31 = vld [vmem:[%s5523_s5] sm:$0xff]  }
0x17e5   :  { %5759 = vst [vmem:[#allocation57_spill] sm:$0xff] %v4441_v31  ;;  %3556 = vmatpush3.bf16.msra.mxu1 %v4441_v31  ;;  %3568 = vmatpush3.bf16.msra.mxu0 %v4441_v31 }
0x17e6   :  { %3557 = vmatprep.subr.bf16.mxu1 %v5528_v1  ;;  %3569 = vmatprep.subr.bf16.mxu0 %v5528_v1 }
0x17e7   :  { %1490 = vbcast.lane.b32.xlu1 %v1483_v34, 328 }
0x17e8   :  { %1486 = vbcast.lane.b32.xlu0 %v1483_v34, 320 }
0x17eb   :  { %1510 = vbcast.lane.b32.xlu1 %v1503_v35, 328 }
0x17ec   :  { %1506 = vbcast.lane.b32.xlu0 %v1503_v35, 320 }
0x17ef   :  { %1514 = vbcast.lane.b32.xlu1 %v1503_v35, 336 }
0x17f0   :  { %1494 = vbcast.lane.b32.xlu0 %v1483_v34, 336 }
0x17f3   :  { %1518 = vbcast.lane.b32.xlu1 %v1503_v35, 344 }
0x17f4   :  { %1498 = vbcast.lane.b32.xlu0 %v1483_v34, 344 }
0x17f7   :  { %1562 = vbcast.lane.b32.xlu1 %v1555_v17, 328 }
0x17f8   :  { %1558 = vbcast.lane.b32.xlu0 %v1555_v17, 320 }
0x17fb   :  { %1582 = vbcast.lane.b32.xlu1 %v1575_v36, 328 }
0x17fc   :  { %1578 = vbcast.lane.b32.xlu0 %v1575_v36, 320 }
0x17ff   :  { %1586 = vbcast.lane.b32.xlu1 %v1575_v36, 336 }
0x1800   :  { %1566 = vbcast.lane.b32.xlu0 %v1555_v17, 336 }
0x1803   :  { %1590 = vbcast.lane.b32.xlu1 %v1575_v36, 344 }
0x1804   :  { %1570 = vbcast.lane.b32.xlu0 %v1555_v17, 344 }
0x1807   :  { %1634 = vbcast.lane.b32.xlu1 %v1627_v52, 328 }
0x1808   :  { %1630 = vbcast.lane.b32.xlu0 %v1627_v52, 320 }
0x180b   :  { %1654 = vbcast.lane.b32.xlu1 %v1647_v13, 328 }
0x180c   :  { %1650 = vbcast.lane.b32.xlu0 %v1647_v13, 320 }
0x180f   :  { %1658 = vbcast.lane.b32.xlu1 %v1647_v13, 336 }
0x1810   :  { %1638 = vbcast.lane.b32.xlu0 %v1627_v52, 336 }
0x1813   :  { %1662 = vbcast.lane.b32.xlu1 %v1647_v13, 344 }
0x1814   :  { %1642 = vbcast.lane.b32.xlu0 %v1627_v52, 344 }
0x1818   :  { %1702 = vbcast.lane.b32.xlu0 %v1699_v26, 320 }
0x181c   :  { %1722 = vbcast.lane.b32.xlu0 %v1719_v42, 320 }
0x1820   :  { %1710 = vbcast.lane.b32.xlu0 %v1699_v26, 336 }
0x1824   :  { %1714 = vbcast.lane.b32.xlu0 %v1699_v26, 344 }
0x182e   :  { %v1161_v46 = vpop.permute.xlu1 %1160 }
0x182f   :  { %v1168_v47 = vrot.slane %v1161_v46, %v4314_v4  ;;  %v1164_v48 = vpop.permute.xlu0 %1163 }
0x1830   :  { %v1172_v50 = vrot.slane %v1164_v48, %v4314_v4 }
0x1832   :  { %v4390_v51 = vpop.permute.xlu1 %1294  ;;  %v1173_v54 = vsel %vm1133_vm10, %v1172_v50, %v1168_v47 }
0x1833   :  { %5737 = vst [vmem:[#allocation35_spill] sm:$0xff] %v4390_v51  ;;  %v1175_v59 = vsel %vm1136_vm11, %v1173_v54, 0.0  ;;  %v4404_v9 = vpop.permute.xlu0 %1290 }
0x1834   :  { %5743 = vst [vmem:[#allocation41_spill] sm:$0xff] %v4404_v9 }
0x1836   :  { %v4393_v56 = vpop.permute.xlu1 %1234 }
0x1837   :  { %5738 = vst [vmem:[#allocation36_spill] sm:$0xff] %v4393_v56  ;;  %1176 = vadd.xlane.f32.xlu1 %v1175_v59  ;;  %v4408_v12 = vpop.permute.xlu0 %1214 }
0x183a   :  { %v4396_v61 = vpop.permute.xlu1 %1298 }
0x183b   :  { %5739 = vst [vmem:[#allocation37_spill] sm:$0xff] %v4396_v61  ;;  %v4412_v15 = vpop.permute.xlu0 %1278 }
0x183c   :  { %5746 = vst [vmem:[#allocation44_spill] sm:$0xff] %v4412_v15 }
0x183e   :  { %v4398_v62 = vpop.permute.xlu1 %1238 }
0x183f   :  { %5740 = vst [vmem:[#allocation38_spill] sm:$0xff] %v4398_v62  ;;  %v4416_v11 = vpop.permute.xlu0 %1218 }
0x1840   :  { %5748 = vst [vmem:[#allocation46_spill] sm:$0xff] %v4416_v11 }
0x1842   :  { %v4400_v0 = vpop.permute.xlu1 %1302 }
0x1843   :  { %5741 = vst [vmem:[#allocation39_spill] sm:$0xff] %v4400_v0  ;;  %v4420_v18 = vpop.permute.xlu0 %1282 }
0x1844   :  { %5750 = vst [vmem:[#allocation48_spill] sm:$0xff] %v4420_v18 }
0x1846   :  { %v4402_v8 = vpop.permute.xlu1 %1346 }
0x1847   :  { %5742 = vst [vmem:[#allocation40_spill] sm:$0xff] %v4402_v8  ;;  %v4424_v19 = vpop.permute.xlu0 %1342 }
0x1848   :  { %1706 = vbcast.lane.b32.xlu1 %v1699_v26, 328  ;;  %5752 = vst [vmem:[#allocation50_spill] sm:$0xff] %v4424_v19 }
0x184a   :  { %v4406_v10 = vpop.permute.xlu1 %1366 }
0x184b   :  { %5744 = vst [vmem:[#allocation42_spill] sm:$0xff] %v4406_v10  ;;  %v4428_v21 = vpop.permute.xlu0 %1362 }
0x184c   :  { %1726 = vbcast.lane.b32.xlu1 %v1719_v42, 328  ;;  %5754 = vst [vmem:[#allocation52_spill] sm:$0xff] %v4428_v21 }
0x184e   :  { %v4410_v14 = vpop.permute.xlu1 %1370 }
0x184f   :  { %5745 = vst [vmem:[#allocation43_spill] sm:$0xff] %v4410_v14  ;;  %v4432_v25 = vpop.permute.xlu0 %1350 }
0x1850   :  { %1730 = vbcast.lane.b32.xlu1 %v1719_v42, 336  ;;  %5756 = vst [vmem:[#allocation54_spill] sm:$0xff] %v4432_v25 }
0x1852   :  { %v4414_v55 = vpop.permute.xlu1 %1374 }
0x1853   :  { %5747 = vst [vmem:[#allocation45_spill] sm:$0xff] %v4414_v55  ;;  %v4436_v60 = vpop.permute.xlu0 %1354 }
0x1854   :  { %1734 = vbcast.lane.b32.xlu1 %v1719_v42, 344  ;;  %5758 = vst [vmem:[#allocation56_spill] sm:$0xff] %v4436_v60 }
0x1856   :  { %v4418_v16 = vpop.permute.xlu1 %1418 }
0x1857   :  { %5749 = vst [vmem:[#allocation47_spill] sm:$0xff] %v4418_v16  ;;  %v4449_v34 = vpop.permute.xlu0 %1414 }
0x1858   :  { %5761 = vst [vmem:[#allocation59_spill] sm:$0xff] %v4449_v34 }
0x185a   :  { %v4422_v7 = vpop.permute.xlu1 %1438 }
0x185b   :  { %5751 = vst [vmem:[#allocation49_spill] sm:$0xff] %v4422_v7  ;;  %v4453_v17 = vpop.permute.xlu0 %1434 }
0x185e   :  { %v4426_v20 = vpop.permute.xlu1 %1442 }
0x185f   :  { %5753 = vst [vmem:[#allocation51_spill] sm:$0xff] %v4426_v20  ;;  %v4457_v52 = vpop.permute.xlu0 %1422 }
0x1860   :  { %5764 = vst [vmem:[#allocation62_spill] sm:$0xff] %v4457_v52 }
0x1862   :  { %v4430_v32 = vpop.permute.xlu1 %1446 }
0x1863   :  { %5755 = vst [vmem:[#allocation53_spill] sm:$0xff] %v4430_v32  ;;  %v4461_v26 = vpop.permute.xlu0 %1426 }
0x1864   :  { %5766 = vst [vmem:[#allocation64_spill] sm:$0xff] %v4461_v26 }
0x1866   :  { %v4434_v28 = vpop.permute.xlu1 %1490 }
0x1867   :  { %5757 = vst [vmem:[#allocation55_spill] sm:$0xff] %v4434_v28  ;;  %v4465_v46 = vpop.permute.xlu0 %1486 }
0x1868   :  { %5768 = vst [vmem:[#allocation66_spill] sm:$0xff] %v4465_v46 }
0x186a   :  { %v4443_v40 = vpop.permute.xlu1 %1510 }
0x186b   :  { %5760 = vst [vmem:[#allocation58_spill] sm:$0xff] %v4443_v40  ;;  %v4469_v48 = vpop.permute.xlu0 %1506 }
0x186c   :  { %5770 = vst [vmem:[#allocation68_spill] sm:$0xff] %v4469_v48 }
0x186e   :  { %v4451_v35 = vpop.permute.xlu1 %1514 }
0x186f   :  { %5762 = vst [vmem:[#allocation60_spill] sm:$0xff] %v4451_v35  ;;  %v4473_v54 = vpop.permute.xlu0 %1494 }
0x1870   :  { %5772 = vst [vmem:[#allocation70_spill] sm:$0xff] %v4473_v54 }
0x1872   :  { %v4455_v36 = vpop.permute.xlu1 %1518 }
0x1873   :  { %5763 = vst [vmem:[#allocation61_spill] sm:$0xff] %v4455_v36  ;;  %v4477_v1 = vpop.permute.xlu0 %1498 }
0x1874   :  { %5774 = vst [vmem:[#allocation72_spill] sm:$0xff] %v4477_v1 }
0x1876   :  { %v4459_v13 = vpop.permute.xlu1 %1562 }
0x1877   :  { %5765 = vst [vmem:[#allocation63_spill] sm:$0xff] %v4459_v13  ;;  %v4481_v49 = vpop.permute.xlu0 %1558 }
0x1878   :  { %5776 = vst [vmem:[#allocation74_spill] sm:$0xff] %v4481_v49 }
0x187a   :  { %v4463_v42 = vpop.permute.xlu1 %1582 }
0x187b   :  { %5767 = vst [vmem:[#allocation65_spill] sm:$0xff] %v4463_v42  ;;  %v4485_v37 = vpop.permute.xlu0 %1578 }
0x187c   :  { %5778 = vst [vmem:[#allocation76_spill] sm:$0xff] %v4485_v37 }
0x187e   :  { %v4467_v47 = vpop.permute.xlu1 %1586 }
0x187f   :  { %5769 = vst [vmem:[#allocation67_spill] sm:$0xff] %v4467_v47  ;;  %v4489_v4 = vpop.permute.xlu0 %1566 }
0x1880   :  { %5780 = vst [vmem:[#allocation78_spill] sm:$0xff] %v4489_v4 }
0x1882   :  { %v4471_v50 = vpop.permute.xlu1 %1590 }
0x1883   :  { %5771 = vst [vmem:[#allocation69_spill] sm:$0xff] %v4471_v50  ;;  %v4491_v2 = vpop.permute.xlu0 %1570 }
0x1884   :  { %5781 = vst [vmem:[#allocation79_spill] sm:$0xff] %v4491_v2 }
0x1886   :  { %v4475_v59 = vpop.permute.xlu1 %1634 }
0x1887   :  { %5773 = vst [vmem:[#allocation71_spill] sm:$0xff] %v4475_v59  ;;  %v4493_v26 = vpop.permute.xlu0 %1630 }
0x1888   :  { %5782 = vst [vmem:[#allocation80_spill] sm:$0xff] %v4493_v26 }
0x188a   :  { %v4479_v53 = vpop.permute.xlu1 %1654 }
0x188b   :  { %5775 = vst [vmem:[#allocation73_spill] sm:$0xff] %v4479_v53  ;;  %v4511_v4 = vpop.permute.xlu0 %1650 }
0x188c   :  { %5783 = vst [vmem:[#allocation81_spill] sm:$0xff] %v4511_v4 }
0x188e   :  { %v4483_v58 = vpop.permute.xlu1 %1658 }
0x188f   :  { %5777 = vst [vmem:[#allocation75_spill] sm:$0xff] %v4483_v58 }
0x1892   :  { %v4487_v31 = vpop.permute.xlu1 %1662 }
0x1893   :  { %5779 = vst [vmem:[#allocation77_spill] sm:$0xff] %v4487_v31 }
0x18c4   :  { %v1177_v57 = vpop.xlane.xlu1 %1176 }
0x18c5   :  { %3776 = vrcp.f32 %v1177_v57 }
0x18cf   :  { %v3777_v39 = vpop.eup %3776 }
0x18d0   :  { %v1183_v1 = vrot.slane %v3777_v39, %v4156_v6  ;;  %v1187_v54 = vrot.slane %v3777_v39, %v4305_v63 }
0x18d2   :  { %v1190_v60 = vmul.f32 %v4332_v23, %v1183_v1  ;;  %v1191_v52 = vmul.f32 %v4334_v24, %v1187_v54 }
0x18d4   :  { %v4500_v37 = vrot.slane %v1190_v60, %v4156_v6  ;;  %v4503_v31 = vrot.slane %v1190_v60, %v4305_v63  ;;  %v4506_v57 = vrot.slane %v1190_v60, %v4323_v5  ;;  %v4509_v2 = vrot.slane %v1190_v60, %v4330_v22 }
0x18d5   :  { %v4520_v24 = vrot.slane %v1190_v60, %v4341_v27  ;;  %v1199_v18 = vrot.slane %v1191_v52, %v4156_v6  ;;  %v1263_v11 = vrot.slane %v1191_v52, %v4305_v63  ;;  %v4525_v25 = vrot.slane %v1191_v52, %v4323_v5  ;;  %v4542_v63 = vpop.permute.xlu0 %1638 }
0x18d6   :  { %v1249_v39 = vmul.f32 %v4376_v41, %v4500_v37  ;;  %v1313_v1 = vmul.f32 %v4386_v45, %v4503_v31  ;;  %v1385_v23 = vmul.f32 %v4402_v8, %v4506_v57  ;;  %v1457_v41 = vmul.f32 %v4418_v16, %v4509_v2  ;;  %5784 = vst [vmem:[#allocation82_spill] sm:$0xff] %v4542_v63 }
0x18d7   :  { %v1253_v45 = vmul.f32 %v4380_v43, %v1199_v18  ;;  %v1317_v48 = vmul.f32 %v4390_v51, %v1263_v11  ;;  %v4532_v8 = vrot.slane %v1191_v52, %v4330_v22  ;;  %v4540_v5 = vrot.slane %v1191_v52, %v4341_v27 }
0x18d8   :  { %v1321_v54 = vadd.f32 %v1313_v1, %v1249_v39  ;;  %v1529_v39 = vmul.f32 %v4434_v28, %v4520_v24  ;;  %v4537_v1 = vrot.slane %v1190_v60, %v4346_v29  ;;  %v1254_v51 = vmul.f32 %v4393_v56, %v1199_v18 }
0x18d9   :  { %v4548_v43 = vrot.slane %v1190_v60, %v4351_v30  ;;  %v4551_v28 = vrot.slane %v1190_v60, %v4356_v33  ;;  %v1318_v22 = vmul.f32 %v4396_v61, %v1263_v11  ;;  %v1461_v63 = vmul.f32 %v4422_v7, %v4532_v8  ;;  %v4572_v7 = vpop.permute.xlu0 %1642 }
0x18da   :  { %v1393_v4 = vadd.f32 %v1385_v23, %v1321_v54  ;;  %v1325_v23 = vadd.f32 %v1317_v48, %v1253_v45  ;;  %v1389_v54 = vmul.f32 %v4406_v10, %v4525_v25  ;;  %v4561_v45 = vpop.permute.xlu1 %1706  ;;  %v1390_v60 = vmul.f32 %v4410_v14, %v4525_v25  ;;  %5785 = vst [vmem:[#allocation83_spill] sm:$0xff] %v4572_v7 }
0x18db   :  { %v1326_v48 = vadd.f32 %v1318_v22, %v1254_v51  ;;  %v1255_v56 = vmul.f32 %v4398_v62, %v1199_v18  ;;  %v4577_v51 = vrot.slane %v1191_v52, %v4356_v33  ;;  %v1248_v62 = vmul.f32 %v4372_v38, %v4500_v37 }
0x18dc   :  { %v1465_v16 = vadd.f32 %v1457_v41, %v1393_v4  ;;  %v1397_v27 = vadd.f32 %v1389_v54, %v1325_v23  ;;  %v4557_v4 = vrot.slane %v1191_v52, %v4346_v29  ;;  %v1601_v41 = vmul.f32 %v4459_v13, %v4537_v1 }
0x18dd   :  { %v1319_v23 = vmul.f32 %v4400_v0, %v1263_v11  ;;  %v1398_v54 = vadd.f32 %v1390_v60, %v1326_v48  ;;  %v1312_v48 = vmul.f32 %v4382_v3, %v4503_v31  ;;  %v1384_v0 = vmul.f32 %v4424_v19, %v4506_v57 }
0x18de   :  { %v1537_v6 = vadd.f32 %v1529_v39, %v1465_v16  ;;  %v1469_v61 = vadd.f32 %v1461_v63, %v1397_v27  ;;  %v1533_v16 = vmul.f32 %v4443_v40, %v4540_v5  ;;  %v4569_v39 = vrot.slane %v1191_v52, %v4351_v30 }
0x18df   :  { %v1605_v22 = vmul.f32 %v4463_v42, %v4557_v4  ;;  %v1462_v63 = vmul.f32 %v4426_v20, %v4532_v8  ;;  %v1327_v27 = vadd.f32 %v1319_v23, %v1255_v56  ;;  %v4593_v56 = vpop.permute.xlu1 %1726  ;;  %v1320_v23 = vadd.f32 %v1312_v48, %v1248_v62 }
0x18e0   :  { %v1609_v10 = vadd.f32 %v1601_v41, %v1537_v6  ;;  %v1541_v13 = vadd.f32 %v1533_v16, %v1469_v61  ;;  %v1673_v6 = vmul.f32 %v4475_v59, %v4548_v43  ;;  %v1745_v61 = vmul.f32 %v4561_v45, %v4551_v28 }
0x18e1   :  { %v1677_v52 = vmul.f32 %v4479_v53, %v4569_v39  ;;  %v1391_v41 = vmul.f32 %v4414_v55, %v4525_v25  ;;  %v1470_v16 = vadd.f32 %v1462_v63, %v1398_v54  ;;  %v1749_v14 = vmul.f32 %v4593_v56, %v4577_v51  ;;  %v4606_v54 = vpop.permute.xlu0 %1702 }
0x18e2   :  { %v1613_v60 = vadd.f32 %v1605_v22, %v1541_v13  ;;  %v1681_v20 = vadd.f32 %v1673_v6, %v1609_v10  ;;  %v1534_v42 = vmul.f32 %v4451_v35, %v4540_v5  ;;  %v1606_v53 = vmul.f32 %v4467_v47, %v4557_v4  ;;  %5786 = vst [vmem:[#allocation84_spill] sm:$0xff] %v4606_v54 }
0x18e3   :  { %v1399_v40 = vadd.f32 %v1391_v41, %v1327_v27  ;;  %v1392_v55 = vadd.f32 %v1384_v0, %v1320_v23  ;;  %v1456_v13 = vmul.f32 %v4449_v34, %v4509_v2  ;;  %v1252_v62 = vmul.f32 %v4384_v44, %v1199_v18 }
0x18e4   :  { %v1678_v10 = vmul.f32 %v4483_v58, %v4569_v39  ;;  %v1463_v22 = vmul.f32 %v4430_v32, %v4532_v8  ;;  %v1535_v63 = vmul.f32 %v4455_v36, %v4540_v5  ;;  %v1316_v48 = vmul.f32 %v4404_v9, %v1263_v11 }
0x18e5   :  { %v1685_v27 = vadd.f32 %v1677_v52, %v1613_v60  ;;  %v1542_v0 = vadd.f32 %v1534_v42, %v1470_v16  ;;  %v1464_v6 = vadd.f32 %v1456_v13, %v1392_v55  ;;  %v1528_v41 = vmul.f32 %v4465_v46, %v4520_v24  ;;  %v4633_v16 = vpop.permute.xlu0 %1722 }
0x18e6   :  { %v1753_v18 = vadd.f32 %v1745_v61, %v1681_v20  ;;  %v1607_v23 = vmul.f32 %v4471_v50, %v4557_v4  ;;  %v1324_v47 = vadd.f32 %v1316_v48, %v1252_v62  ;;  %v1388_v58 = vmul.f32 %v4428_v21, %v4525_v25  ;;  %5787 = vst [vmem:[#allocation85_spill] sm:$0xff] %v4633_v16  ;;  %v5788_v62 = vld [vmem:[#allocation68_spill] sm:$0xff] }
0x18e7   :  { %v1471_v32 = vadd.f32 %v1463_v22, %v1399_v40  ;;  %v1536_v35 = vadd.f32 %v1528_v41, %v1464_v6  ;;  %v1600_v36 = vmul.f32 %v4481_v49, %v4537_v1  ;;  %v1250_v11 = vmul.f32 %v4408_v12, %v4500_v37  ;;  %v5790_v41 = vld [vmem:[#allocation46_spill] sm:$0xff] }
0x18e8   :  { %v1672_v55 = vmul.f32 %v4493_v26, %v4548_v43  ;;  %v1396_v42 = vadd.f32 %v1388_v58, %v1324_v47  ;;  %v1460_v20 = vmul.f32 %v4453_v17, %v4532_v8  ;;  %v1314_v61 = vmul.f32 %v4412_v15, %v4503_v31  ;;  %v5789_v58 = vld [vmem:[#allocation54_spill] sm:$0xff] }
0x18e9   :  { %v1757_v52 = vadd.f32 %v1749_v14, %v1685_v27  ;;  %v1614_v25 = vadd.f32 %v1606_v53, %v1542_v0  ;;  %v1608_v40 = vadd.f32 %v1600_v36, %v1536_v35  ;;  %v1744_v60 = vmul.f32 %v4606_v54, %v4551_v28  ;;  %v5791_v53 = vld [vmem:[#allocation48_spill] sm:$0xff]  ;;  %v4643_v36 = vpop.permute.xlu1 %1730 }
0x18ea   :  { %v1468_v13 = vadd.f32 %v1460_v20, %v1396_v42  ;;  %v1532_v22 = vmul.f32 %v5788_v62, %v4540_v5  ;;  %v1322_v48 = vadd.f32 %v1314_v61, %v1250_v11  ;;  %v1386_v47 = vmul.f32 %v5789_v58, %v4506_v57  ;;  %5792 = vst [vmem:[#allocation54_spill] sm:$0xff] %v4643_v36  ;;  %v5793_v0 = vld [vmem:[#allocation76_spill] sm:$0xff]  ;;  %v5794_v5 = vld [vmem:[#allocation62_spill] sm:$0xff] }
0x18eb   :  { %v1543_v8 = vadd.f32 %v1535_v63, %v1471_v32  ;;  %v1680_v6 = vadd.f32 %v1672_v55, %v1608_v40  ;;  %v1251_v14 = vmul.f32 %v5790_v41, %v4500_v37  ;;  %v1315_v35 = vmul.f32 %v5791_v53, %v4503_v31  ;;  %v5795_v63 = vld [vmem:[#allocation56_spill] sm:$0xff]  ;;  %v5796_v40 = vld [vmem:[#allocation81_spill] sm:$0xff] }
0x18ec   :  { %v1540_v27 = vadd.f32 %v1532_v22, %v1468_v13  ;;  %v1604_v42 = vmul.f32 %v5793_v0, %v4557_v4  ;;  %v1394_v20 = vadd.f32 %v1386_v47, %v1322_v48  ;;  %v1458_v11 = vmul.f32 %v5794_v5, %v4509_v2  ;;  %v5797_v13 = vld [vmem:[#allocation70_spill] sm:$0xff]  ;;  %v5798_v47 = vld [vmem:[#allocation64_spill] sm:$0xff] }
0x18ed   :  { %v1686_v61 = vadd.f32 %v1678_v10, %v1614_v25  ;;  %v1752_v50 = vadd.f32 %v1744_v60, %v1680_v6  ;;  %v1323_v32 = vadd.f32 %v1315_v35, %v1251_v14  ;;  %v1387_v55 = vmul.f32 %v5795_v63, %v4506_v57  ;;  %v4657_v10 = vpop.permute.xlu0 %1710  ;;  %v5800_v6 = vld [vmem:[#allocation78_spill] sm:$0xff]  ;;  %v5801_v35 = vld [vmem:[#allocation77_spill] sm:$0xff] }
0x18ee   :  { %v1612_v37 = vadd.f32 %v1604_v42, %v1540_v27  ;;  %v1676_v31 = vmul.f32 %v5796_v40, %v4569_v39  ;;  %v1466_v53 = vadd.f32 %v1458_v11, %v1394_v20  ;;  %v1530_v22 = vmul.f32 %v5797_v13, %v4520_v24  ;;  %5799 = vst [vmem:[#allocation56_spill] sm:$0xff] %v4657_v10 }
0x18ef   :  { %v1615_v41 = vadd.f32 %v1607_v23, %v1543_v8  ;;  %v3621_v4 = vpack.i.bf16 %v1753_v18, %v1752_v50  ;;  %v1395_v48 = vadd.f32 %v1387_v55, %v1323_v32  ;;  %v1459_v5 = vmul.f32 %v5798_v47, %v4509_v2  ;;  %v5802_v50 = vld [vmem:[#allocation72_spill] sm:$0xff]  ;;  %v4669_v8 = vpop.permute.xlu1 %1734 }
0x18f0   :  { %v1684_v25 = vadd.f32 %v1676_v31, %v1612_v37  ;;  %v1748_v57 = vmul.f32 %v4633_v16, %v4577_v51  ;;  %v1538_v60 = vadd.f32 %v1530_v22, %v1466_v53  ;;  %v1602_v14 = vmul.f32 %v5800_v6, %v4537_v1  ;;  %5803 = vst [vmem:[#allocation81_spill] sm:$0xff] %v4669_v8  ;;  %v5804_v53 = vld [vmem:[#allocation82_spill] sm:$0xff]  ;;  %v5805_v37 = vld [vmem:[#allocation79_spill] sm:$0xff] }
0x18f1   :  { %v1679_v27 = vmul.f32 %v5801_v35, %v4569_v39  ;;  %3622 = vperm.xlu0 %3620, %v3621_v4   ;;  %v1467_v23 = vadd.f32 %v1459_v5, %v1395_v48  ;;  %v1531_v18 = vmul.f32 %v5802_v50, %v4520_v24  ;;  %v1750_v2 = vmul.f32 %v4643_v36, %v4577_v51 }
0x18f2   :  { %v1756_v42 = vadd.f32 %v1748_v57, %v1684_v25  ;;  %v1610_v20 = vadd.f32 %v1602_v14, %v1538_v60  ;;  %v1674_v11 = vmul.f32 %v5804_v53, %v4548_v43  ;;  %v1603_v39 = vmul.f32 %v5805_v37, %v4537_v1  ;;  %v4681_v57 = vpop.permute.xlu0 %1714 }
0x18f3   :  { %v1687_v32 = vadd.f32 %v1679_v27, %v1615_v41  ;;  %v1539_v55 = vadd.f32 %v1531_v18, %v1467_v23  ;;  %v1758_v31 = vadd.f32 %v1750_v2, %v1686_v61  ;;  %v1746_v24 = vmul.f32 %v4657_v10, %v4551_v28  ;;  %5806 = vst [vmem:[#allocation70_spill] sm:$0xff] %v4681_v57  ;;  %v5808_v23 = vld [vmem:[#allocation20_spill] sm:$0xff] }
0x18f4   :  { %v3626_v5 = vpack.i.bf16 %v1757_v52, %v1756_v42  ;;  %v1682_v22 = vadd.f32 %v1674_v11, %v1610_v20  ;;  %v1751_v4 = vmul.f32 %v4669_v8, %v4577_v51  ;;  %v1675_v25 = vmul.f32 %v4572_v7, %v4548_v43  ;;  %v4688_v51 = vld [vmem:[%s5523_s5 + $0x8] sm:$0xff]   ;;  %v4708_v2 = vld [vmem:[%s5523_s5 + $0x18] sm:$0xff]  }
0x18f5   :  { %v1611_v48 = vadd.f32 %v1603_v39, %v1539_v55  ;;  %v1747_v1 = vmul.f32 %v4681_v57, %v4551_v28  ;;  %5807 = vst [vmem:[#allocation78_spill] sm:$0xff] %v4688_v51  ;;  %v1838_v43 = vrot.slane %v5808_v23, 6  ;;  %3558 = vmatpush3.bf16.msra.mxu1 %v4688_v51  ;;  %3570 = vmatpush3.bf16.msra.mxu0 %v4688_v51  ;;  %v5809_v18 = vmov 0.0   ;;  %v4699_v28 = vld [vmem:[%s5523_s5 + $0x10] sm:$0xff]   ;;  %5811 = vst [vmem:[#allocation20_spill] sm:$0xff] %v4708_v2  ;;  %v5812_v42 = vld [vmem:[#allocation24_spill] sm:$0xff] }
0x18f6   :  { %3627 = vperm.xlu1 %3619, %v3626_v5   ;;  %v1754_v41 = vadd.f32 %v1746_v24, %v1682_v22  ;;  %v1759_v60 = vadd.f32 %v1751_v4, %v1687_v32  ;;  %3559 = vmatprep.subr.bf16.mxu1 %v5809_v18  ;;  %5810 = vst [vmem:[#allocation82_spill] sm:$0xff] %v4699_v28  ;;  %v1796_v20 = vadd.s32 4294967288, %v5812_v42  ;;  %v1803_v32 = vadd.s32 4294967280, %v5812_v42  ;;  %v5813_v55 = vld [vmem:[#allocation16_spill] sm:$0xff]  ;;  %v5835_v8 = vld [vmem:[#allocation47_spill] sm:$0xff] }
0x18f7   :  { %v1683_v14 = vadd.f32 %v1675_v25, %v1611_v48  ;;  %3571 = vmatprep.subr.bf16.mxu0 %v5809_v18  ;;  %v1810_v48 = vadd.s32 4294967272, %v5812_v42 }
0x18f8   :  { %v3631_v52 = vpack.i.bf16 %v1758_v31, %v1754_v41  ;;  %v4717_v39 = vsub.s32 %v1796_v20, %v5813_v55  ;;  %v4721_v25 = vsub.s32 %v1803_v32, %v5813_v55 }
0x18f9   :  { %v1755_v61 = vadd.f32 %v1747_v1, %v1683_v14  ;;  %3560 = vmatpush3.bf16.msra.mxu1 %v4699_v28  ;;  %3572 = vmatpush3.bf16.msra.mxu0 %v4699_v28 }
0x18fa   :  { %3632 = vperm.xlu0 %3620, %v3631_v52   ;;  %3561 = vmatprep.subr.bf16.mxu1 %v5809_v18  ;;  %5814 = vst [vmem:[#allocation24_spill] sm:$0xff] %v4717_v39  ;;  %5815 = vst [vmem:[#allocation16_spill] sm:$0xff] %v4721_v25 }
0x18fb   :  { %v3636_v27 = vpack.i.bf16 %v1759_v60, %v1755_v61  ;;  %3573 = vmatprep.subr.bf16.mxu0 %v5809_v18  ;;  %v5816_v60 = vld [vmem:[#allocation25_spill] sm:$0xff] }
0x18fd   :  { %3637 = vperm.xlu1 %3619, %v3636_v27   ;;  %3562 = vmatpush3.bf16.msra.mxu1 %v4708_v2 }
0x18fe   :  { %1839 = vrot.lane.b32.xlu0 %v1838_v43, %s3977_s21  ;;  %3574 = vmatpush3.bf16.msra.mxu0 %v4708_v2  ;;  %v4728_v43 = vsub.s32 %v1810_v48, %v5813_v55 }
0x18ff   :  { %3579 = vmatprep.subr.bf16.mxu1 %v5809_v18  ;;  %3591 = vmatprep.subr.bf16.mxu0 %v5809_v18 }
0x1900   :  { %5817 = vst [vmem:[#allocation86_spill] sm:$0xff] %v4728_v43 }
0x1970   :  { %v3623_v11 = vpop.permute.xlu0 %3622 }
0x1971   :  { %v3625_v5 = vunpack.i.h.bf16 %v3623_v11  ;;  %v3624_v22 = vunpack.i.l.bf16 %v3623_v11 }
0x1973   :  { %v1800_v1 = vrot.slane %v3625_v5, %v4717_v39  ;;  %v1795_v52 = vrot.slane %v3624_v22, %v5816_v60 }
0x1975   :  { %v3628_v31 = vpop.permute.xlu1 %3627 }
0x1976   :  { %v3630_v24 = vunpack.i.h.bf16 %v3628_v31  ;;  %v3629_v4 = vunpack.i.l.bf16 %v3628_v31  ;;  %v1802_v31 = vsel %vm1801_vm12, %v1800_v1, %v1795_v52  ;;  %v5818_v52 = vld [vmem:[#allocation57_spill] sm:$0xff] }
0x1978   :  { %v1824_v41 = vrot.slane %v3630_v24, %v4717_v39  ;;  %v1820_v14 = vrot.slane %v3629_v4, %v5816_v60 }
0x1979   :  { %v3633_v61 = vpop.permute.xlu0 %3632 }
0x197a   :  { %v3635_v27 = vunpack.i.h.bf16 %v3633_v61  ;;  %v3634_v23 = vunpack.i.l.bf16 %v3633_v61  ;;  %v1825_v32 = vsel %vm1801_vm12, %v1824_v41, %v1820_v14 }
0x197c   :  { %v3638_v42 = vpop.permute.xlu1 %3637  ;;  %v1829_v20 = vrot.slane %v3635_v27, %v4721_v25  ;;  %v1807_v11 = vrot.slane %v3634_v23, %v4721_v25 }
0x197d   :  { %v3640_v5 = vunpack.i.h.bf16 %v3638_v42  ;;  %v3639_v24 = vunpack.i.l.bf16 %v3638_v42  ;;  %v1840_v23 = vpop.permute.xlu0 %1839  ;;  %v4752_v42 = vld [vmem:[#allocation9] ss:$0 sm:$0xff] }
0x197e   :  { %v1830_v22 = vsel %vm1808_vm13, %v1829_v20, %v1825_v32  ;;  %v1809_v4 = vsel %vm1808_vm13, %v1807_v11, %v1802_v31  ;;  %5819 = vst [vmem:[#allocation57_spill] sm:$0xff] %v4752_v42  ;;  %v1844_v20 = vmul.f32 0.0, %v4752_v42  ;;  %v4758_v11 = vld [vmem:[%s5524_s6] ss:$0 sm:$0xff] }
0x197f   :  { %v1834_v55 = vrot.slane %v3640_v5, %v4728_v43  ;;  %v1814_v48 = vrot.slane %v3639_v24, %v4728_v43  ;;  %5820 = vst [vmem:[#allocation87_spill] sm:$0xff] %v4758_v11 }
0x1981   :  { %v1816_v61 = vsel %vm1815_vm14, %v1814_v48, %v1809_v4  ;;  %v1835_v27 = vsel %vm1815_vm14, %v1834_v55, %v1830_v22 }
0x1982   :  { %v1836_v41 = vsel %vm1133_vm10, %v1835_v27, %v1816_v61 }
0x1983   :  { %v1842_v14 = vsel %vm200_vm3, %v1836_v41, %v1840_v23 }
0x1984   :  { %v1843_v1 = vpack.c.bf16 %v1842_v14, %v1842_v14 }
0x1986   :  { %3564 = vmatmul.mubr.msk.bf16.vlgmr.msra.gmra.mrb[16].mxu1 %vm1869_vm15, %v1843_v1  ;;  %v5821_v1 = vld [vmem:[#allocation19_spill] sm:$0xff] }
0x1987   :  { %3580 = vmatpush3.bf16.msra.mxu1 %v5818_v52  ;;  %3587 = vmatprep.mubr.msk.bf16.mxu1 %vm3973_vm0, %v5809_v18  ;;  %v1923_v52 = vrot.slane %v5821_v1, 6  ;;  %v5826_v1 = vld [vmem:[#allocation21_spill] sm:$0xff] }
0x1988   :  { %3581 = vmatprep.subr.bf16.mxu1 %v5809_v18 }
0x198b   :  { %3582 = vmatpush3.bf16.msra.mxu1 %v4688_v51 }
0x198c   :  { %3583 = vmatprep.subr.bf16.mxu1 %v5809_v18 }
0x198f   :  { %3584 = vmatpush3.bf16.msra.mxu1 %v4699_v28  ;;  %v5833_v28 = vld [vmem:[#allocation34_spill] sm:$0xff] }
0x1990   :  { %3585 = vmatprep.subr.bf16.mxu1 %v5809_v18 }
0x1993   :  { %3586 = vmatpush3.bf16.msra.mxu1 %v4708_v2 }
0x1a59   :  { %v1907_v32 = vpop.f32.mrb[16].mxu1 }
0x1a5a   :  { %v1913_v31 = vadd.f32 %v1907_v32, %v1844_v20  ;;  %v3565_v5 = vpop.f32.mrb[17].mxu1 }
0x1a5b   :  { %v1910_v24 = vpop.f32.mrb[18].mxu1 }
0x1a5c   :  { %v1914_v22 = vadd.f32 %v4758_v11, %v1913_v31  ;;  %v3566_v4 = vpop.f32.mrb[19].mxu1 }
0x1a5d   :  { %v5824_v4 = vld [vmem:[#allocation17_spill] sm:$0xff] }
0x1a5e   :  { %3778 = vtanh.f32 %v1914_v22  ;;  %v3428_v48 = vmul.f32 -1.442695, %v1914_v22 }
0x1a60   :  { %3780 = vpow2.f32 %v3428_v48 }
0x1a68   :  { %v3779_v55 = vpop.eup %3778 }
0x1a69   :  { %1927 = vrot.lane.b32.xlu1 %v3779_v55, %s3975_s0 }
0x1a6a   :  { %v3781_v61 = vpop.eup %3780 }
0x1a6b   :  { %v1918_v27 = vadd.f32 1.0, %v3781_v61 }
0x1a6d   :  { %3782 = vrcp.f32 %v1918_v27  ;;  %v5825_v27 = vld [vmem:[#allocation18_spill] sm:$0xff] }
0x1a77   :  { %v3783_v23 = vpop.eup %3782 }
0x1a78   :  { %v1925_v20 = vmul.f32 %v3783_v23, %v1923_v52 }
0x1adb   :  { %v1928_v41 = vpop.permute.xlu1 %1927 }
0x1adc   :  { %v1930_v14 = vmul.f32 %v3783_v23, %v1928_v41 }
0x1ade   :  { %1932 = vrot.lane.b32.xlu0 %v1930_v14, %s3975_s0 }
0x1b50   :  { %v1933_v32 = vpop.permute.xlu0 %1932 }
0x1b51   :  { %v4764_v31 = vadd.f32 %v1933_v32, %v1925_v20  ;;  %v5827_v32 = vld [vmem:[#allocation22_spill] sm:$0xff] }
0x1b53   :  { %5822 = vst [vmem:[#allocation19_spill] sm:$0xff] %v4764_v31  ;;  %3784 = vtanh.f32 %v4764_v31 }
0x1b5d   :  { %v3785_v5 = vpop.eup %3784 }
0x1b5e   :  { %1938 = vrot.lane.b32.xlu1 %v3785_v5, %s3975_s0 }
0x1bd0   :  { %v1939_v24 = vpop.permute.xlu1 %1938 }
0x1bd1   :  { %v4768_v22 = vmul.f32 %v3783_v23, %v1939_v24 }
0x1bd3   :  { %5823 = vst [vmem:[#allocation88_spill] sm:$0xff] %v4768_v22  ;;  %v1968_v55 = vrot.slane %v4768_v22, %v5824_v4  ;;  %v5834_v22 = vld [vmem:[#allocation40_spill] sm:$0xff] }
0x1bd5   :  { %v1969_v48 = vcombine.high %v1968_v55, %v1968_v55  ;;  %v1976_v61 = vrot.slane %v1968_v55, %v5824_v4 }
0x1bd7   :  { %v1987_v41 = vrot.slane %v1976_v61, %v5825_v27  ;;  %v1983_v14 = vrot.slane %v1969_v48, %v5824_v4 }
0x1bd9   :  { %v1994_v52 = vmul.f32 %v1987_v41, %v5826_v1  ;;  %v1991_v20 = vrot.slane %v1983_v14, %v5825_v27 }
0x1bdb   :  { %1998 = vrot.lane.b32.xlu0 %v1994_v52, %s3967_s20  ;;  %v1995_v5 = vmul.f32 %v1991_v20, %v5827_v32 }
0x1bdd   :  { %2000 = vrot.lane.b32.xlu1 %v1995_v5, %s3967_s20 }
0x1c4d   :  { %v1999_v23 = vpop.permute.xlu0 %1998 }
0x1c4e   :  { %v2004_v24 = vsel %vm200_vm3, %v1999_v23, 0.0  ;;  %v5828_v23 = vld [vmem:[#allocation23_spill] sm:$0xff] }
0x1c4f   :  { %2005 = vadd.xlane.f32.xlu0 %v2004_v24  ;;  %v2001_v31 = vpop.permute.xlu1 %2000 }
0x1c50   :  { %v2007_v55 = vsel %vm200_vm3, %v2001_v31, 0.0 }
0x1c51   :  { %2008 = vadd.xlane.f32.xlu1 %v2007_v55 }
0x1cdc   :  { %v2006_v61 = vpop.xlane.xlu0 %2005 }
0x1cdd   :  { %v2015_v41 = vrot.slane %v2006_v61, %v5816_v60 }
0x1cde   :  { %v2009_v48 = vpop.xlane.xlu1 %2008 }
0x1cdf   :  { %v2019_v14 = vrot.slane %v2009_v48, %v5816_v60 }
0x1ce1   :  { %v2020_v52 = vsel %vm1133_vm10, %v2019_v14, %v2015_v41 }
0x1ce2   :  { %v2022_v20 = vsel %vm1136_vm11, %v2020_v52, -inf }
0x1ce3   :  { %2023 = vmax.xlane.f32.xlu0 %v2022_v20 }
0x1d70   :  { %v2024_v5 = vpop.xlane.xlu0 %2023 }
0x1d71   :  { %v2029_v32 = vrot.slane %v2024_v5, %v5825_v27  ;;  %v2033_v24 = vrot.slane %v2024_v5, %v5828_v23 }
0x1d73   :  { %v2036_v1 = vsub.f32 %v2006_v61, %v2029_v32  ;;  %v2037_v4 = vsub.f32 %v2009_v48, %v2033_v24 }
0x1d75   :  { %v2038_v31 = vmul.f32 1.442695, %v2036_v1  ;;  %v2040_v55 = vmul.f32 1.442695, %v2037_v4 }
0x1d77   :  { %3786 = vpow2.f32 %v2038_v31  ;;  %v5829_v31 = vld [vmem:[#allocation26_spill] sm:$0xff] }
0x1d78   :  { %3788 = vpow2.f32 %v2040_v55 }
0x1d81   :  { %v3787_v11 = vpop.eup %3786 }
0x1d82   :  { %v3789_v42 = vpop.eup %3788  ;;  %2045 = vperm.xlu0 %3620, %v3787_v11  }
0x1d83   :  { %2048 = vperm.xlu1 %3619, %v3789_v42  }
0x1e01   :  { %v2046_v2 = vpop.permute.xlu0 %2045 }
0x1e02   :  { %v2049_v41 = vpop.permute.xlu1 %2048  ;;  %v2053_v14 = vrot.slane %v2046_v2, %v5816_v60 }
0x1e03   :  { %v2057_v52 = vrot.slane %v2049_v41, %v5816_v60  ;;  %v5830_v41 = vld [vmem:[#allocation27_spill] sm:$0xff] }
0x1e05   :  { %v2058_v20 = vsel %vm1133_vm10, %v2057_v52, %v2053_v14  ;;  %v5831_v52 = vld [vmem:[#allocation28_spill] sm:$0xff] }
0x1e06   :  { %v2060_v5 = vsel %vm1136_vm11, %v2058_v20, 0.0 }
0x1e07   :  { %2061 = vadd.xlane.f32.xlu1 %v2060_v5 }
0x1e94   :  { %v2062_v32 = vpop.xlane.xlu1 %2061 }
0x1e95   :  { %3790 = vrcp.f32 %v2062_v32  ;;  %v5832_v32 = vld [vmem:[#allocation30_spill] sm:$0xff] }
0x1e9f   :  { %v3791_v4 = vpop.eup %3790 }
0x1ea0   :  { %v2068_v1 = vrot.slane %v3791_v4, %v5825_v27  ;;  %v2072_v48 = vrot.slane %v3791_v4, %v5828_v23 }
0x1ea2   :  { %v2075_v61 = vmul.f32 %v3787_v11, %v2068_v1  ;;  %v2076_v18 = vmul.f32 %v3789_v42, %v2072_v48 }
0x1ea4   :  { %v4795_v24 = vrot.slane %v2075_v61, %v5825_v27  ;;  %v4798_v2 = vrot.slane %v2075_v61, %v5828_v23  ;;  %v4801_v55 = vrot.slane %v2075_v61, %v5829_v31  ;;  %v4804_v14 = vrot.slane %v2075_v61, %v5830_v41 }
0x1ea5   :  { %v4807_v20 = vrot.slane %v2075_v61, %v5831_v52  ;;  %v4810_v5 = vrot.slane %v2075_v61, %v4346_v29  ;;  %v4821_v43 = vrot.slane %v2075_v61, %v4351_v30  ;;  %v4824_v25 = vrot.slane %v2075_v61, %v4356_v33 }
0x1ea6   :  { %v2085_v11 = vmul.f32 %v4795_v24, %v4372_v38  ;;  %v2086_v4 = vmul.f32 %v4795_v24, %v5832_v32  ;;  %v2101_v1 = vmul.f32 %v4798_v2, %v4382_v3  ;;  %v2102_v51 = vmul.f32 %v4798_v2, %v5833_v28  ;;  %v5836_v28 = vld [vmem:[#allocation55_spill] sm:$0xff] }
0x1ea7   :  { %v2125_v38 = vmul.f32 %v4801_v55, %v4424_v19  ;;  %v2126_v32 = vmul.f32 %v4801_v55, %v5834_v22  ;;  %v2149_v3 = vmul.f32 %v4804_v14, %v4449_v34  ;;  %v2150_v42 = vmul.f32 %v4804_v14, %v5835_v8 }
0x1ea8   :  { %v2109_v60 = vadd.f32 %v2101_v1, %v2085_v11  ;;  %v2110_v39 = vadd.f32 %v2102_v51, %v2086_v4  ;;  %v2173_v48 = vmul.f32 %v4807_v20, %v4465_v46  ;;  %v2174_v61 = vmul.f32 %v4807_v20, %v5836_v28  ;;  %v5837_v1 = vld [vmem:[#allocation63_spill] sm:$0xff] }
0x1ea9   :  { %v2197_v4 = vmul.f32 %v4810_v5, %v4481_v49  ;;  %v2198_v22 = vmul.f32 %v4810_v5, %v5837_v1  ;;  %v2221_v34 = vmul.f32 %v4821_v43, %v4493_v26  ;;  %v4845_v19 = vrot.slane %v2076_v18, %v5825_v27  ;;  %v5838_v1 = vld [vmem:[#allocation31_spill] sm:$0xff] }
0x1eaa   :  { %v2133_v11 = vadd.f32 %v2125_v38, %v2109_v60  ;;  %v2134_v51 = vadd.f32 %v2126_v32, %v2110_v39  ;;  %v4848_v8 = vrot.slane %v2076_v18, %v5828_v23  ;;  %v4851_v46 = vrot.slane %v2076_v18, %v5829_v31  ;;  %v5839_v23 = vld [vmem:[#allocation35_spill] sm:$0xff] }
0x1eab   :  { %v2222_v60 = vmul.f32 %v4821_v43, %v4475_v59  ;;  %v4856_v32 = vrot.slane %v2076_v18, %v5830_v41  ;;  %v2089_v26 = vmul.f32 %v4845_v19, %v4384_v44  ;;  %v2090_v49 = vmul.f32 %v4845_v19, %v5838_v1  ;;  %v5840_v1 = vld [vmem:[#allocation42_spill] sm:$0xff] }
0x1eac   :  { %v2157_v38 = vadd.f32 %v2149_v3, %v2133_v11  ;;  %v2158_v39 = vadd.f32 %v2150_v42, %v2134_v51  ;;  %v2105_v28 = vmul.f32 %v4848_v8, %v4404_v9  ;;  %v2106_v31 = vmul.f32 %v4848_v8, %v5839_v23 }
0x1ead   :  { %v4867_v11 = vrot.slane %v2076_v18, %v5831_v52  ;;  %v4870_v51 = vrot.slane %v2076_v18, %v4346_v29  ;;  %v2129_v44 = vmul.f32 %v4851_v46, %v4428_v21  ;;  %v2130_v27 = vmul.f32 %v4851_v46, %v5840_v1 }
0x1eae   :  { %v2181_v3 = vadd.f32 %v2173_v48, %v2157_v38  ;;  %v2182_v42 = vadd.f32 %v2174_v61, %v2158_v39  ;;  %v2113_v59 = vadd.f32 %v2105_v28, %v2089_v26  ;;  %v2114_v41 = vadd.f32 %v2106_v31, %v2090_v49  ;;  %v5841_v49 = vld [vmem:[#allocation49_spill] sm:$0xff] }
0x1eaf   :  { %v2245_v48 = vmul.f32 %v4824_v25, %v4606_v54  ;;  %v2246_v61 = vmul.f32 %v4824_v25, %v4561_v45  ;;  %v2153_v26 = vmul.f32 %v4856_v32, %v4453_v17  ;;  %v2154_v28 = vmul.f32 %v4856_v32, %v5841_v49  ;;  %v5844_v49 = vld [vmem:[#allocation65_spill] sm:$0xff] }
0x1eb0   :  { %v2205_v9 = vadd.f32 %v2197_v4, %v2181_v3  ;;  %v2206_v57 = vadd.f32 %v2198_v22, %v2182_v42  ;;  %v2137_v38 = vadd.f32 %v2129_v44, %v2113_v59  ;;  %v2138_v39 = vadd.f32 %v2130_v27, %v2114_v41  ;;  %v5842_v22 = vld [vmem:[#allocation58_spill] sm:$0xff] }
0x1eb1   :  { %v2177_v4 = vmul.f32 %v4867_v11, %v5788_v62  ;;  %v2178_v3 = vmul.f32 %v4867_v11, %v5842_v22  ;;  %v2201_v44 = vmul.f32 %v4870_v51, %v5793_v0  ;;  %v4891_v59 = vrot.slane %v2076_v18, %v4351_v30 }
0x1eb2   :  { %v2229_v31 = vadd.f32 %v2221_v34, %v2205_v9  ;;  %v2230_v21 = vadd.f32 %v2222_v60, %v2206_v57  ;;  %v2161_v42 = vadd.f32 %v2153_v26, %v2137_v38  ;;  %v2162_v54 = vadd.f32 %v2154_v28, %v2138_v39  ;;  %v5843_v34 = vld [vmem:[#allocation36_spill] sm:$0xff] }
0x1eb3   :  { %v2087_v9 = vmul.f32 %v4795_v24, %v4408_v12  ;;  %v2091_v57 = vmul.f32 %v4845_v19, %v5843_v34  ;;  %v2202_v38 = vmul.f32 %v4870_v51, %v5844_v49  ;;  %v4900_v39 = vrot.slane %v2076_v18, %v4356_v33 }
0x1eb4   :  { %v2253_v27 = vadd.f32 %v2245_v48, %v2229_v31  ;;  %v2254_v41 = vadd.f32 %v2246_v61, %v2230_v21  ;;  %v2185_v60 = vadd.f32 %v2177_v4, %v2161_v42  ;;  %v2186_v62 = vadd.f32 %v2178_v3, %v2162_v54  ;;  %v5845_v48 = vld [vmem:[#allocation37_spill] sm:$0xff] }
0x1eb5   :  { %v2103_v28 = vmul.f32 %v4798_v2, %v4412_v15  ;;  %v2107_v21 = vmul.f32 %v4848_v8, %v5845_v48  ;;  %v2225_v34 = vmul.f32 %v4891_v59, %v5796_v40  ;;  %v5846_v4 = vld [vmem:[#allocation73_spill] sm:$0xff]  ;;  %v2127_v18 = vmul.f32 %v4801_v55, %v5789_v58 }
0x1eb6   :  { %v3641_v26 = vpack.i.bf16 %v2254_v41, %v2253_v27  ;;  %v2209_v61 = vadd.f32 %v2201_v44, %v2185_v60  ;;  %v2210_v31 = vadd.f32 %v2202_v38, %v2186_v62  ;;  %v2226_v54 = vmul.f32 %v4891_v59, %v5846_v4  ;;  %v5847_v27 = vld [vmem:[#allocation43_spill] sm:$0xff]  ;;  %v5848_v4 = vld [vmem:[#allocation62_spill] sm:$0xff] }
0x1eb7   :  { %v2111_v3 = vadd.f32 %v2103_v28, %v2087_v9  ;;  %v2115_v42 = vadd.f32 %v2107_v21, %v2091_v57  ;;  %v2131_v41 = vmul.f32 %v4851_v46, %v5847_v27  ;;  %v2249_v62 = vmul.f32 %v4900_v39, %v4633_v16  ;;  %v5849_v57 = vld [vmem:[#allocation51_spill] sm:$0xff]  ;;  %v5851_v27 = vld [vmem:[#allocation46_spill] sm:$0xff] }
0x1eb8   :  { %3642 = vperm.xlu0 %3620, %v3641_v26   ;;  %v2233_v15 = vadd.f32 %v2225_v34, %v2209_v61  ;;  %v2234_v49 = vadd.f32 %v2226_v54, %v2210_v31  ;;  %v2250_v44 = vmul.f32 %v4900_v39, %v4593_v56  ;;  %v2151_v9 = vmul.f32 %v4804_v14, %v5848_v4  ;;  %v5850_v54 = vld [vmem:[#allocation60_spill] sm:$0xff] }
0x1eb9   :  { %v2135_v60 = vadd.f32 %v2127_v18, %v2111_v3  ;;  %v2139_v38 = vadd.f32 %v2131_v41, %v2115_v42  ;;  %v2155_v26 = vmul.f32 %v4856_v32, %v5849_v57  ;;  %v2175_v34 = vmul.f32 %v4807_v20, %v5797_v13  ;;  %v5852_v18 = vld [vmem:[#allocation38_spill] sm:$0xff]  ;;  %v5853_v4 = vld [vmem:[#allocation48_spill] sm:$0xff] }
0x1eba   :  { %v2257_v28 = vadd.f32 %v2249_v62, %v2233_v15  ;;  %v2258_v21 = vadd.f32 %v2250_v44, %v2234_v49  ;;  %v2179_v16 = vmul.f32 %v4867_v11, %v5850_v54  ;;  %v2088_v3 = vmul.f32 %v4795_v24, %v5851_v27  ;;  %v5854_v15 = vld [vmem:[#allocation39_spill] sm:$0xff] }
0x1ebb   :  { %v2159_v61 = vadd.f32 %v2151_v9, %v2135_v60  ;;  %v2163_v31 = vadd.f32 %v2155_v26, %v2139_v38  ;;  %v2092_v41 = vmul.f32 %v4845_v19, %v5852_v18  ;;  %v2104_v57 = vmul.f32 %v4798_v2, %v5853_v4  ;;  %v5855_v38 = vld [vmem:[#allocation67_spill] sm:$0xff] }
0x1ebc   :  { %v3646_v42 = vpack.i.bf16 %v2258_v21, %v2257_v28  ;;  %v2108_v49 = vmul.f32 %v4848_v8, %v5854_v15  ;;  %v2199_v60 = vmul.f32 %v4810_v5, %v5800_v6  ;;  %v2203_v9 = vmul.f32 %v4870_v51, %v5855_v38  ;;  %v5856_v28 = vld [vmem:[#allocation45_spill] sm:$0xff]  ;;  %v5857_v8 = vld [vmem:[#allocation75_spill] sm:$0xff] }
0x1ebd   :  { %v2183_v62 = vadd.f32 %v2175_v34, %v2159_v61  ;;  %v2187_v44 = vadd.f32 %v2179_v16, %v2163_v31  ;;  %v2112_v24 = vadd.f32 %v2104_v57, %v2088_v3  ;;  %v2128_v19 = vmul.f32 %v4801_v55, %v5795_v63  ;;  %v5858_v3 = vld [vmem:[#allocation53_spill] sm:$0xff] }
0x1ebe   :  { %3647 = vperm.xlu0 %3620, %v3646_v42   ;;  %v2116_v26 = vadd.f32 %v2108_v49, %v2092_v41  ;;  %v2132_v2 = vmul.f32 %v4851_v46, %v5856_v28  ;;  %v2223_v16 = vmul.f32 %v4821_v43, %v5804_v53  ;;  %v2227_v34 = vmul.f32 %v4891_v59, %v5857_v8 }
0x1ebf   :  { %v2207_v21 = vadd.f32 %v2199_v60, %v2183_v62  ;;  %v2211_v4 = vadd.f32 %v2203_v9, %v2187_v44  ;;  %v2136_v61 = vadd.f32 %v2128_v19, %v2112_v24  ;;  %v2152_v57 = vmul.f32 %v4804_v14, %v5798_v47  ;;  %v5859_v9 = vld [vmem:[#allocation61_spill] sm:$0xff] }
0x1ec0   :  { %v2140_v31 = vadd.f32 %v2132_v2, %v2116_v26  ;;  %v2156_v42 = vmul.f32 %v4856_v32, %v5858_v3  ;;  %v2247_v46 = vmul.f32 %v4824_v25, %v4657_v10  ;;  %v2251_v49 = vmul.f32 %v4900_v39, %v4643_v36  ;;  %v5860_v2 = vld [vmem:[#allocation69_spill] sm:$0xff]  ;;  %v5905_v3 = vld [vmem:[#allocation84_spill] sm:$0xff] }
0x1ec1   :  { %v2231_v55 = vadd.f32 %v2223_v16, %v2207_v21  ;;  %v2235_v41 = vadd.f32 %v2227_v34, %v2211_v4  ;;  %v2160_v62 = vadd.f32 %v2152_v57, %v2136_v61  ;;  %v2176_v60 = vmul.f32 %v4807_v20, %v5802_v50  ;;  %v5903_v50 = vld [vmem:[#allocation41_spill] sm:$0xff] }
0x1ec2   :  { %v2164_v44 = vadd.f32 %v2156_v42, %v2140_v31  ;;  %v2180_v24 = vmul.f32 %v4867_v11, %v5859_v9  ;;  %v2200_v4 = vmul.f32 %v4810_v5, %v5805_v37  ;;  %v2204_v21 = vmul.f32 %v4870_v51, %v5860_v2  ;;  %v5861_v42 = vld [vmem:[#allocation70_spill] sm:$0xff]  ;;  %v5896_v2 = vld [vmem:[#allocation55_spill] sm:$0xff]  ;;  %v5899_v37 = vld [vmem:[#allocation80_spill] sm:$0xff] }
0x1ec3   :  { %v2255_v14 = vadd.f32 %v2247_v46, %v2231_v55  ;;  %v2259_v26 = vadd.f32 %v2251_v49, %v2235_v41  ;;  %v2184_v19 = vadd.f32 %v2176_v60, %v2160_v62  ;;  %v2224_v31 = vmul.f32 %v4821_v43, %v4572_v7  ;;  %v5862_v41 = vld [vmem:[#allocation81_spill] sm:$0xff]  ;;  %v5863_v62 = vld [vmem:[#allocation88_spill] sm:$0xff]  ;;  %v5894_v7 = vld [vmem:[#allocation47_spill] sm:$0xff] }
0x1ec4   :  { %v2188_v32 = vadd.f32 %v2180_v24, %v2164_v44  ;;  %v2228_v20 = vmul.f32 %v4891_v59, %v5801_v35  ;;  %v2248_v55 = vmul.f32 %v4824_v25, %v5861_v42  ;;  %v2252_v5 = vmul.f32 %v4900_v39, %v5862_v41  ;;  %v3401_v43 = vld [vmem:[%s5525_s7] ss:$0 sm:$0xff]  ;;  %v5891_v41 = vld [vmem:[#allocation50_spill] sm:$0xff]  ;;  %v5893_v35 = vld [vmem:[#allocation59_spill] sm:$0xff] }
0x1ec5   :  { %v3651_v16 = vpack.i.bf16 %v2259_v26, %v2255_v14  ;;  %v2208_v34 = vadd.f32 %v2200_v4, %v2184_v19  ;;  %v5892_v42 = vld [vmem:[#allocation40_spill] sm:$0xff] }
0x1ec6   :  { %v2212_v61 = vadd.f32 %v2204_v21, %v2188_v32  ;;  %v5864_v32 = vld [vmem:[#allocation24_spill] sm:$0xff]  ;;  %v5865_v21 = vld [vmem:[#allocation25_spill] sm:$0xff] }
0x1ec7   :  { %3652 = vperm.xlu0 %3620, %v3651_v16   ;;  %v2232_v11 = vadd.f32 %v2224_v31, %v2208_v34  ;;  %v5866_v31 = vld [vmem:[#allocation16_spill] sm:$0xff] }
0x1ec8   :  { %v2236_v57 = vadd.f32 %v2228_v20, %v2212_v61 }
0x1ec9   :  { %v2256_v46 = vadd.f32 %v2248_v55, %v2232_v11 }
0x1eca   :  { %v2260_v51 = vadd.f32 %v2252_v5, %v2236_v57 }
0x1ecc   :  { %v3656_v49 = vpack.i.bf16 %v2260_v51, %v2256_v46 }
0x1ece   :  { %3657 = vperm.xlu0 %3620, %v3656_v49   ;;  %v5867_v49 = vld [vmem:[#allocation86_spill] sm:$0xff] }
0x1ed2   :  { %2333 = vrot.lane.b32.xlu0 %v5863_v62, %s3977_s21 }
0x1ed6   :  { %1942 = vrot.lane.b32.xlu0 %v3401_v43, %s3967_s20 }
0x1f37   :  { %v3643_v59 = vpop.permute.xlu0 %3642 }
0x1f38   :  { %v3645_v25 = vunpack.i.h.bf16 %v3643_v59  ;;  %v3644_v24 = vunpack.i.l.bf16 %v3643_v59 }
0x1f3a   :  { %v2300_v4 = vrot.slane %v3645_v25, %v5864_v32  ;;  %v2296_v16 = vrot.slane %v3644_v24, %v5865_v21 }
0x1f3c   :  { %v2301_v46 = vsel %vm1801_vm12, %v2300_v4, %v2296_v16 }
0x1f3d   :  { %v3648_v44 = vpop.permute.xlu0 %3647 }
0x1f3e   :  { %v3650_v14 = vunpack.i.h.bf16 %v3648_v44  ;;  %v3649_v39 = vunpack.i.l.bf16 %v3648_v44 }
0x1f40   :  { %v2319_v34 = vrot.slane %v3650_v14, %v5864_v32  ;;  %v2315_v61 = vrot.slane %v3649_v39, %v5865_v21 }
0x1f42   :  { %v2320_v51 = vsel %vm1801_vm12, %v2319_v34, %v2315_v61  ;;  %v3844_v34 = vld [vmem:[%s5523_s5] sm:$0xff]   ;;  %v5869_v61 = vmov 0.0  }
0x1f46   :  { %v3653_v60 = vpop.permute.xlu0 %3652 }
0x1f47   :  { %v3655_v26 = vunpack.i.h.bf16 %v3653_v60  ;;  %v3654_v19 = vunpack.i.l.bf16 %v3653_v60 }
0x1f49   :  { %v2324_v20 = vrot.slane %v3655_v26, %v5866_v31  ;;  %v2305_v11 = vrot.slane %v3654_v19, %v5866_v31 }
0x1f4b   :  { %v2306_v44 = vsel %vm1808_vm13, %v2305_v11, %v2301_v46  ;;  %v2325_v60 = vsel %vm1808_vm13, %v2324_v20, %v2320_v51  ;;  %v5870_v20 = vld [vmem:[#allocation78_spill] sm:$0xff] }
0x1f4c   :  { %v5871_v11 = vld [vmem:[#allocation82_spill] sm:$0xff] }
0x1f4d   :  { %v3658_v57 = vpop.permute.xlu0 %3657 }
0x1f4e   :  { %v3660_v55 = vunpack.i.h.bf16 %v3658_v57  ;;  %v3659_v5 = vunpack.i.l.bf16 %v3658_v57 }
0x1f50   :  { %v2329_v43 = vrot.slane %v3660_v55, %v5867_v49  ;;  %v2310_v59 = vrot.slane %v3659_v5, %v5867_v49 }
0x1f51   :  { %v2334_v25 = vpop.permute.xlu0 %2333 }
0x1f52   :  { %v2311_v24 = vsel %vm1815_vm14, %v2310_v59, %v2306_v44  ;;  %v2330_v14 = vsel %vm1815_vm14, %v2329_v43, %v2325_v60  ;;  %v5010_v59 = vld [vmem:[#allocation2] ss:$0 sm:$0xff] }
0x1f53   :  { %v2331_v39 = vsel %vm1133_vm10, %v2330_v14, %v2311_v24  ;;  %5873 = vst [vmem:[#allocation42_spill] sm:$0xff] %v5010_v59  ;;  %v5875_v24 = vld [vmem:[#allocation57_spill] sm:$0xff] }
0x1f54   :  { %v2336_v26 = vsel %vm200_vm3, %v2331_v39, %v2334_v25 }
0x1f55   :  { %v2337_v19 = vpack.c.bf16 %v2336_v26, %v2336_v26  ;;  %v4992_v4 = vpop.permute.xlu0 %1942  ;;  %v5876_v26 = vld [vmem:[#allocation87_spill] sm:$0xff] }
0x1f56   :  { %5868 = vst [vmem:[#allocation28_spill] sm:$0xff] %v4992_v4  ;;  %v1945_v16 = vmul.f32 %v4992_v4, %v5863_v62  ;;  %v5872_v62 = vld [vmem:[#allocation20_spill] sm:$0xff] }
0x1f57   :  { %3576 = vmatmul.mubr.msk.bf16.vlgmr.msra.gmra.mrb[20].mxu0 %vm1869_vm15, %v2337_v19 }
0x1f58   :  { %1947 = vrot.lane.b32.xlu0 %v1945_v16, %s3967_s20  ;;  %3592 = vmatpush3.bf16.msra.mxu0 %v3844_v34 }
0x1f59   :  { %3593 = vmatprep.subr.bf16.mxu0 %v5869_v61  ;;  %3599 = vmatprep.mubr.msk.bf16.mxu0 %vm3973_vm0, %v5869_v61  ;;  %vm3374_vm0 = vcmask 7168  }
0x1f5c   :  { %3594 = vmatpush3.bf16.msra.mxu0 %v5870_v20 }
0x1f5d   :  { %3595 = vmatprep.subr.bf16.mxu0 %v5869_v61 }
0x1f60   :  { %3596 = vmatpush3.bf16.msra.mxu0 %v5871_v11 }
0x1f61   :  { %3597 = vmatprep.subr.bf16.mxu0 %v5869_v61 }
0x1f64   :  { %3598 = vmatpush3.bf16.msra.mxu0 %v5872_v62 }
0x1fca   :  { %v1948_v57 = vpop.permute.xlu0 %1947 }
0x1fcb   :  { %v1951_v55 = vsel %vm1950_vm1, %v1948_v57, 0.0 }
0x1fcc   :  { %1952 = vadd.xlane.f32.xlu0 %v1951_v55  ;;  %v5877_v55 = vld [vmem:[#allocation19_spill] sm:$0xff] }
0x202a   :  { %v2381_v5 = vpop.f32.mrb[20].mxu0 }
0x202b   :  { %v3577_v46 = vpop.f32.mrb[21].mxu0 }
0x202c   :  { %v2384_v51 = vpop.f32.mrb[22].mxu0 }
0x202d   :  { %v3578_v43 = vpop.f32.mrb[23].mxu0 }
0x2059   :  { %v1953_v44 = vpop.xlane.xlu0 %1952 }
0x205a   :  { %v5013_v60 = vadd.f32 %v5010_v59, %v1953_v44  ;;  %v5890_v59 = vld [vmem:[#allocation34_spill] sm:$0xff] }
0x205c   :  { %5874 = vst [vmem:[#allocation58_spill] sm:$0xff] %v5013_v60  ;;  %2340 = vperm.xlu1 %3619, %v5013_v60  }
0x20db   :  { %v2341_v25 = vpop.permute.xlu1 %2340 }
0x20dc   :  { %v2343_v14 = vmul.f32 %v5875_v24, %v2341_v25  ;;  %v5880_v24 = vld [vmem:[#allocation17_spill] sm:$0xff] }
0x20de   :  { %v2387_v39 = vadd.f32 %v2381_v5, %v2343_v14 }
0x20e0   :  { %v2388_v19 = vadd.f32 %v5876_v26, %v2387_v39 }
0x20e2   :  { %3792 = vtanh.f32 %v2388_v19  ;;  %v3431_v34 = vmul.f32 -1.442695, %v2388_v19  ;;  %v5881_v19 = vld [vmem:[#allocation18_spill] sm:$0xff] }
0x20e4   :  { %3794 = vpow2.f32 %v3431_v34 }
0x20ec   :  { %v3793_v16 = vpop.eup %3792 }
0x20ed   :  { %2398 = vrot.lane.b32.xlu1 %v3793_v16, %s3975_s0 }
0x20ee   :  { %v3795_v61 = vpop.eup %3794 }
0x20ef   :  { %v2392_v20 = vadd.f32 1.0, %v3795_v61  ;;  %v5882_v61 = vld [vmem:[#allocation21_spill] sm:$0xff] }
0x20f1   :  { %3796 = vrcp.f32 %v2392_v20 }
0x20fb   :  { %v3797_v11 = vpop.eup %3796 }
0x20fc   :  { %v2396_v46 = vmul.f32 %v3797_v11, %v5877_v55 }
0x215f   :  { %v2399_v62 = vpop.permute.xlu1 %2398 }
0x2160   :  { %v2401_v57 = vmul.f32 %v3797_v11, %v2399_v62 }
0x2162   :  { %2403 = vrot.lane.b32.xlu1 %v2401_v57, %s3975_s0  ;;  %v5883_v57 = vld [vmem:[#allocation22_spill] sm:$0xff] }
0x21d4   :  { %v2404_v51 = vpop.permute.xlu1 %2403 }
0x21d5   :  { %v5021_v5 = vadd.f32 %v2404_v51, %v2396_v46 }
0x21d7   :  { %5878 = vst [vmem:[#allocation60_spill] sm:$0xff] %v5021_v5  ;;  %3798 = vtanh.f32 %v5021_v5 }
0x21e1   :  { %v3799_v43 = vpop.eup %3798 }
0x21e2   :  { %2409 = vrot.lane.b32.xlu0 %v3799_v43, %s3975_s0 }
0x2254   :  { %v2410_v44 = vpop.permute.xlu0 %2409 }
0x2255   :  { %v5025_v25 = vmul.f32 %v3797_v11, %v2410_v44 }
0x2257   :  { %5879 = vst [vmem:[#allocation46_spill] sm:$0xff] %v5025_v25  ;;  %v2435_v14 = vrot.slane %v5025_v25, %v5880_v24 }
0x2259   :  { %v2436_v39 = vcombine.high %v2435_v14, %v2435_v14  ;;  %v2443_v26 = vrot.slane %v2435_v14, %v5880_v24 }
0x225b   :  { %v2454_v16 = vrot.slane %v2443_v26, %v5881_v19  ;;  %v2450_v34 = vrot.slane %v2436_v39, %v5880_v24 }
0x225d   :  { %v2461_v20 = vmul.f32 %v2454_v16, %v5882_v61  ;;  %v2458_v62 = vrot.slane %v2450_v34, %v5881_v19 }
0x225f   :  { %2465 = vrot.lane.b32.xlu1 %v2461_v20, %s3967_s20  ;;  %v2462_v55 = vmul.f32 %v2458_v62, %v5883_v57 }
0x2263   :  { %2467 = vrot.lane.b32.xlu1 %v2462_v55, %s3967_s20  ;;  %v5884_v55 = vld [vmem:[#allocation23_spill] sm:$0xff] }
0x22d1   :  { %v2466_v11 = vpop.permute.xlu1 %2465 }
0x22d2   :  { %v2471_v46 = vsel %vm200_vm3, %v2466_v11, 0.0 }
0x22d3   :  { %2472 = vadd.xlane.f32.xlu1 %v2471_v46 }
0x22d5   :  { %v2468_v51 = vpop.permute.xlu1 %2467 }
0x22d6   :  { %v2474_v43 = vsel %vm200_vm3, %v2468_v51, 0.0 }
0x22d7   :  { %2475 = vadd.xlane.f32.xlu0 %v2474_v43 }
0x2360   :  { %v2473_v44 = vpop.xlane.xlu1 %2472 }
0x2361   :  { %v2482_v39 = vrot.slane %v2473_v44, %v5865_v21 }
0x2364   :  { %v2476_v14 = vpop.xlane.xlu0 %2475 }
0x2365   :  { %v2486_v26 = vrot.slane %v2476_v14, %v5865_v21 }
0x2367   :  { %v2487_v16 = vsel %vm1133_vm10, %v2486_v26, %v2482_v39 }
0x2368   :  { %v2489_v34 = vsel %vm1136_vm11, %v2487_v16, -inf }
0x2369   :  { %2490 = vmax.xlane.f32.xlu1 %v2489_v34 }
0x23f6   :  { %v2491_v20 = vpop.xlane.xlu1 %2490 }
0x23f7   :  { %v2496_v62 = vrot.slane %v2491_v20, %v5881_v19  ;;  %v2500_v11 = vrot.slane %v2491_v20, %v5884_v55 }
0x23f9   :  { %v2503_v46 = vsub.f32 %v2473_v44, %v2496_v62  ;;  %v2504_v60 = vsub.f32 %v2476_v14, %v2500_v11 }
0x23fb   :  { %v2505_v51 = vmul.f32 1.442695, %v2503_v46  ;;  %v2507_v43 = vmul.f32 1.442695, %v2504_v60 }
0x23fd   :  { %3800 = vpow2.f32 %v2505_v51  ;;  %v5885_v51 = vld [vmem:[#allocation26_spill] sm:$0xff] }
0x23fe   :  { %3802 = vpow2.f32 %v2507_v43 }
0x2407   :  { %v3801_v57 = vpop.eup %3800 }
0x2408   :  { %v3803_v61 = vpop.eup %3802  ;;  %2512 = vperm.xlu1 %3619, %v3801_v57  }
0x2409   :  { %2515 = vperm.xlu0 %3620, %v3803_v61  }
0x2487   :  { %v2513_v24 = vpop.permute.xlu1 %2512 }
0x2488   :  { %v2516_v39 = vpop.permute.xlu0 %2515  ;;  %v2520_v26 = vrot.slane %v2513_v24, %v5865_v21 }
0x2489   :  { %v2524_v16 = vrot.slane %v2516_v39, %v5865_v21  ;;  %v5886_v39 = vld [vmem:[#allocation27_spill] sm:$0xff] }
0x248b   :  { %v2525_v34 = vsel %vm1133_vm10, %v2524_v16, %v2520_v26 }
0x248c   :  { %v2527_v20 = vsel %vm1136_vm11, %v2525_v34, 0.0 }
0x248d   :  { %2528 = vadd.xlane.f32.xlu1 %v2527_v20 }
0x251a   :  { %v2529_v44 = vpop.xlane.xlu1 %2528 }
0x251b   :  { %3804 = vrcp.f32 %v2529_v44  ;;  %v5888_v44 = vld [vmem:[#allocation30_spill] sm:$0xff] }
0x2525   :  { %v3805_v60 = vpop.eup %3804 }
0x2526   :  { %v2535_v14 = vrot.slane %v3805_v60, %v5881_v19  ;;  %v2539_v11 = vrot.slane %v3805_v60, %v5884_v55 }
0x2528   :  { %v2542_v62 = vmul.f32 %v3801_v57, %v2535_v14  ;;  %v5887_v57 = vld [vmem:[#allocation29_spill] sm:$0xff]  ;;  %v5889_v14 = vld [vmem:[#allocation32_spill] sm:$0xff]  ;;  %v2543_v31 = vmul.f32 %v3803_v61, %v2539_v11  ;;  %v5895_v11 = vld [vmem:[#allocation66_spill] sm:$0xff] }
0x252a   :  { %v5052_v46 = vrot.slane %v2542_v62, %v5881_v19  ;;  %v5055_v24 = vrot.slane %v2542_v62, %v5884_v55  ;;  %v5058_v43 = vrot.slane %v2542_v62, %v5885_v51  ;;  %v5061_v26 = vrot.slane %v2542_v62, %v5886_v39 }
0x252b   :  { %v5064_v16 = vrot.slane %v2542_v62, %v5831_v52  ;;  %v5067_v34 = vrot.slane %v2542_v62, %v4346_v29  ;;  %v5078_v21 = vrot.slane %v2542_v62, %v4351_v30  ;;  %v5081_v32 = vrot.slane %v2542_v62, %v4356_v33 }
0x252c   :  { %v2552_v20 = vmul.f32 %v5052_v46, %v5887_v57  ;;  %v2553_v60 = vmul.f32 %v5052_v46, %v5888_v44  ;;  %v2568_v5 = vmul.f32 %v5055_v24, %v5889_v14  ;;  %v2569_v49 = vmul.f32 %v5055_v24, %v5890_v59 }
0x252d   :  { %v2592_v57 = vmul.f32 %v5058_v43, %v5891_v41  ;;  %v2593_v44 = vmul.f32 %v5058_v43, %v5892_v42  ;;  %v2616_v14 = vmul.f32 %v5061_v26, %v5893_v35  ;;  %v2617_v61 = vmul.f32 %v5061_v26, %v5894_v7  ;;  %v5898_v41 = vld [vmem:[#allocation63_spill] sm:$0xff] }
0x252e   :  { %v2576_v4 = vadd.f32 %v2568_v5, %v2552_v20  ;;  %v2577_v25 = vadd.f32 %v2569_v49, %v2553_v60  ;;  %v2640_v59 = vmul.f32 %v5064_v16, %v5895_v11  ;;  %v2641_v62 = vmul.f32 %v5064_v16, %v5896_v2  ;;  %v5897_v20 = vld [vmem:[#allocation74_spill] sm:$0xff]  ;;  %v5902_v2 = vld [vmem:[#allocation31_spill] sm:$0xff] }
0x252f   :  { %v2664_v60 = vmul.f32 %v5067_v34, %v5897_v20  ;;  %v2665_v42 = vmul.f32 %v5067_v34, %v5898_v41  ;;  %v2688_v35 = vmul.f32 %v5078_v21, %v5899_v37  ;;  %v5102_v9 = vrot.slane %v2543_v31, %v5881_v19  ;;  %v5901_v41 = vld [vmem:[#allocation33_spill] sm:$0xff] }
0x2530   :  { %v2600_v5 = vadd.f32 %v2592_v57, %v2576_v4  ;;  %v2601_v49 = vadd.f32 %v2593_v44, %v2577_v25  ;;  %v5105_v7 = vrot.slane %v2543_v31, %v5884_v55  ;;  %v5108_v11 = vrot.slane %v2543_v31, %v5885_v51  ;;  %v5900_v57 = vld [vmem:[#allocation71_spill] sm:$0xff] }
0x2531   :  { %v2689_v44 = vmul.f32 %v5078_v21, %v5900_v57  ;;  %v5113_v20 = vrot.slane %v2543_v31, %v5886_v39  ;;  %v2556_v37 = vmul.f32 %v5102_v9, %v5901_v41  ;;  %v2557_v19 = vmul.f32 %v5102_v9, %v5902_v2  ;;  %v5904_v41 = vld [vmem:[#allocation52_spill] sm:$0xff] }
0x2532   :  { %v2624_v4 = vadd.f32 %v2616_v14, %v2600_v5  ;;  %v2625_v25 = vadd.f32 %v2617_v61, %v2601_v49  ;;  %v2572_v55 = vmul.f32 %v5105_v7, %v5903_v50  ;;  %v2573_v51 = vmul.f32 %v5105_v7, %v5839_v23  ;;  %v5907_v23 = vld [vmem:[#allocation68_spill] sm:$0xff] }
0x2533   :  { %v5124_v5 = vrot.slane %v2543_v31, %v5831_v52  ;;  %v5127_v49 = vrot.slane %v2543_v31, %v4346_v29  ;;  %v2596_v36 = vmul.f32 %v5108_v11, %v5904_v41  ;;  %v2597_v2 = vmul.f32 %v5108_v11, %v5840_v1 }
0x2534   :  { %v2648_v14 = vadd.f32 %v2640_v59, %v2624_v4  ;;  %v2649_v61 = vadd.f32 %v2641_v62, %v2625_v25  ;;  %v2580_v57 = vadd.f32 %v2572_v55, %v2556_v37  ;;  %v2581_v39 = vadd.f32 %v2573_v51, %v2557_v19  ;;  %v5906_v19 = vld [vmem:[#allocation49_spill] sm:$0xff] }
0x2535   :  { %v2712_v59 = vmul.f32 %v5081_v32, %v5905_v3  ;;  %v2713_v62 = vmul.f32 %v5081_v32, %v4561_v45  ;;  %v2620_v37 = vmul.f32 %v5113_v20, %v4453_v17  ;;  %v2621_v55 = vmul.f32 %v5113_v20, %v5906_v19  ;;  %v5909_v19 = vld [vmem:[#allocation65_spill] sm:$0xff] }
0x2536   :  { %v2672_v50 = vadd.f32 %v2664_v60, %v2648_v14  ;;  %v2673_v10 = vadd.f32 %v2665_v42, %v2649_v61  ;;  %v2604_v4 = vadd.f32 %v2596_v36, %v2580_v57  ;;  %v2605_v25 = vadd.f32 %v2597_v2, %v2581_v39 }
0x2537   :  { %v2644_v60 = vmul.f32 %v5124_v5, %v5907_v23  ;;  %v2645_v42 = vmul.f32 %v5124_v5, %v5842_v22  ;;  %v2668_v36 = vmul.f32 %v5127_v49, %v5793_v0  ;;  %v5148_v2 = vrot.slane %v2543_v31, %v4351_v30 }
0x2538   :  { %v2696_v51 = vadd.f32 %v2688_v35, %v2672_v50  ;;  %v2697_v41 = vadd.f32 %v2689_v44, %v2673_v10  ;;  %v2628_v14 = vadd.f32 %v2620_v37, %v2604_v4  ;;  %v2629_v61 = vadd.f32 %v2621_v55, %v2605_v25  ;;  %v5908_v10 = vld [vmem:[#allocation36_spill] sm:$0xff] }
0x2539   :  { %v2554_v35 = vmul.f32 %v5052_v46, %v4408_v12  ;;  %v2558_v50 = vmul.f32 %v5102_v9, %v5908_v10  ;;  %v2669_v4 = vmul.f32 %v5127_v49, %v5909_v19  ;;  %v5157_v25 = vrot.slane %v2543_v31, %v4356_v33  ;;  %v5910_v55 = vld [vmem:[#allocation44_spill] sm:$0xff] }
0x253a   :  { %v2720_v39 = vadd.f32 %v2712_v59, %v2696_v51  ;;  %v2721_v57 = vadd.f32 %v2713_v62, %v2697_v41  ;;  %v2652_v44 = vadd.f32 %v2644_v60, %v2628_v14  ;;  %v2653_v23 = vadd.f32 %v2645_v42, %v2629_v61  ;;  %v5911_v60 = vld [vmem:[#allocation73_spill] sm:$0xff] }
0x253b   :  { %v2570_v0 = vmul.f32 %v5055_v24, %v5910_v55  ;;  %v2574_v41 = vmul.f32 %v5105_v7, %v5845_v48  ;;  %v2692_v51 = vmul.f32 %v5148_v2, %v5796_v40  ;;  %v2693_v42 = vmul.f32 %v5148_v2, %v5911_v60  ;;  %v5913_v48 = vld [vmem:[#allocation85_spill] sm:$0xff]  ;;  %v5914_v60 = vld [vmem:[#allocation62_spill] sm:$0xff] }
0x253c   :  { %v3661_v37 = vpack.i.bf16 %v2721_v57, %v2720_v39  ;;  %v2676_v59 = vadd.f32 %v2668_v36, %v2652_v44  ;;  %v2677_v62 = vadd.f32 %v2669_v4, %v2653_v23  ;;  %v2594_v31 = vmul.f32 %v5058_v43, %v5789_v58  ;;  %v5912_v39 = vld [vmem:[#allocation43_spill] sm:$0xff] }
0x253d   :  { %v2578_v14 = vadd.f32 %v2570_v0, %v2554_v35  ;;  %v2582_v61 = vadd.f32 %v2574_v41, %v2558_v50  ;;  %v2598_v57 = vmul.f32 %v5108_v11, %v5912_v39  ;;  %v2716_v23 = vmul.f32 %v5157_v25, %v5913_v48  ;;  %v5915_v35 = vld [vmem:[#allocation51_spill] sm:$0xff] }
0x253e   :  { %3662 = vperm.xlu0 %3620, %v3661_v37   ;;  %v2700_v55 = vadd.f32 %v2692_v51, %v2676_v59  ;;  %v2701_v19 = vadd.f32 %v2693_v42, %v2677_v62  ;;  %v2717_v36 = vmul.f32 %v5157_v25, %v4593_v56  ;;  %v2618_v0 = vmul.f32 %v5061_v26, %v5914_v60 }
0x253f   :  { %v2602_v44 = vadd.f32 %v2594_v31, %v2578_v14  ;;  %v2606_v4 = vadd.f32 %v2598_v57, %v2582_v61  ;;  %v2622_v50 = vmul.f32 %v5113_v20, %v5915_v35  ;;  %v2642_v59 = vmul.f32 %v5064_v16, %v5797_v13  ;;  %v5916_v57 = vld [vmem:[#allocation48_spill] sm:$0xff] }
0x2540   :  { %v2724_v37 = vadd.f32 %v2716_v23, %v2700_v55  ;;  %v2725_v41 = vadd.f32 %v2717_v36, %v2701_v19  ;;  %v2646_v42 = vmul.f32 %v5124_v5, %v5850_v54  ;;  %v2555_v14 = vmul.f32 %v5052_v46, %v5851_v27 }
0x2541   :  { %v2626_v62 = vadd.f32 %v2618_v0, %v2602_v44  ;;  %v2630_v51 = vadd.f32 %v2622_v50, %v2606_v4  ;;  %v2559_v31 = vmul.f32 %v5102_v9, %v5852_v18  ;;  %v2571_v35 = vmul.f32 %v5055_v24, %v5916_v57 }
0x2542   :  { %v3666_v61 = vpack.i.bf16 %v2725_v41, %v2724_v37  ;;  %v2575_v19 = vmul.f32 %v5105_v7, %v5854_v15  ;;  %v2666_v36 = vmul.f32 %v5067_v34, %v5800_v6  ;;  %v2670_v44 = vmul.f32 %v5127_v49, %v5855_v38 }
0x2543   :  { %v2650_v55 = vadd.f32 %v2642_v59, %v2626_v62  ;;  %v2654_v23 = vadd.f32 %v2646_v42, %v2630_v51  ;;  %v2579_v46 = vadd.f32 %v2571_v35, %v2555_v14  ;;  %v2595_v9 = vmul.f32 %v5058_v43, %v5795_v63  ;;  %v5917_v62 = vld [vmem:[#allocation53_spill] sm:$0xff]  ;;  %v5918_v14 = vld [vmem:[#allocation56_spill] sm:$0xff] }
0x2544   :  { %3667 = vperm.xlu0 %3620, %v3666_v61   ;;  %v2583_v4 = vadd.f32 %v2575_v19, %v2559_v31  ;;  %v2599_v24 = vmul.f32 %v5108_v11, %v5856_v28  ;;  %v2690_v7 = vmul.f32 %v5078_v21, %v5804_v53  ;;  %v2694_v37 = vmul.f32 %v5148_v2, %v5857_v8  ;;  %v5919_v61 = vld [vmem:[#allocation54_spill] sm:$0xff] }
0x2545   :  { %v2674_v0 = vadd.f32 %v2666_v36, %v2650_v55  ;;  %v2678_v50 = vadd.f32 %v2670_v44, %v2654_v23  ;;  %v2603_v41 = vadd.f32 %v2595_v9, %v2579_v46  ;;  %v2619_v35 = vmul.f32 %v5061_v26, %v5798_v47  ;;  %v5920_v23 = vld [vmem:[#allocation72_spill] sm:$0xff]  ;;  %v5921_v44 = vld [vmem:[#allocation61_spill] sm:$0xff]  ;;  %v5966_v47 = vld [vmem:[#allocation35_spill] sm:$0xff] }
0x2546   :  { %v2607_v59 = vadd.f32 %v2599_v24, %v2583_v4  ;;  %v2623_v51 = vmul.f32 %v5113_v20, %v5917_v62  ;;  %v2714_v11 = vmul.f32 %v5081_v32, %v5918_v14  ;;  %v2718_v31 = vmul.f32 %v5157_v25, %v5919_v61  ;;  %v5922_v24 = vld [vmem:[#allocation79_spill] sm:$0xff]  ;;  %v5965_v62 = vld [vmem:[#allocation41_spill] sm:$0xff] }
0x2547   :  { %v2698_v43 = vadd.f32 %v2690_v7, %v2674_v0  ;;  %v2702_v42 = vadd.f32 %v2694_v37, %v2678_v50  ;;  %v2627_v19 = vadd.f32 %v2619_v35, %v2603_v41  ;;  %v2643_v36 = vmul.f32 %v5064_v16, %v5920_v23  ;;  %v5923_v50 = vld [vmem:[#allocation69_spill] sm:$0xff]  ;;  %v5961_v23 = vld [vmem:[#allocation80_spill] sm:$0xff] }
0x2548   :  { %v2631_v55 = vadd.f32 %v2623_v51, %v2607_v59  ;;  %v2647_v46 = vmul.f32 %v5124_v5, %v5921_v44  ;;  %v2667_v0 = vmul.f32 %v5067_v34, %v5922_v24  ;;  %v2671_v7 = vmul.f32 %v5127_v49, %v5923_v50  ;;  %v5924_v59 = vld [vmem:[#allocation83_spill] sm:$0xff]  ;;  %v5925_v16 = vld [vmem:[#allocation77_spill] sm:$0xff] }
0x2549   :  { %v2722_v26 = vadd.f32 %v2714_v11, %v2698_v43  ;;  %v2726_v4 = vadd.f32 %v2718_v31, %v2702_v42  ;;  %v2651_v9 = vadd.f32 %v2643_v36, %v2627_v19  ;;  %v2691_v35 = vmul.f32 %v5078_v21, %v5924_v59  ;;  %v5926_v42 = vld [vmem:[#allocation70_spill] sm:$0xff]  ;;  %v5927_v31 = vld [vmem:[#allocation81_spill] sm:$0xff]  ;;  %v5929_v21 = vld [vmem:[#allocation28_spill] sm:$0xff] }
0x254a   :  { %v2655_v20 = vadd.f32 %v2647_v46, %v2631_v55  ;;  %v2695_v51 = vmul.f32 %v5148_v2, %v5925_v16  ;;  %v2715_v11 = vmul.f32 %v5081_v32, %v5926_v42  ;;  %v2719_v34 = vmul.f32 %v5157_v25, %v5927_v31  ;;  %v5928_v36 = vld [vmem:[#allocation46_spill] sm:$0xff]  ;;  %v5954_v59 = vld [vmem:[#allocation40_spill] sm:$0xff]  ;;  %v5955_v50 = vld [vmem:[#allocation59_spill] sm:$0xff] }
0x254b   :  { %v3671_v37 = vpack.i.bf16 %v2726_v4, %v2722_v26  ;;  %v2675_v61 = vadd.f32 %v2667_v0, %v2651_v9  ;;  %v2413_v46 = vmul.f32 %v5928_v36, %v5929_v21  ;;  %v5953_v16 = vld [vmem:[#allocation50_spill] sm:$0xff]  ;;  %v5956_v24 = vld [vmem:[#allocation47_spill] sm:$0xff] }
0x254c   :  { %v2679_v41 = vadd.f32 %v2671_v7, %v2655_v20  ;;  %v5930_v7 = vld [vmem:[#allocation24_spill] sm:$0xff]  ;;  %v5958_v44 = vld [vmem:[#allocation55_spill] sm:$0xff] }
0x254d   :  { %3672 = vperm.xlu0 %3620, %v3671_v37   ;;  %v2699_v5 = vadd.f32 %v2691_v35, %v2675_v61 }
0x254e   :  { %v2703_v43 = vadd.f32 %v2695_v51, %v2679_v41  ;;  %v5931_v41 = vld [vmem:[#allocation25_spill] sm:$0xff] }
0x254f   :  { %v2723_v19 = vadd.f32 %v2715_v11, %v2699_v5 }
0x2550   :  { %v2727_v49 = vadd.f32 %v2719_v34, %v2703_v43  ;;  %v5932_v43 = vld [vmem:[#allocation16_spill] sm:$0xff] }
0x2552   :  { %v3676_v55 = vpack.i.bf16 %v2727_v49, %v2723_v19 }
0x2554   :  { %3677 = vperm.xlu0 %3620, %v3676_v55  }
0x2558   :  { %2800 = vrot.lane.b32.xlu0 %v5928_v36, %s3977_s21 }
0x255c   :  { %2415 = vrot.lane.b32.xlu0 %v2413_v46, %s3967_s20 }
0x25bd   :  { %v3663_v2 = vpop.permute.xlu0 %3662 }
0x25be   :  { %v3665_v4 = vunpack.i.h.bf16 %v3663_v2  ;;  %v3664_v32 = vunpack.i.l.bf16 %v3663_v2  ;;  %v5933_v2 = vld [vmem:[#allocation86_spill] sm:$0xff] }
0x25c0   :  { %v2767_v37 = vrot.slane %v3665_v4, %v5930_v7  ;;  %v2763_v35 = vrot.slane %v3664_v32, %v5931_v41 }
0x25c2   :  { %v2768_v36 = vsel %vm1801_vm12, %v2767_v37, %v2763_v35 }
0x25c3   :  { %v3668_v61 = vpop.permute.xlu0 %3667 }
0x25c4   :  { %v3670_v9 = vunpack.i.h.bf16 %v3668_v61  ;;  %v3669_v20 = vunpack.i.l.bf16 %v3668_v61 }
0x25c6   :  { %v2786_v51 = vrot.slane %v3670_v9, %v5930_v7  ;;  %v2782_v5 = vrot.slane %v3669_v20, %v5931_v41 }
0x25c8   :  { %v2787_v46 = vsel %vm1801_vm12, %v2786_v51, %v2782_v5 }
0x25cc   :  { %v3673_v26 = vpop.permute.xlu0 %3672 }
0x25cd   :  { %v3675_v25 = vunpack.i.h.bf16 %v3673_v26  ;;  %v3674_v0 = vunpack.i.l.bf16 %v3673_v26 }
0x25cf   :  { %v2791_v11 = vrot.slane %v3675_v25, %v5932_v43  ;;  %v2772_v34 = vrot.slane %v3674_v0, %v5932_v43  ;;  %v5951_v43 = vld [vmem:[#allocation34_spill] sm:$0xff] }
0x25d1   :  { %v2773_v4 = vsel %vm1808_vm13, %v2772_v34, %v2768_v36  ;;  %v2792_v32 = vsel %vm1808_vm13, %v2791_v11, %v2787_v46  ;;  %v5934_v34 = vld [vmem:[#allocation42_spill] sm:$0xff] }
0x25d3   :  { %v3678_v19 = vpop.permute.xlu0 %3677 }
0x25d4   :  { %v3680_v49 = vunpack.i.h.bf16 %v3678_v19  ;;  %v3679_v55 = vunpack.i.l.bf16 %v3678_v19 }
0x25d6   :  { %v2796_v61 = vrot.slane %v3680_v49, %v5933_v2  ;;  %v2777_v26 = vrot.slane %v3679_v55, %v5933_v2 }
0x25d7   :  { %v2801_v9 = vpop.permute.xlu0 %2800 }
0x25d8   :  { %v2778_v20 = vsel %vm1815_vm14, %v2777_v26, %v2773_v4  ;;  %v2797_v25 = vsel %vm1815_vm14, %v2796_v61, %v2792_v32  ;;  %v5254_v26 = vld [vmem:[#allocation9] ss:$0 sm:$0xff] }
0x25d9   :  { %v2798_v0 = vsel %vm1133_vm10, %v2797_v25, %v2778_v20  ;;  %5936 = vst [vmem:[#allocation39_spill] sm:$0xff] %v5254_v26 }
0x25da   :  { %v2803_v19 = vsel %vm200_vm3, %v2798_v0, %v2801_v9  ;;  %v5260_v9 = vld [vmem:[%s5524_s6] ss:$0 sm:$0xff]  ;;  %s3978_s6 = smov 1  }
0x25db   :  { %v2804_v37 = vpack.c.bf16 %v2803_v19, %v2803_v19  ;;  %v2416_v35 = vpop.permute.xlu0 %2415  ;;  %5937 = vst [vmem:[#allocation67_spill] sm:$0xff] %v5260_v9 }
0x25dc   :  { %v2418_v51 = vsel %vm1950_vm1, %v2416_v35, 0.0 }
0x25dd   :  { %3588 = vmatmul.mubr.msk.bf16.vlgmr.msra.gmra.mrb[20].mxu1 %vm1869_vm15, %v2804_v37  ;;  %2419 = vadd.xlane.f32.xlu0 %v2418_v51 }
0x266a   :  { %v2420_v5 = vpop.xlane.xlu0 %2419 }
0x266b   :  { %v5251_v49 = vadd.f32 %v5934_v34, %v2420_v5  ;;  %v5938_v34 = vld [vmem:[#allocation60_spill] sm:$0xff] }
0x266d   :  { %5935 = vst [vmem:[#allocation38_spill] sm:$0xff] %v5251_v49  ;;  %2807 = vperm.xlu1 %3619, %v5251_v49  }
0x26b0   :  { %v2848_v11 = vpop.f32.mrb[20].mxu1 }
0x26b1   :  { %v3589_v55 = vpop.f32.mrb[21].mxu1 }
0x26b2   :  { %v2851_v36 = vpop.f32.mrb[22].mxu1 }
0x26b3   :  { %v3590_v46 = vpop.f32.mrb[23].mxu1 }
0x26ec   :  { %v2808_v61 = vpop.permute.xlu1 %2807 }
0x26ed   :  { %v2810_v4 = vmul.f32 %v5254_v26, %v2808_v61 }
0x26ef   :  { %v2854_v32 = vadd.f32 %v2848_v11, %v2810_v4 }
0x26f1   :  { %v2855_v20 = vadd.f32 %v5260_v9, %v2854_v32  ;;  %v5941_v32 = vld [vmem:[#allocation17_spill] sm:$0xff] }
0x26f3   :  { %3806 = vtanh.f32 %v2855_v20  ;;  %v3434_v0 = vmul.f32 -1.442695, %v2855_v20 }
0x26f5   :  { %3808 = vpow2.f32 %v3434_v0 }
0x26fd   :  { %v3807_v25 = vpop.eup %3806 }
0x26fe   :  { %2865 = vrot.lane.b32.xlu1 %v3807_v25, %s3975_s0 }
0x26ff   :  { %v3809_v19 = vpop.eup %3808 }
0x2700   :  { %v2859_v37 = vadd.f32 1.0, %v3809_v19  ;;  %v5942_v19 = vld [vmem:[#allocation18_spill] sm:$0xff] }
0x2702   :  { %3810 = vrcp.f32 %v2859_v37 }
0x270c   :  { %v3811_v35 = vpop.eup %3810 }
0x270d   :  { %v2863_v11 = vmul.f32 %v3811_v35, %v5938_v34 }
0x2770   :  { %v2866_v51 = vpop.permute.xlu1 %2865 }
0x2771   :  { %v2868_v5 = vmul.f32 %v3811_v35, %v2866_v51 }
0x2773   :  { %2870 = vrot.lane.b32.xlu1 %v2868_v5, %s3975_s0  ;;  %v5943_v5 = vld [vmem:[#allocation21_spill] sm:$0xff] }
0x27e5   :  { %v2871_v55 = vpop.permute.xlu1 %2870 }
0x27e6   :  { %v5266_v36 = vadd.f32 %v2871_v55, %v2863_v11  ;;  %v5944_v55 = vld [vmem:[#allocation22_spill] sm:$0xff] }
0x27e8   :  { %5939 = vst [vmem:[#allocation45_spill] sm:$0xff] %v5266_v36  ;;  %3812 = vtanh.f32 %v5266_v36 }
0x27f2   :  { %v3813_v46 = vpop.eup %3812 }
0x27f3   :  { %2876 = vrot.lane.b32.xlu1 %v3813_v46, %s3975_s0 }
0x2865   :  { %v2877_v61 = vpop.permute.xlu1 %2876 }
0x2866   :  { %v5270_v4 = vmul.f32 %v3811_v35, %v2877_v61 }
0x2868   :  { %5940 = vst [vmem:[#allocation88_spill] sm:$0xff] %v5270_v4  ;;  %v2902_v20 = vrot.slane %v5270_v4, %v5941_v32 }
0x286a   :  { %v2903_v25 = vcombine.high %v2902_v20, %v2902_v20  ;;  %v2910_v0 = vrot.slane %v2902_v20, %v5941_v32 }
0x286c   :  { %v2921_v37 = vrot.slane %v2910_v0, %v5942_v19  ;;  %v2917_v51 = vrot.slane %v2903_v25, %v5941_v32 }
0x286e   :  { %v2928_v34 = vmul.f32 %v2921_v37, %v5943_v5  ;;  %v2925_v11 = vrot.slane %v2917_v51, %v5942_v19 }
0x2870   :  { %2932 = vrot.lane.b32.xlu0 %v2928_v34, %s3967_s20  ;;  %v2929_v46 = vmul.f32 %v2925_v11, %v5944_v55  ;;  %v5945_v55 = vld [vmem:[#allocation23_spill] sm:$0xff] }
0x2872   :  { %2934 = vrot.lane.b32.xlu1 %v2929_v46, %s3967_s20 }
0x28e2   :  { %v2933_v35 = vpop.permute.xlu0 %2932 }
0x28e3   :  { %v2938_v61 = vsel %vm200_vm3, %v2933_v35, 0.0 }
0x28e4   :  { %2939 = vadd.xlane.f32.xlu1 %v2938_v61  ;;  %v2935_v36 = vpop.permute.xlu1 %2934 }
0x28e5   :  { %v2941_v20 = vsel %vm200_vm3, %v2935_v36, 0.0 }
0x28e6   :  { %2942 = vadd.xlane.f32.xlu0 %v2941_v20 }
0x2971   :  { %v2940_v0 = vpop.xlane.xlu1 %2939 }
0x2972   :  { %v2949_v25 = vrot.slane %v2940_v0, %v5931_v41 }
0x2973   :  { %v2943_v32 = vpop.xlane.xlu0 %2942 }
0x2974   :  { %v2953_v37 = vrot.slane %v2943_v32, %v5931_v41 }
0x2976   :  { %v2954_v51 = vsel %vm1133_vm10, %v2953_v37, %v2949_v25 }
0x2977   :  { %v2956_v5 = vsel %vm1136_vm11, %v2954_v51, -inf }
0x2978   :  { %2957 = vmax.xlane.f32.xlu1 %v2956_v5 }
0x2a05   :  { %v2958_v34 = vpop.xlane.xlu1 %2957 }
0x2a06   :  { %v2963_v11 = vrot.slane %v2958_v34, %v5942_v19  ;;  %v2967_v46 = vrot.slane %v2958_v34, %v5945_v55 }
0x2a08   :  { %v2970_v35 = vsub.f32 %v2940_v0, %v2963_v11  ;;  %v2971_v61 = vsub.f32 %v2943_v32, %v2967_v46 }
0x2a0a   :  { %v2972_v36 = vmul.f32 1.442695, %v2970_v35  ;;  %v2974_v20 = vmul.f32 1.442695, %v2971_v61 }
0x2a0c   :  { %3814 = vpow2.f32 %v2972_v36  ;;  %v5946_v36 = vld [vmem:[#allocation26_spill] sm:$0xff] }
0x2a0d   :  { %3816 = vpow2.f32 %v2974_v20 }
0x2a16   :  { %v3815_v9 = vpop.eup %3814 }
0x2a17   :  { %v3817_v26 = vpop.eup %3816  ;;  %2979 = vperm.xlu1 %3619, %v3815_v9  }
0x2a18   :  { %2982 = vperm.xlu0 %3620, %v3817_v26  }
0x2a96   :  { %v2980_v49 = vpop.permute.xlu1 %2979 }
0x2a97   :  { %v2983_v25 = vpop.permute.xlu0 %2982  ;;  %v2987_v37 = vrot.slane %v2980_v49, %v5931_v41 }
0x2a98   :  { %v2991_v51 = vrot.slane %v2983_v25, %v5931_v41  ;;  %v5947_v25 = vld [vmem:[#allocation27_spill] sm:$0xff] }
0x2a9a   :  { %v2992_v5 = vsel %vm1133_vm10, %v2991_v51, %v2987_v37 }
0x2a9b   :  { %v2994_v34 = vsel %vm1136_vm11, %v2992_v5, 0.0 }
0x2a9c   :  { %2995 = vadd.xlane.f32.xlu1 %v2994_v34 }
0x2b29   :  { %v2996_v0 = vpop.xlane.xlu1 %2995 }
0x2b2a   :  { %3818 = vrcp.f32 %v2996_v0  ;;  %v5949_v0 = vld [vmem:[#allocation30_spill] sm:$0xff] }
0x2b34   :  { %v3819_v32 = vpop.eup %3818 }
0x2b35   :  { %v3002_v11 = vrot.slane %v3819_v32, %v5942_v19  ;;  %v3006_v35 = vrot.slane %v3819_v32, %v5945_v55 }
0x2b37   :  { %v3009_v46 = vmul.f32 %v3815_v9, %v3002_v11  ;;  %v5948_v9 = vld [vmem:[#allocation29_spill] sm:$0xff]  ;;  %v5950_v11 = vld [vmem:[#allocation32_spill] sm:$0xff]  ;;  %v3010_v7 = vmul.f32 %v3817_v26, %v3006_v35  ;;  %v5957_v26 = vld [vmem:[#allocation66_spill] sm:$0xff] }
0x2b39   :  { %v5297_v61 = vrot.slane %v3009_v46, %v5942_v19  ;;  %v5300_v49 = vrot.slane %v3009_v46, %v5945_v55  ;;  %v5303_v20 = vrot.slane %v3009_v46, %v5946_v36  ;;  %v5306_v37 = vrot.slane %v3009_v46, %v5947_v25 }
0x2b3a   :  { %v5309_v51 = vrot.slane %v3009_v46, %v5831_v52  ;;  %v5312_v5 = vrot.slane %v3009_v46, %v4346_v29  ;;  %v5323_v21 = vrot.slane %v3009_v46, %v4351_v30  ;;  %v5326_v4 = vrot.slane %v3009_v46, %v4356_v33 }
0x2b3b   :  { %v3019_v34 = vmul.f32 %v5297_v61, %v5948_v9  ;;  %v3020_v32 = vmul.f32 %v5297_v61, %v5949_v0  ;;  %v3035_v2 = vmul.f32 %v5300_v49, %v5950_v11  ;;  %v3036_v41 = vmul.f32 %v5300_v49, %v5951_v43 }
0x2b3c   :  { %5952 = vst [vmem:[#allocation78_spill] sm:$0xff] %v5323_v21  ;;  %v3059_v9 = vmul.f32 %v5303_v20, %v5953_v16  ;;  %v3060_v0 = vmul.f32 %v5303_v20, %v5954_v59  ;;  %v3083_v11 = vmul.f32 %v5306_v37, %v5955_v50  ;;  %v3084_v43 = vmul.f32 %v5306_v37, %v5956_v24 }
0x2b3d   :  { %v3043_v31 = vadd.f32 %v3035_v2, %v3019_v34  ;;  %v3044_v42 = vadd.f32 %v3036_v41, %v3020_v32  ;;  %v3107_v35 = vmul.f32 %v5309_v51, %v5957_v26  ;;  %v3108_v46 = vmul.f32 %v5309_v51, %v5958_v44  ;;  %v5959_v34 = vld [vmem:[#allocation74_spill] sm:$0xff]  ;;  %v5960_v32 = vld [vmem:[#allocation63_spill] sm:$0xff] }
0x2b3e   :  { %v3131_v16 = vmul.f32 %v5312_v5, %v5959_v34  ;;  %v3132_v59 = vmul.f32 %v5312_v5, %v5960_v32  ;;  %v3155_v50 = vmul.f32 %v5323_v21, %v5961_v23  ;;  %v5347_v14 = vrot.slane %v3010_v7, %v5942_v19  ;;  %v5963_v34 = vld [vmem:[#allocation33_spill] sm:$0xff]  ;;  %v5964_v32 = vld [vmem:[#allocation31_spill] sm:$0xff] }
0x2b3f   :  { %v3067_v2 = vadd.f32 %v3059_v9, %v3043_v31  ;;  %v3068_v41 = vadd.f32 %v3060_v0, %v3044_v42  ;;  %v5350_v24 = vrot.slane %v3010_v7, %v5945_v55  ;;  %v5353_v26 = vrot.slane %v3010_v7, %v5946_v36  ;;  %v5962_v31 = vld [vmem:[#allocation71_spill] sm:$0xff] }
0x2b40   :  { %v3156_v9 = vmul.f32 %v5323_v21, %v5962_v31  ;;  %v5358_v0 = vrot.slane %v3010_v7, %v5947_v25  ;;  %v3023_v23 = vmul.f32 %v5347_v14, %v5963_v34  ;;  %v3024_v19 = vmul.f32 %v5347_v14, %v5964_v32  ;;  %v5967_v34 = vld [vmem:[#allocation52_spill] sm:$0xff] }
0x2b41   :  { %v3091_v44 = vadd.f32 %v3083_v11, %v3067_v2  ;;  %v3092_v42 = vadd.f32 %v3084_v43, %v3068_v41  ;;  %v3039_v55 = vmul.f32 %v5350_v24, %v5965_v62  ;;  %v3040_v36 = vmul.f32 %v5350_v24, %v5966_v47 }
0x2b42   :  { %v5369_v2 = vrot.slane %v3010_v7, %v5831_v52  ;;  %v5372_v25 = vrot.slane %v3010_v7, %v4346_v29  ;;  %v3063_v8 = vmul.f32 %v5353_v26, %v5967_v34  ;;  %v3064_v32 = vmul.f32 %v5353_v26, %v5840_v1 }
0x2b43   :  { %v3115_v11 = vadd.f32 %v3107_v35, %v3091_v44  ;;  %v3116_v43 = vadd.f32 %v3108_v46, %v3092_v42  ;;  %v3047_v41 = vadd.f32 %v3039_v55, %v3023_v23  ;;  %v3048_v31 = vadd.f32 %v3040_v36, %v3024_v19  ;;  %v5968_v44 = vld [vmem:[#allocation49_spill] sm:$0xff]  ;;  %v5969_v55 = vld [vmem:[#allocation68_spill] sm:$0xff] }
0x2b44   :  { %v3179_v47 = vmul.f32 %v5326_v4, %v5905_v3  ;;  %v3180_v52 = vmul.f32 %v5326_v4, %v4561_v45  ;;  %v3087_v29 = vmul.f32 %v5358_v0, %v4453_v17  ;;  %v3088_v42 = vmul.f32 %v5358_v0, %v5968_v44  ;;  %v5970_v36 = vld [vmem:[#allocation76_spill] sm:$0xff] }
0x2b45   :  { %v3139_v62 = vadd.f32 %v3131_v16, %v3115_v11  ;;  %v3140_v21 = vadd.f32 %v3132_v59, %v3116_v43  ;;  %v3071_v35 = vadd.f32 %v3063_v8, %v3047_v41  ;;  %v3072_v46 = vadd.f32 %v3064_v32, %v3048_v31  ;;  %v5971_v41 = vld [vmem:[#allocation65_spill] sm:$0xff]  ;;  %v5972_v32 = vld [vmem:[#allocation44_spill] sm:$0xff] }
0x2b46   :  { %v3111_v1 = vmul.f32 %v5369_v2, %v5969_v55  ;;  %v3112_v16 = vmul.f32 %v5369_v2, %v5842_v22  ;;  %v3135_v45 = vmul.f32 %v5372_v25, %v5970_v36  ;;  %v5393_v8 = vrot.slane %v3010_v7, %v4351_v30 }
0x2b47   :  { %v3163_v23 = vadd.f32 %v3155_v50, %v3139_v62  ;;  %v3164_v19 = vadd.f32 %v3156_v9, %v3140_v21  ;;  %v3095_v3 = vadd.f32 %v3087_v29, %v3071_v35  ;;  %v3096_v59 = vadd.f32 %v3088_v42, %v3072_v46  ;;  %v5973_v62 = vld [vmem:[#allocation37_spill] sm:$0xff] }
0x2b48   :  { %v3021_v50 = vmul.f32 %v5297_v61, %v4408_v12  ;;  %v3025_v21 = vmul.f32 %v5347_v14, %v5908_v10  ;;  %v3136_v22 = vmul.f32 %v5372_v25, %v5971_v41  ;;  %v5402_v31 = vrot.slane %v3010_v7, %v4356_v33  ;;  %v5974_v35 = vld [vmem:[#allocation73_spill] sm:$0xff]  ;;  %v5977_v41 = vld [vmem:[#allocation75_spill] sm:$0xff] }
0x2b49   :  { %v3187_v17 = vadd.f32 %v3179_v47, %v3163_v23  ;;  %v3188_v11 = vadd.f32 %v3180_v52, %v3164_v19  ;;  %v3119_v9 = vadd.f32 %v3111_v1, %v3095_v3  ;;  %v3120_v43 = vadd.f32 %v3112_v16, %v3096_v59  ;;  %v5975_v3 = vld [vmem:[#allocation51_spill] sm:$0xff] }
0x2b4a   :  { %v3037_v30 = vmul.f32 %v5300_v49, %v5972_v32  ;;  %v3041_v47 = vmul.f32 %v5350_v24, %v5973_v62  ;;  %v3159_v10 = vmul.f32 %v5393_v8, %v5796_v40  ;;  %v3160_v46 = vmul.f32 %v5393_v8, %v5974_v35 }
0x2b4b   :  { %v3681_v34 = vpack.i.bf16 %v3188_v11, %v3187_v17  ;;  %v3143_v52 = vadd.f32 %v3135_v45, %v3119_v9  ;;  %v3144_v12 = vadd.f32 %v3136_v22, %v3120_v43  ;;  %v3061_v33 = vmul.f32 %v5303_v20, %v5789_v58 }
0x2b4c   :  { %v3045_v29 = vadd.f32 %v3037_v30, %v3021_v50  ;;  %v3049_v44 = vadd.f32 %v3041_v47, %v3025_v21  ;;  %v3065_v7 = vmul.f32 %v5353_v26, %v5912_v39  ;;  %v3183_v19 = vmul.f32 %v5402_v31, %v5913_v48  ;;  %v5979_v30 = vld [vmem:[#allocation53_spill] sm:$0xff]  ;;  %v5980_v47 = vld [vmem:[#allocation56_spill] sm:$0xff] }
0x2b4d   :  { %3682 = vperm.xlu0 %3620, %v3681_v34   ;;  %v3167_v42 = vadd.f32 %v3159_v10, %v3143_v52  ;;  %v3168_v23 = vadd.f32 %v3160_v46, %v3144_v12  ;;  %v3184_v40 = vmul.f32 %v5402_v31, %v4593_v56  ;;  %v3085_v16 = vmul.f32 %v5306_v37, %v5914_v60  ;;  %v5982_v10 = vld [vmem:[#allocation72_spill] sm:$0xff]  ;;  %v5983_v46 = vld [vmem:[#allocation61_spill] sm:$0xff] }
0x2b4e   :  { %v3069_v55 = vadd.f32 %v3061_v33, %v3045_v29  ;;  %v3073_v1 = vadd.f32 %v3065_v7, %v3049_v44  ;;  %v3089_v59 = vmul.f32 %v5358_v0, %v5975_v3  ;;  %v3109_v39 = vmul.f32 %v5309_v51, %v5797_v13  ;;  %v5984_v7 = vld [vmem:[#allocation79_spill] sm:$0xff] }
0x2b4f   :  { %v3191_v58 = vadd.f32 %v3183_v19, %v3167_v42  ;;  %v3192_v36 = vadd.f32 %v3184_v40, %v3168_v23  ;;  %v3113_v48 = vmul.f32 %v5369_v2, %v5850_v54  ;;  %v3022_v56 = vmul.f32 %v5297_v61, %v5851_v27  ;;  %v5985_v23 = vld [vmem:[#allocation69_spill] sm:$0xff] }
0x2b50   :  { %v3093_v45 = vadd.f32 %v3085_v16, %v3069_v55  ;;  %v3097_v17 = vadd.f32 %v3089_v59, %v3073_v1  ;;  %v3026_v60 = vmul.f32 %v5347_v14, %v5852_v18  ;;  %v3038_v50 = vmul.f32 %v5300_v49, %v5916_v57  ;;  %v5986_v16 = vld [vmem:[#allocation83_spill] sm:$0xff] }
0x2b51   :  { %v3686_v11 = vpack.i.bf16 %v3192_v36, %v3191_v58  ;;  %v3042_v21 = vmul.f32 %v5350_v24, %v5854_v15  ;;  %v3133_v43 = vmul.f32 %v5312_v5, %v5800_v6  ;;  %v3137_v54 = vmul.f32 %v5372_v25, %v5855_v38  ;;  %v5976_v15 = vld [vmem:[#allocation78_spill] sm:$0xff]  ;;  %v5978_v38 = vld [vmem:[#allocation64_spill] sm:$0xff] }
0x2b52   :  { %v3117_v9 = vadd.f32 %v3109_v39, %v3093_v45  ;;  %v3121_v13 = vadd.f32 %v3113_v48, %v3097_v17  ;;  %v3046_v27 = vadd.f32 %v3038_v50, %v3022_v56  ;;  %v3062_v18 = vmul.f32 %v5303_v20, %v5795_v63  ;;  %v5988_v36 = vld [vmem:[#allocation70_spill] sm:$0xff]  ;;  %v5989_v45 = vld [vmem:[#allocation81_spill] sm:$0xff]  ;;  %v5990_v56 = vld [vmem:[#allocation88_spill] sm:$0xff] }
0x2b53   :  { %3687 = vperm.xlu0 %3620, %v3686_v11   ;;  %v3050_v61 = vadd.f32 %v3042_v21, %v3026_v60  ;;  %v3066_v57 = vmul.f32 %v5353_v26, %v5856_v28  ;;  %v3157_v24 = vmul.f32 %v5976_v15, %v5804_v53  ;;  %v3161_v6 = vmul.f32 %v5393_v8, %v5977_v41  ;;  %v5981_v26 = vld [vmem:[#allocation54_spill] sm:$0xff]  ;;  %v5991_v11 = vld [vmem:[#allocation28_spill] sm:$0xff] }
0x2b54   :  { %v3141_v14 = vadd.f32 %v3133_v43, %v3117_v9  ;;  %v3145_v49 = vadd.f32 %v3137_v54, %v3121_v13  ;;  %v3070_v22 = vadd.f32 %v3062_v18, %v3046_v27  ;;  %v3086_v32 = vmul.f32 %v5306_v37, %v5978_v38  ;;  %v5992_v27 = vld [vmem:[#allocation24_spill] sm:$0xff]  ;;  %v5993_v18 = vld [vmem:[#allocation25_spill] sm:$0xff] }
0x2b55   :  { %v3074_v34 = vadd.f32 %v3066_v57, %v3050_v61  ;;  %v3090_v62 = vmul.f32 %v5358_v0, %v5979_v30  ;;  %v3181_v28 = vmul.f32 %v5326_v4, %v5980_v47  ;;  %v3185_v52 = vmul.f32 %v5402_v31, %v5981_v26  ;;  %v5995_v30 = vld [vmem:[#allocation86_spill] sm:$0xff] }
0x2b56   :  { %v3165_v63 = vadd.f32 %v3157_v24, %v3141_v14  ;;  %v3169_v20 = vadd.f32 %v3161_v6, %v3145_v49  ;;  %v3094_v53 = vadd.f32 %v3086_v32, %v3070_v22  ;;  %v3110_v35 = vmul.f32 %v5309_v51, %v5982_v10  ;;  %v5987_v51 = vld [vmem:[#allocation77_spill] sm:$0xff] }
0x2b57   :  { %v3098_v12 = vadd.f32 %v3090_v62, %v3074_v34  ;;  %v3114_v29 = vmul.f32 %v5369_v2, %v5983_v46  ;;  %v3134_v42 = vmul.f32 %v5312_v5, %v5984_v7  ;;  %v3138_v19 = vmul.f32 %v5372_v25, %v5985_v23  ;;  %v5996_v23 = vld [vmem:[#allocation38_spill] sm:$0xff] }
0x2b58   :  { %v3189_v37 = vadd.f32 %v3181_v28, %v3165_v63  ;;  %v3193_v44 = vadd.f32 %v3185_v52, %v3169_v20  ;;  %v3118_v33 = vadd.f32 %v3110_v35, %v3094_v53  ;;  %v3158_v3 = vmul.f32 %v5976_v15, %v5986_v16  ;;  %v5994_v15 = vld [vmem:[#allocation16_spill] sm:$0xff] }
0x2b59   :  { %v3122_v0 = vadd.f32 %v3114_v29, %v3098_v12  ;;  %v3162_v59 = vmul.f32 %v5393_v8, %v5987_v51  ;;  %v3182_v39 = vmul.f32 %v5326_v4, %v5988_v36  ;;  %v3186_v5 = vmul.f32 %v5402_v31, %v5989_v45 }
0x2b5a   :  { %v3691_v40 = vpack.i.bf16 %v3193_v44, %v3189_v37  ;;  %v3142_v55 = vadd.f32 %v3134_v42, %v3118_v33  ;;  %v2880_v60 = vmul.f32 %v5990_v56, %v5991_v11  ;;  %v3847_v37 = vld [vmem:[#allocation2] ss:$0 sm:$0xff] }
0x2b5b   :  { %v3146_v1 = vadd.f32 %v3138_v19, %v3122_v0  ;;  %v3432_v19 = vmul.f32 -1.442695, %v5996_v23 }
0x2b5c   :  { %3692 = vperm.xlu0 %3620, %v3691_v40   ;;  %v3166_v2 = vadd.f32 %v3158_v3, %v3142_v55 }
0x2b5d   :  { %v3170_v58 = vadd.f32 %v3162_v59, %v3146_v1  ;;  %3820 = vpow2.f32 %v3432_v19  ;;  %v5997_v1 = vld [vmem:[#allocation39_spill] sm:$0xff] }
0x2b5e   :  { %v3190_v17 = vadd.f32 %v3182_v39, %v3166_v2  ;;  %v5998_v59 = vld [vmem:[#allocation67_spill] sm:$0xff] }
0x2b5f   :  { %v3194_v25 = vadd.f32 %v3186_v5, %v3170_v58 }
0x2b61   :  { %v3696_v48 = vpack.i.bf16 %v3194_v25, %v3190_v17 }
0x2b63   :  { %3697 = vperm.xlu0 %3620, %v3696_v48  }
0x2b67   :  { %3267 = vrot.lane.b32.xlu0 %v5990_v56, %s3977_s21  ;;  %v3821_v51 = vpop.eup %3820 }
0x2b68   :  { %v2425_v58 = vadd.f32 1.0, %v3821_v51 }
0x2b6b   :  { %2882 = vrot.lane.b32.xlu0 %v2880_v60, %s3967_s20 }
0x2bcc   :  { %v3683_v8 = vpop.permute.xlu0 %3682 }
0x2bcd   :  { %v3685_v9 = vunpack.i.h.bf16 %v3683_v8  ;;  %v3684_v4 = vunpack.i.l.bf16 %v3683_v8 }
0x2bcf   :  { %v3234_v61 = vrot.slane %v3685_v9, %v5992_v27  ;;  %v3230_v57 = vrot.slane %v3684_v4, %v5993_v18 }
0x2bd1   :  { %v3235_v38 = vsel %vm1801_vm12, %v3234_v61, %v3230_v57 }
0x2bd2   :  { %v3688_v50 = vpop.permute.xlu0 %3687 }
0x2bd3   :  { %v3690_v13 = vunpack.i.h.bf16 %v3688_v50  ;;  %v3689_v43 = vunpack.i.l.bf16 %v3688_v50 }
0x2bd5   :  { %v3253_v14 = vrot.slane %v3690_v13, %v5992_v27  ;;  %v3249_v49 = vrot.slane %v3689_v43, %v5993_v18 }
0x2bd7   :  { %v3254_v32 = vsel %vm1801_vm12, %v3253_v14, %v3249_v49 }
0x2bdb   :  { %v3693_v21 = vpop.permute.xlu0 %3692 }
0x2bdc   :  { %v3695_v31 = vunpack.i.h.bf16 %v3693_v21  ;;  %v3694_v54 = vunpack.i.l.bf16 %v3693_v21  ;;  %v5999_v21 = vld [vmem:[#allocation45_spill] sm:$0xff] }
0x2bde   :  { %v3258_v24 = vrot.slane %v3695_v31, %v5994_v15  ;;  %v3239_v41 = vrot.slane %v3694_v54, %v5994_v15 }
0x2be0   :  { %v3240_v20 = vsel %vm1808_vm13, %v3239_v41, %v3235_v38  ;;  %v3259_v47 = vsel %vm1808_vm13, %v3258_v24, %v3254_v32 }
0x2be2   :  { %v3698_v6 = vpop.permute.xlu0 %3697 }
0x2be3   :  { %v3700_v22 = vunpack.i.h.bf16 %v3698_v6  ;;  %v3699_v34 = vunpack.i.l.bf16 %v3698_v6  ;;  %v6000_v6 = vld [vmem:[#allocation58_spill] sm:$0xff] }
0x2be5   :  { %v3263_v62 = vrot.slane %v3700_v22, %v5995_v30  ;;  %v3244_v63 = vrot.slane %v3699_v34, %v5995_v30  ;;  %v3429_v22 = vmul.f32 -1.442695, %v6000_v6 }
0x2be6   :  { %v3268_v28 = vpop.permute.xlu0 %3267 }
0x2be7   :  { %v3245_v26 = vsel %vm1815_vm14, %v3244_v63, %v3240_v20  ;;  %v3264_v52 = vsel %vm1815_vm14, %v3263_v62, %v3259_v47 }
0x2be8   :  { %v3265_v53 = vsel %vm1133_vm10, %v3264_v52, %v3245_v26 }
0x2be9   :  { %v3270_v12 = vsel %vm200_vm3, %v3265_v53, %v3268_v28  ;;  %vm3378_vm3 = vcmask 23552  }
0x2bea   :  { %v3271_v10 = vpack.c.bf16 %v3270_v12, %v3270_v12  ;;  %v2883_v35 = vpop.permute.xlu0 %2882 }
0x2beb   :  { %v2885_v46 = vsel %vm1950_vm1, %v2883_v35, 0.0 }
0x2bec   :  { %3600 = vmatmul.mubr.msk.bf16.vlgmr.msra.gmra.mrb[24].mxu0 %vm1869_vm15, %v3271_v10  ;;  %2886 = vadd.xlane.f32.xlu1 %v2885_v46 }
0x2c79   :  { %v2887_v29 = vpop.xlane.xlu1 %2886 }
0x2c7a   :  { %v2888_v44 = vadd.f32 %v3847_v37, %v2887_v29 }
0x2c7c   :  { %3274 = vperm.xlu0 %3620, %v2888_v44   ;;  %v3435_v40 = vmul.f32 -1.442695, %v2888_v44 }
0x2c7e   :  { %3822 = vpow2.f32 %v3435_v40 }
0x2c88   :  { %v3823_v36 = vpop.eup %3822 }
0x2c89   :  { %v2892_v39 = vadd.f32 1.0, %v3823_v36 }
0x2cbf   :  { %v3315_v33 = vpop.f32.mrb[24].mxu0 }
0x2cc0   :  { %v3601_v0 = vpop.f32.mrb[25].mxu0 }
0x2cc1   :  { %v3318_v7 = vpop.f32.mrb[26].mxu0 }
0x2cc2   :  { %v3602_v42 = vpop.f32.mrb[27].mxu0 }
0x2cfb   :  { %v3275_v55 = vpop.permute.xlu0 %3274 }
0x2cfc   :  { %v3277_v16 = vmul.f32 %v5997_v1, %v3275_v55 }
0x2cfe   :  { %v3321_v3 = vadd.f32 %v3315_v33, %v3277_v16 }
0x2d00   :  { %v3322_v2 = vadd.f32 %v5998_v59, %v3321_v3 }
0x2d02   :  { %3824 = vtanh.f32 %v3322_v2  ;;  %v3437_v25 = vmul.f32 -1.442695, %v3322_v2 }
0x2d03   :  { %3826 = vrcp.f32 %v2425_v58 }
0x2d04   :  { %3828 = vrcp.f32 %v2892_v39 }
0x2d05   :  { %3830 = vpow2.f32 %v3437_v25 }
0x2d0c   :  { %v3825_v45 = vpop.eup %3824 }
0x2d0d   :  { %3332 = vrot.lane.b32.xlu1 %v3825_v45, %s3975_s0  ;;  %v3827_v5 = vpop.eup %3826 }
0x2d0e   :  { %v3829_v17 = vpop.eup %3828 }
0x2d0f   :  { %v3831_v48 = vpop.eup %3830 }
0x2d10   :  { %v3326_v56 = vadd.f32 1.0, %v3831_v48 }
0x2d11   :  { %3363 = vrot.lane.b32.xlu1 %v3827_v5, %s3978_s6 }
0x2d12   :  { %3832 = vrcp.f32 %v3326_v56 }
0x2d15   :  { %3367 = vrot.lane.b32.xlu1 %v3829_v17, %s3979_s11 }
0x2d1c   :  { %v3833_v60 = vpop.eup %3832 }
0x2d1d   :  { %v3330_v9 = vmul.f32 %v3833_v60, %v5999_v21 }
0x2d7f   :  { %v3333_v8 = vpop.permute.xlu1 %3332 }
0x2d80   :  { %v3335_v50 = vmul.f32 %v3833_v60, %v3333_v8 }
0x2d82   :  { %3337 = vrot.lane.b32.xlu0 %v3335_v50, %s3975_s0 }
0x2d83   :  { %v3364_v38 = vpop.permute.xlu1 %3363 }
0x2d87   :  { %v3368_v32 = vpop.permute.xlu1 %3367 }
0x2df4   :  { %v3338_v4 = vpop.permute.xlu0 %3337 }
0x2df5   :  { %v3340_v13 = vadd.f32 %v3338_v4, %v3330_v9 }
0x2df7   :  { %3834 = vtanh.f32 %v3340_v13 }
0x2e01   :  { %v3835_v43 = vpop.eup %3834 }
0x2e02   :  { %3343 = vrot.lane.b32.xlu0 %v3835_v43, %s3975_s0 }
0x2e74   :  { %v3344_v31 = vpop.permute.xlu0 %3343 }
0x2e75   :  { %v3346_v54 = vmul.f32 %v3833_v60, %v3344_v31 }
0x2e77   :  { %v3347_v27 = vmul.f32 %v3346_v54, %v5991_v11 }
0x2e79   :  { %3349 = vrot.lane.b32.xlu0 %v3347_v27, %s3967_s20  ;;  %s3981_s20 = smov [#allocation11]  }
0x2e7a   :  { %s3388_s14 = sshll.u32 %s3981_s20, 4  ;;  %s3389_s14 = int_to_ptr.vmem [resolvable:$true] %s3388_s14 }
0x2e7b   :  { %s3936_s2 = scalar_lea.vmem %s3389_s14, 32  ;;  %p3941_p5 = scmp.lt.s32.totalorder %s3389_s14, %s3389_s14 }
0x2e7c   :  { %p3937_p4 = scmp.ne.s32.totalorder %s3389_s14, %s3936_s2  ;;  %p3942_p6 = scmp.lt.s32.totalorder %s3936_s2, %s3936_s2 }
0x2e7e   :  { %p3943_p7 = por %p3942_p6, %p3941_p5 }
0x2e80   :  { %p3944_p8 = pnand %p3943_p7, %p3937_p4 }
0x2eeb   :  { %v3350_v61 = vpop.permute.xlu0 %3349 }
0x2eec   :  { %v3352_v18 = vsel %vm1950_vm1, %v3350_v61, 0.0 }
0x2eed   :  { %3353 = vadd.xlane.f32.xlu0 %v3352_v18 }
0x2f7a   :  { %v3354_v57 = vpop.xlane.xlu0 %3353 }
0x2f7b   :  { %v3355_v14 = vadd.f32 %v3847_v37, %v3354_v57 }
0x2f7d   :  { %v3438_v49 = vmul.f32 -1.442695, %v3355_v14 }
0x2f7f   :  { %3836 = vpow2.f32 %v3438_v49 }
0x2f89   :  { %v3837_v15 = vpop.eup %3836 }
0x2f8a   :  { %v3359_v24 = vadd.f32 1.0, %v3837_v15 }
0x2f8c   :  { %3838 = vrcp.f32 %v3359_v24 }
0x2f8d   :  { %3840 = vpow2.f32 %v3429_v22 }
0x2f96   :  { %v3839_v41 = vpop.eup %3838 }
0x2f97   :  { %3371 = vrot.lane.b32.xlu1 %v3839_v41, %s3980_s13  ;;  %v3841_v11 = vpop.eup %3840 }
0x2f98   :  { %v1958_v34 = vadd.f32 1.0, %v3841_v11 }
0x2f9a   :  { %3842 = vrcp.f32 %v1958_v34 }
0x2fa4   :  { %v3843_v30 = vpop.eup %3842 }
0x2fa5   :  { %v3375_v62 = vsel %vm3374_vm0, %v3843_v30, %v3364_v38 }
0x2fa6   :  { %v3377_v63 = vsel %vm3376_vm2, %v3375_v62, %v3368_v32 }
0x3009   :  { %v3372_v20 = vpop.permute.xlu1 %3371 }
0x300a   :  { %v3379_v47 = vsel %vm3378_vm3, %v3377_v63, %v3372_v20 }
0x300b   :  { %3381 = vst.msk [vmem:[#allocation11] sm:$0x3] %vm3380_vm4, %v3379_v47 }
0x300c   :  { %3947 = shalt.err (!%p3944_p8)
}
0x300d   :  { %s3948_s27 = scalar_lea.hbm %s5527_s9, 32 }
0x300e   :  { %p3949_p9 = scmp.ne.s32.totalorder %s5527_s9, %s3948_s27  ;;  %p3952_p10 = scmp.lt.u32.totalorder %s3948_s27, %s5527_s9 }
0x3010   :  { %p3954_p11 = pnand %p3952_p10, %p3949_p9 }
0x3012   :  { %3957 = shalt.err (!%p3954_p11)
}
0x3013   :  { %3391 = dma.vmem_to_hbm [thread:$0]  %s3389_s14, 32, %s5527_s9, [#allocation5]  }
0x3014   :  { %3964 = dma.done.wait [#allocation5], 32  }
0x3015   :  { %3965 = vsyncadd [#allocation5], 4294967264 }
0x3016   :  { %3395 = vsyncpa [#allocation4], 1 }
0x3017   :  { %3396 = vsyncpa [#allocation7], 1 }
0x3018   :  { %3397 = vsyncpa [#allocation10], 1 }
0x3019   :  { %3398 = vsyncpa [#allocation5], 1 }

</bundles_post_ra>
